<compile_context>
chip_gen: v7x
topology: tpu7x:2x2x1
jax: 0.10.0
libtpu: 0.0.40
codegen_flags: <defaults>
</compile_context>

<pallas_src>
import jax
import jax.numpy as jnp
import numpy as np
from jax import lax
from jax.experimental import pallas as pl
from jax.experimental.pallas import tpu as pltpu


def _round_up(x, m):
    return (x + m - 1) // m * m


# ----------------------------------------------------------------------------
# Kernel 1: tiled matmul (bf16 in, f32 acc, bf16 out) + fused BN column stats.
#   a: (M, K)  b: (K, C)  ->  y: (Mp, C) bf16,  ssum/ssq: (1, C) f32 col sums.
# Grid = (C tiles, M tiles).  The (1, tc) stats blocks are resident across the
# inner row axis (init at its first step), so the C axis is "parallel" and the
# row axis "arbitrary"; per-channel group folding happens in JAX glue.
# ----------------------------------------------------------------------------
def _mm_stats_kernel(a_ref, b_ref, y_ref, ssum_ref, ssq_ref):
    y = jnp.dot(a_ref[...], b_ref[...], preferred_element_type=jnp.float32)
    y_ref[...] = y.astype(y_ref.dtype)

    @pl.when(pl.program_id(1) == 0)
    def _():
        ssum_ref[...] = jnp.zeros_like(ssum_ref)
        ssq_ref[...] = jnp.zeros_like(ssq_ref)

    ssum_ref[...] += jnp.sum(y, axis=0, keepdims=True)
    ssq_ref[...] += jnp.sum(y * y, axis=0, keepdims=True)


def matmul_bn_stats(a, b, *, tc, max_tm=1024):
    """a: (M, K) @ b: (K, C) -> y (Mp, C) bf16, ssum/ssq (1, C) f32."""
    M, K = a.shape
    C = b.shape[1]
    assert C % tc == 0 and tc % 128 == 0
    a = a.astype(jnp.bfloat16)
    b = b.astype(jnp.bfloat16)
    tm = min(max_tm, _round_up(M, 8))
    Mp = _round_up(M, tm)
    a = jnp.pad(a, ((0, Mp - M), (0, 0)))            # zero rows: stats-neutral
    y, ssum, ssq = pl.pallas_call(
        _mm_stats_kernel,
        out_shape=(jax.ShapeDtypeStruct((Mp, C), jnp.bfloat16),
                   jax.ShapeDtypeStruct((1, C), jnp.float32),
                   jax.ShapeDtypeStruct((1, C), jnp.float32)),
        grid_spec=pltpu.PrefetchScalarGridSpec(
            num_scalar_prefetch=0,
            grid=(C // tc, Mp // tm),
            in_specs=[
                pl.BlockSpec((tm, K), lambda c, m: (m, 0)),
                pl.BlockSpec((K, tc), lambda c, m: (0, c)),
            ],
            out_specs=(
                pl.BlockSpec((tm, tc), lambda c, m: (m, c)),
                pl.BlockSpec((1, tc), lambda c, m: (0, c)),
                pl.BlockSpec((1, tc), lambda c, m: (0, c)),
            ),
        ),
        compiler_params=pltpu.CompilerParams(
            dimension_semantics=("parallel", "arbitrary")),
    )(a, b)
    return y, ssum, ssq


# ----------------------------------------------------------------------------
# Kernel 2: BN apply (y * scale + shift), ReLU, bf16 out -- lane-dense rows.
# ----------------------------------------------------------------------------
def _bn_relu_kernel(y_ref, s_ref, h_ref, o_ref):
    o_ref[...] = jnp.maximum(
        y_ref[...].astype(jnp.float32) * s_ref[...] + h_ref[...], 0.0
    ).astype(o_ref.dtype)


def bn_relu_apply(y, scale, shift, *, max_tm=1024, out_dtype=jnp.bfloat16):
    M, C = y.shape
    tm = min(max_tm, _round_up(M, 8))
    Mp = _round_up(M, tm)
    y = jnp.pad(y, ((0, Mp - M), (0, 0)))
    out = pl.pallas_call(
        _bn_relu_kernel,
        out_shape=jax.ShapeDtypeStruct((Mp, C), out_dtype),
        grid_spec=pltpu.PrefetchScalarGridSpec(
            num_scalar_prefetch=0,
            grid=(Mp // tm,),
            in_specs=[
                pl.BlockSpec((tm, C), lambda i: (i, 0)),
                pl.BlockSpec((1, C), lambda i: (0, 0)),
                pl.BlockSpec((1, C), lambda i: (0, 0)),
            ],
            out_specs=pl.BlockSpec((tm, C), lambda i: (i, 0)),
        ),
        compiler_params=pltpu.CompilerParams(dimension_semantics=("parallel",)),
    )(y, scale.reshape(1, C).astype(jnp.float32),
      shift.reshape(1, C).astype(jnp.float32))
    return out[:M]


# ----------------------------------------------------------------------------
# Kernel 3: layer-3 (Cout=1) matmul + bias + tanh, lane-dense (phases, M) out.
#   out(8, M) = tanh( W(8, Kp) . patches(M, Kp)^T + b )
# Contraction on the shared last (lane) dim keeps patches channel-minor in HBM
# (no lane-axis transpose glue) while the output tile stays lane-dense in M.
# ----------------------------------------------------------------------------
def _convT_tanh_kernel(w_ref, p_ref, b_ref, o_ref):
    acc = lax.dot_general(
        w_ref[...], p_ref[...],
        dimension_numbers=(((1,), (1,)), ((), ())),
        preferred_element_type=jnp.float32)
    o_ref[...] = jnp.tanh(acc + b_ref[...]).astype(o_ref.dtype)


def convT_tanh_lane_dense(w, patches, bias, *, max_tn=2048):
    """w: (8, Kp), patches: (M, Kp), bias: (8, 1) -> (8, Mp) bf16."""
    P8, Kp = w.shape
    M = patches.shape[0]
    w = w.astype(jnp.bfloat16)
    patches = patches.astype(jnp.bfloat16)
    tn = min(max_tn, _round_up(M, 128))
    Mp = _round_up(M, tn)
    patches = jnp.pad(patches, ((0, Mp - M), (0, 0)))
    return pl.pallas_call(
        _convT_tanh_kernel,
        out_shape=jax.ShapeDtypeStruct((P8, Mp), jnp.bfloat16),
        grid_spec=pltpu.PrefetchScalarGridSpec(
            num_scalar_prefetch=0,
            grid=(Mp // tn,),
            in_specs=[
                pl.BlockSpec((P8, Kp), lambda i: (0, 0)),
                pl.BlockSpec((tn, Kp), lambda i: (i, 0)),
                pl.BlockSpec((P8, 1), lambda i: (0, 0)),
            ],
            out_specs=pl.BlockSpec((P8, tn), lambda i: (0, i)),
        ),
        compiler_params=pltpu.CompilerParams(dimension_semantics=("parallel",)),
    )(w, patches, bias.astype(jnp.float32))


# ----------------------------------------------------------------------------
# Plain-JAX glue: BN scale/shift, shared-3x3 patches, merged sub-pixel weights.
# ----------------------------------------------------------------------------
def _bn_scale_shift(ssum, ssq, count, gamma, beta, groups, eps=1e-5):
    """Fold (1, groups*C) column sums over groups -> training-mode BN affine."""
    C = gamma.shape[0]
    s = jnp.sum(ssum.reshape(groups, C), axis=0)
    q = jnp.sum(ssq.reshape(groups, C), axis=0)
    mean = s / count
    var = jnp.maximum(q / count - mean * mean, 0.0)
    inv = gamma * lax.rsqrt(var + eps)
    return inv, beta - mean * inv


def _shared_patches(x):
    """x: (N,H,W,C) NHWC -> (N*H*W, 9*C) zero-padded 3x3 patches, tap-major /
    channel-minor.  Channels stay on the lane axis: no lane transposes."""
    N, H, W, C = x.shape
    xp = jnp.pad(x, ((0, 0), (1, 1), (1, 1), (0, 0)))
    slabs = [xp[:, a:a + H, b:b + W, :] for a in range(3) for b in range(3)]
    p = jnp.stack(slabs, axis=3)                      # (N, H, W, 9, C)
    return p.reshape(N * H * W, 9 * C)


# ConvTranspose2d(k=4, s=2, p=1) sub-pixel decomposition: output row 2h+ph is
# fed by input rows {h-1, h} through kernel rows {3, 1} when ph == 0, and by
# {h, h+1} through kernel rows {2, 0} when ph == 1 (taps a of the 3x3 window).
_PHASE_TAPS = {0: ((0, 3), (1, 1)), 1: ((1, 2), (2, 0))}


def _merged_convT_weight(w):
    """ConvTranspose2d weight (Cin, Cout, 4, 4) -> (9*Cin, 4*Cout): all 4
    output phases merged over the shared 3x3 neighbourhood (structural zeros
    at unused taps); columns phase-major / channel-minor."""
    cin, cout = w.shape[0], w.shape[1]
    wm = jnp.zeros((9, cin, 4, cout), jnp.float32)
    for ph in range(2):
        for pw_ in range(2):
            p = 2 * ph + pw_
            for a, kh in _PHASE_TAPS[ph]:
                for b, kw in _PHASE_TAPS[pw_]:
                    wm = wm.at[3 * a + b, :, p, :].set(w[:, :, kh, kw])
    return wm.reshape(9 * cin, 4 * cout)


# ----------------------------------------------------------------------------
# Generator forward (Pallas)
# ----------------------------------------------------------------------------
@jax.jit
def generator_forward(z, params):
    N = z.shape[0]

    # -- Layer 1: ConvT(100->128, k7, s1, p0) on a 1x1 input = outer product.
    #    (N,128K) @ (128K, 49*128), C-tiled (tc=896).  b1 dropped: cancelled
    #    exactly by training-mode BatchNorm.
    z2d = jnp.pad(z.reshape(N, 100), ((0, 0), (0, 28)))              # K 100->128
    w1m = params["w1"].transpose(0, 2, 3, 1).reshape(100, 49 * 128)
    w1m = jnp.pad(w1m, ((0, 28), (0, 0)))
    y1, ss1, sq1 = matmul_bn_stats(z2d, w1m, tc=896, max_tm=512)     # bf16
    s1, h1 = _bn_scale_shift(ss1, sq1, N * 49,
                             params["g1"], params["be1"], groups=49)
    Mp1 = y1.shape[0]
    x1 = bn_relu_apply(y1.reshape(Mp1 * 49, 128), s1, h1)            # 128 lanes
    x1 = x1[:N * 49].reshape(N, 7, 7, 128)                           # NHWC 7x7

    # -- Layer 2: ConvT(128->64, k4, s2, p1): all 4 sub-pixel phases merged
    #    into one 256-column lane-dense matmul over shared 3x3 patches.
    #    b2 dropped (cancelled by BN).
    p2 = _shared_patches(x1)                                         # (M2, 1152)
    w2m = _merged_convT_weight(params["w2"])                         # (1152, 256)
    y2, ss2, sq2 = matmul_bn_stats(p2, w2m, tc=256, max_tm=1024)     # bf16
    s2, h2 = _bn_scale_shift(ss2, sq2, 4 * N * 49,
                             params["g2"], params["be2"], groups=4)
    x2 = bn_relu_apply(y2, jnp.tile(s2, 4), jnp.tile(h2, 4))         # 256 lanes
    M2 = N * 49
    x2 = x2[:M2].reshape(N, 7, 7, 2, 2, 64)
    x2 = x2.transpose(0, 1, 3, 2, 4, 5).reshape(N, 14, 14, 64)       # NHWC 14x14

    # -- Layer 3: ConvT(64->1, k4, s2, p1) + tanh; channel-minor patches,
    #    lane-dense (8, M) bf16 output, bias+tanh fused.
    p3 = jnp.pad(_shared_patches(x2), ((0, 0), (0, 64)))             # 576 -> 640
    w3m = _merged_convT_weight(params["w3"]).T                       # (4, 576)
    w3m = jnp.pad(w3m, ((0, 4), (0, 64)))                            # (8, 640)
    bias8 = jnp.broadcast_to(params["b3"].reshape(1, 1), (8, 1))
    y3 = convT_tanh_lane_dense(w3m, p3, bias8, max_tn=2048)          # (8, M3p)
    M3 = N * 196
    out = y3[:4, :M3].astype(jnp.float32).reshape(2, 2, N, 14, 14)
    out = out.transpose(2, 3, 0, 4, 1).reshape(N, 28, 28)
    return out[:, None, :, :]                                        # NCHW f32


# ----------------------------------------------------------------------------
# Pure-JAX reference (different code path: XLA conv) for a numerics cross-check
# ----------------------------------------------------------------------------
def _convT_ref(x, W, b, stride, padding):
    k = W.shape[2]
    w_conv = jnp.flip(W, (2, 3)).transpose(1, 0, 2, 3)   # (Cout, Cin, k, k)
    pad = k - 1 - padding
    y = lax.conv_general_dilated(
        x, w_conv, window_strides=(1, 1), padding=[(pad, pad), (pad, pad)],
        lhs_dilation=(stride, stride),
        dimension_numbers=("NCHW", "OIHW", "NCHW"),
        precision=lax.Precision.HIGHEST)
    return y + b.reshape(1, -1, 1, 1)


def _bn_relu_ref(x, g, b, eps=1e-5):
    mean = x.mean(axis=(0, 2, 3), keepdims=True)
    var = ((x - mean) ** 2).mean(axis=(0, 2, 3), keepdims=True)
    xn = (x - mean) * lax.rsqrt(var + eps)
    return jnp.maximum(xn * g.reshape(1, -1, 1, 1) + b.reshape(1, -1, 1, 1), 0.0)


@jax.jit
def reference_forward(z, params):
    x = _bn_relu_ref(_convT_ref(z, params["w1"], params["b1"], 1, 0),
                     params["g1"], params["be1"])
    x = _bn_relu_ref(_convT_ref(x, params["w2"], params["b2"], 2, 1),
                     params["g2"], params["be2"])
    return jnp.tanh(_convT_ref(x, params["w3"], params["b3"], 2, 1))


# ----------------------------------------------------------------------------
if __name__ == "__main__":
    key = jax.random.PRNGKey(0)
    ks = jax.random.split(key, 12)
    N = 2
    z = jax.random.normal(ks[0], (N, 100, 1, 1), jnp.float32)

    params = {
        "w1": 0.05 * jax.random.normal(ks[1], (100, 128, 7, 7), jnp.float32),
        "b1": 0.05 * jax.random.normal(ks[2], (128,), jnp.float32),
        "g1": 1.0 + 0.1 * jax.random.normal(ks[3], (128,), jnp.float32),
        "be1": 0.1 * jax.random.normal(ks[4], (128,), jnp.float32),
        "w2": 0.05 * jax.random.normal(ks[5], (128, 64, 4, 4), jnp.float32),
        "b2": 0.05 * jax.random.normal(ks[6], (64,), jnp.float32),
        "g2": 1.0 + 0.1 * jax.random.normal(ks[7], (64,), jnp.float32),
        "be2": 0.1 * jax.random.normal(ks[8], (64,), jnp.float32),
        "w3": 0.05 * jax.random.normal(ks[9], (64, 1, 4, 4), jnp.float32),
        "b3": 0.05 * jax.random.normal(ks[10], (1,), jnp.float32),
    }

    out = jax.block_until_ready(generator_forward(z, params))
    assert out.shape == (N, 1, 28, 28), out.shape

    ref = jax.block_until_ready(reference_forward(z, params))
    # bf16 activations end-to-end (MXU inputs + HBM intermediates, f32 MXU
    # accumulation and f32 BN stats) vs an f32 HIGHEST-precision reference.
    np.testing.assert_allclose(np.asarray(out), np.asarray(ref),
                               atol=4e-2, rtol=4e-2)

    print("KERNEL_OK")
</pallas_src>

<mosaic_0001>
module attributes {stable_mosaic.version = 11 : i64} {
  func.func @_mm_stats_kernel(%arg0: i32, %arg1: i32, %arg2: memref<8x128xbf16, #tpu.memory_space<vmem>>, %arg3: memref<128x896xbf16, #tpu.memory_space<vmem>>, %arg4: memref<8x896xbf16, #tpu.memory_space<vmem>>, %arg5: memref<1x896xf32, #tpu.memory_space<vmem>>, %arg6: memref<1x896xf32, #tpu.memory_space<vmem>>) attributes {dimension_semantics = [#tpu.dimension_semantics<parallel>, #tpu.dimension_semantics<arbitrary>], iteration_bounds = array<i64: 7, 1>, scalar_prefetch = 0 : i64, scratch_operands = 0 : i64, tpu.core_type = #tpu.core_type<tc>, window_params = [{transform_indices = @transform_0, window_bounds = array<i64: 8, 128>}, {transform_indices = @transform_1, window_bounds = array<i64: 128, 896>}, {transform_indices = @transform_2, window_bounds = array<i64: 8, 896>}, {transform_indices = @transform_3, window_bounds = array<i64: 1, 896>}, {transform_indices = @transform_4, window_bounds = array<i64: 1, 896>}]} {
    %c0 = arith.constant 0 : index
    %c0_0 = arith.constant 0 : index
    %0 = vector.load %arg2[%c0, %c0_0] : memref<8x128xbf16, #tpu.memory_space<vmem>>, vector<8x128xbf16>
    %c0_1 = arith.constant 0 : index
    %c0_2 = arith.constant 0 : index
    %1 = vector.load %arg3[%c0_1, %c0_2] : memref<128x896xbf16, #tpu.memory_space<vmem>>, vector<128x896xbf16>
    %cst = arith.constant dense<0.000000e+00> : vector<8x896xf32>
    %2 = tpu.matmul %0, %1, %cst {dimension_numbers = #tpu.dot_dimension_numbers<[1], [0], [0], [1], [0, 0, 1, 1], [], []>} : vector<8x128xbf16>, vector<128x896xbf16>, vector<8x896xf32> -> vector<8x896xf32>
    %3 = arith.truncf %2 : vector<8x896xf32> to vector<8x896xbf16>
    %c0_3 = arith.constant 0 : index
    %c0_4 = arith.constant 0 : index
    %4 = vector.load %arg4[%c0_3, %c0_4] : memref<8x896xbf16, #tpu.memory_space<vmem>>, vector<8x896xbf16>
    tpu.vector_store %arg4[%c0_3, %c0_4], %3 {strides = array<i32>} : memref<8x896xbf16, #tpu.memory_space<vmem>>, vector<8x896xbf16>,
    %c0_i32 = arith.constant 0 : i32
    %5 = arith.cmpi eq, %arg1, %c0_i32 : i32
    %6 = arith.extui %5 : i1 to i32
    %c0_i32_5 = arith.constant 0 : i32
    %7 = arith.cmpi ne, %6, %c0_i32_5 : i32
    scf.if %7 {
      %cst_16 = arith.constant 0.000000e+00 : f32
      %19 = vector.broadcast %cst_16 : f32 to vector<1x896xf32>
      %c0_17 = arith.constant 0 : index
      %c0_18 = arith.constant 0 : index
      %20 = vector.load %arg5[%c0_17, %c0_18] : memref<1x896xf32, #tpu.memory_space<vmem>>, vector<1x896xf32>
      tpu.vector_store %arg5[%c0_17, %c0_18], %19 {strides = array<i32>} : memref<1x896xf32, #tpu.memory_space<vmem>>, vector<1x896xf32>,
      %cst_19 = arith.constant 0.000000e+00 : f32
      %21 = vector.broadcast %cst_19 : f32 to vector<1x896xf32>
      %c0_20 = arith.constant 0 : index
      %c0_21 = arith.constant 0 : index
      %22 = vector.load %arg6[%c0_20, %c0_21] : memref<1x896xf32, #tpu.memory_space<vmem>>, vector<1x896xf32>
      tpu.vector_store %arg6[%c0_20, %c0_21], %21 {strides = array<i32>} : memref<1x896xf32, #tpu.memory_space<vmem>>, vector<1x896xf32>,
    } else {
    }
    %c0_6 = arith.constant 0 : index
    %c0_7 = arith.constant 0 : index
    %8 = vector.load %arg5[%c0_6, %c0_7] : memref<1x896xf32, #tpu.memory_space<vmem>>, vector<1x896xf32>
    %cst_8 = arith.constant dense<0.000000e+00> : vector<896xf32>
    %9 = vector.multi_reduction <add>, %2, %cst_8 [0] : vector<8x896xf32> to vector<896xf32>
    %10 = vector.shape_cast %9 : vector<896xf32> to vector<1x896xf32>
    %11 = arith.addf %8, %10 : vector<1x896xf32>
    %c0_9 = arith.constant 0 : index
    %c0_10 = arith.constant 0 : index
    %12 = vector.load %arg5[%c0_9, %c0_10] : memref<1x896xf32, #tpu.memory_space<vmem>>, vector<1x896xf32>
    tpu.vector_store %arg5[%c0_9, %c0_10], %11 {strides = array<i32>} : memref<1x896xf32, #tpu.memory_space<vmem>>, vector<1x896xf32>,
    %c0_11 = arith.constant 0 : index
    %c0_12 = arith.constant 0 : index
    %13 = vector.load %arg6[%c0_11, %c0_12] : memref<1x896xf32, #tpu.memory_space<vmem>>, vector<1x896xf32>
    %14 = arith.mulf %2, %2 : vector<8x896xf32>
    %cst_13 = arith.constant dense<0.000000e+00> : vector<896xf32>
    %15 = vector.multi_reduction <add>, %14, %cst_13 [0] : vector<8x896xf32> to vector<896xf32>
    %16 = vector.shape_cast %15 : vector<896xf32> to vector<1x896xf32>
    %17 = arith.addf %13, %16 : vector<1x896xf32>
    %c0_14 = arith.constant 0 : index
    %c0_15 = arith.constant 0 : index
    %18 = vector.load %arg6[%c0_14, %c0_15] : memref<1x896xf32, #tpu.memory_space<vmem>>, vector<1x896xf32>
    tpu.vector_store %arg6[%c0_14, %c0_15], %17 {strides = array<i32>} : memref<1x896xf32, #tpu.memory_space<vmem>>, vector<1x896xf32>,
    return
  }
  func.func @transform_0(%arg0: i32, %arg1: i32) -> (i32, i32) {
    %c0_i32 = arith.constant 0 : i32
    %c0_i32_0 = arith.constant 0 : i32
    return %arg1, %c0_i32 : i32, i32
  }
  func.func @transform_1(%arg0: i32, %arg1: i32) -> (i32, i32) {
    %c0_i32 = arith.constant 0 : i32
    %c0_i32_0 = arith.constant 0 : i32
    return %c0_i32, %arg0 : i32, i32
  }
  func.func @transform_2(%arg0: i32, %arg1: i32) -> (i32, i32) {
    %c0_i32 = arith.constant 0 : i32
    return %arg1, %arg0 : i32, i32
  }
  func.func @transform_3(%arg0: i32, %arg1: i32) -> (i32, i32) {
    %c0_i32 = arith.constant 0 : i32
    %c0_i32_0 = arith.constant 0 : i32
    return %c0_i32, %arg0 : i32, i32
  }
  func.func @transform_4(%arg0: i32, %arg1: i32) -> (i32, i32) {
    %c0_i32 = arith.constant 0 : i32
    %c0_i32_0 = arith.constant 0 : i32
    return %c0_i32, %arg0 : i32, i32
  }
}

module attributes {stable_mosaic.version = 11 : i64} {
  func.func @_bn_relu_kernel(%arg0: i32, %arg1: memref<392x128xbf16, #tpu.memory_space<vmem>>, %arg2: memref<1x128xf32, #tpu.memory_space<vmem>>, %arg3: memref<1x128xf32, #tpu.memory_space<vmem>>, %arg4: memref<392x128xbf16, #tpu.memory_space<vmem>>) attributes {dimension_semantics = [#tpu.dimension_semantics<parallel>], iteration_bounds = array<i64: 1>, scalar_prefetch = 0 : i64, scratch_operands = 0 : i64, tpu.core_type = #tpu.core_type<tc>, window_params = [{transform_indices = @transform_0, window_bounds = array<i64: 392, 128>}, {pipeline_mode = #tpu.pipeline_mode<synchronous>, transform_indices = @transform_1, window_bounds = array<i64: 1, 128>}, {pipeline_mode = #tpu.pipeline_mode<synchronous>, transform_indices = @transform_2, window_bounds = array<i64: 1, 128>}, {transform_indices = @transform_3, window_bounds = array<i64: 392, 128>}]} {
    %c0 = arith.constant 0 : index
    %c0_0 = arith.constant 0 : index
    %0 = vector.load %arg1[%c0, %c0_0] : memref<392x128xbf16, #tpu.memory_space<vmem>>, vector<392x128xbf16>
    %1 = arith.extf %0 : vector<392x128xbf16> to vector<392x128xf32>
    %c0_1 = arith.constant 0 : index
    %c0_2 = arith.constant 0 : index
    %2 = vector.load %arg2[%c0_1, %c0_2] : memref<1x128xf32, #tpu.memory_space<vmem>>, vector<1x128xf32>
    %3 = vector.broadcast %2 : vector<1x128xf32> to vector<392x128xf32>
    %4 = arith.mulf %1, %3 : vector<392x128xf32>
    %c0_3 = arith.constant 0 : index
    %c0_4 = arith.constant 0 : index
    %5 = vector.load %arg3[%c0_3, %c0_4] : memref<1x128xf32, #tpu.memory_space<vmem>>, vector<1x128xf32>
    %6 = vector.broadcast %5 : vector<1x128xf32> to vector<392x128xf32>
    %7 = arith.addf %4, %6 : vector<392x128xf32>
    %cst = arith.constant 0.000000e+00 : f32
    %8 = vector.broadcast %cst : f32 to vector<392x128xf32>
    %9 = arith.maximumf %7, %8 : vector<392x128xf32>
    %10 = arith.truncf %9 : vector<392x128xf32> to vector<392x128xbf16>
    %c0_5 = arith.constant 0 : index
    %c0_6 = arith.constant 0 : index
    %11 = vector.load %arg4[%c0_5, %c0_6] : memref<392x128xbf16, #tpu.memory_space<vmem>>, vector<392x128xbf16>
    tpu.vector_store %arg4[%c0_5, %c0_6], %10 {strides = array<i32>} : memref<392x128xbf16, #tpu.memory_space<vmem>>, vector<392x128xbf16>,
    return
  }
  func.func @transform_0(%arg0: i32) -> (i32, i32) {
    %c0_i32 = arith.constant 0 : i32
    %c0_i32_0 = arith.constant 0 : i32
    return %arg0, %c0_i32 : i32, i32
  }
  func.func @transform_1(%arg0: i32) -> (i32, i32) {
    %c0_i32 = arith.constant 0 : i32
    %c0_i32_0 = arith.constant 0 : i32
    %c0_i32_1 = arith.constant 0 : i32
    return %c0_i32, %c0_i32_0 : i32, i32
  }
  func.func @transform_2(%arg0: i32) -> (i32, i32) {
    %c0_i32 = arith.constant 0 : i32
    %c0_i32_0 = arith.constant 0 : i32
    %c0_i32_1 = arith.constant 0 : i32
    return %c0_i32, %c0_i32_0 : i32, i32
  }
  func.func @transform_3(%arg0: i32) -> (i32, i32) {
    %c0_i32 = arith.constant 0 : i32
    %c0_i32_0 = arith.constant 0 : i32
    return %arg0, %c0_i32 : i32, i32
  }
}

module attributes {stable_mosaic.version = 11 : i64} {
  func.func @_mm_stats_kernel(%arg0: i32, %arg1: i32, %arg2: memref<104x1152xbf16, #tpu.memory_space<vmem>>, %arg3: memref<1152x256xbf16, #tpu.memory_space<vmem>>, %arg4: memref<104x256xbf16, #tpu.memory_space<vmem>>, %arg5: memref<1x256xf32, #tpu.memory_space<vmem>>, %arg6: memref<1x256xf32, #tpu.memory_space<vmem>>) attributes {dimension_semantics = [#tpu.dimension_semantics<parallel>, #tpu.dimension_semantics<arbitrary>], iteration_bounds = array<i64: 1, 1>, scalar_prefetch = 0 : i64, scratch_operands = 0 : i64, tpu.core_type = #tpu.core_type<tc>, window_params = [{transform_indices = @transform_0, window_bounds = array<i64: 104, 1152>}, {transform_indices = @transform_1, window_bounds = array<i64: 1152, 256>}, {transform_indices = @transform_2, window_bounds = array<i64: 104, 256>}, {transform_indices = @transform_3, window_bounds = array<i64: 1, 256>}, {transform_indices = @transform_4, window_bounds = array<i64: 1, 256>}]} {
    %c0 = arith.constant 0 : index
    %c0_0 = arith.constant 0 : index
    %0 = vector.load %arg2[%c0, %c0_0] : memref<104x1152xbf16, #tpu.memory_space<vmem>>, vector<104x1152xbf16>
    %c0_1 = arith.constant 0 : index
    %c0_2 = arith.constant 0 : index
    %1 = vector.load %arg3[%c0_1, %c0_2] : memref<1152x256xbf16, #tpu.memory_space<vmem>>, vector<1152x256xbf16>
    %cst = arith.constant dense<0.000000e+00> : vector<104x256xf32>
    %2 = tpu.matmul %0, %1, %cst {dimension_numbers = #tpu.dot_dimension_numbers<[1], [0], [0], [1], [0, 0, 1, 1], [], []>} : vector<104x1152xbf16>, vector<1152x256xbf16>, vector<104x256xf32> -> vector<104x256xf32>
    %3 = arith.truncf %2 : vector<104x256xf32> to vector<104x256xbf16>
    %c0_3 = arith.constant 0 : index
    %c0_4 = arith.constant 0 : index
    %4 = vector.load %arg4[%c0_3, %c0_4] : memref<104x256xbf16, #tpu.memory_space<vmem>>, vector<104x256xbf16>
    tpu.vector_store %arg4[%c0_3, %c0_4], %3 {strides = array<i32>} : memref<104x256xbf16, #tpu.memory_space<vmem>>, vector<104x256xbf16>,
    %c0_i32 = arith.constant 0 : i32
    %5 = arith.cmpi eq, %arg1, %c0_i32 : i32
    %6 = arith.extui %5 : i1 to i32
    %c0_i32_5 = arith.constant 0 : i32
    %7 = arith.cmpi ne, %6, %c0_i32_5 : i32
    scf.if %7 {
      %cst_16 = arith.constant 0.000000e+00 : f32
      %19 = vector.broadcast %cst_16 : f32 to vector<1x256xf32>
      %c0_17 = arith.constant 0 : index
      %c0_18 = arith.constant 0 : index
      %20 = vector.load %arg5[%c0_17, %c0_18] : memref<1x256xf32, #tpu.memory_space<vmem>>, vector<1x256xf32>
      tpu.vector_store %arg5[%c0_17, %c0_18], %19 {strides = array<i32>} : memref<1x256xf32, #tpu.memory_space<vmem>>, vector<1x256xf32>,
      %cst_19 = arith.constant 0.000000e+00 : f32
      %21 = vector.broadcast %cst_19 : f32 to vector<1x256xf32>
      %c0_20 = arith.constant 0 : index
      %c0_21 = arith.constant 0 : index
      %22 = vector.load %arg6[%c0_20, %c0_21] : memref<1x256xf32, #tpu.memory_space<vmem>>, vector<1x256xf32>
      tpu.vector_store %arg6[%c0_20, %c0_21], %21 {strides = array<i32>} : memref<1x256xf32, #tpu.memory_space<vmem>>, vector<1x256xf32>,
    } else {
    }
    %c0_6 = arith.constant 0 : index
    %c0_7 = arith.constant 0 : index
    %8 = vector.load %arg5[%c0_6, %c0_7] : memref<1x256xf32, #tpu.memory_space<vmem>>, vector<1x256xf32>
    %cst_8 = arith.constant dense<0.000000e+00> : vector<256xf32>
    %9 = vector.multi_reduction <add>, %2, %cst_8 [0] : vector<104x256xf32> to vector<256xf32>
    %10 = vector.shape_cast %9 : vector<256xf32> to vector<1x256xf32>
    %11 = arith.addf %8, %10 : vector<1x256xf32>
    %c0_9 = arith.constant 0 : index
    %c0_10 = arith.constant 0 : index
    %12 = vector.load %arg5[%c0_9, %c0_10] : memref<1x256xf32, #tpu.memory_space<vmem>>, vector<1x256xf32>
    tpu.vector_store %arg5[%c0_9, %c0_10], %11 {strides = array<i32>} : memref<1x256xf32, #tpu.memory_space<vmem>>, vector<1x256xf32>,
    %c0_11 = arith.constant 0 : index
    %c0_12 = arith.constant 0 : index
    %13 = vector.load %arg6[%c0_11, %c0_12] : memref<1x256xf32, #tpu.memory_space<vmem>>, vector<1x256xf32>
    %14 = arith.mulf %2, %2 : vector<104x256xf32>
    %cst_13 = arith.constant dense<0.000000e+00> : vector<256xf32>
    %15 = vector.multi_reduction <add>, %14, %cst_13 [0] : vector<104x256xf32> to vector<256xf32>
    %16 = vector.shape_cast %15 : vector<256xf32> to vector<1x256xf32>
    %17 = arith.addf %13, %16 : vector<1x256xf32>
    %c0_14 = arith.constant 0 : index
    %c0_15 = arith.constant 0 : index
    %18 = vector.load %arg6[%c0_14, %c0_15] : memref<1x256xf32, #tpu.memory_space<vmem>>, vector<1x256xf32>
    tpu.vector_store %arg6[%c0_14, %c0_15], %17 {strides = array<i32>} : memref<1x256xf32, #tpu.memory_space<vmem>>, vector<1x256xf32>,
    return
  }
  func.func @transform_0(%arg0: i32, %arg1: i32) -> (i32, i32) {
    %c0_i32 = arith.constant 0 : i32
    %c0_i32_0 = arith.constant 0 : i32
    return %arg1, %c0_i32 : i32, i32
  }
  func.func @transform_1(%arg0: i32, %arg1: i32) -> (i32, i32) {
    %c0_i32 = arith.constant 0 : i32
    %c0_i32_0 = arith.constant 0 : i32
    return %c0_i32, %arg0 : i32, i32
  }
  func.func @transform_2(%arg0: i32, %arg1: i32) -> (i32, i32) {
    %c0_i32 = arith.constant 0 : i32
    return %arg1, %arg0 : i32, i32
  }
  func.func @transform_3(%arg0: i32, %arg1: i32) -> (i32, i32) {
    %c0_i32 = arith.constant 0 : i32
    %c0_i32_0 = arith.constant 0 : i32
    return %c0_i32, %arg0 : i32, i32
  }
  func.func @transform_4(%arg0: i32, %arg1: i32) -> (i32, i32) {
    %c0_i32 = arith.constant 0 : i32
    %c0_i32_0 = arith.constant 0 : i32
    return %c0_i32, %arg0 : i32, i32
  }
}

module attributes {stable_mosaic.version = 11 : i64} {
  func.func @_bn_relu_kernel(%arg0: i32, %arg1: memref<104x256xbf16, #tpu.memory_space<vmem>>, %arg2: memref<1x256xf32, #tpu.memory_space<vmem>>, %arg3: memref<1x256xf32, #tpu.memory_space<vmem>>, %arg4: memref<104x256xbf16, #tpu.memory_space<vmem>>) attributes {dimension_semantics = [#tpu.dimension_semantics<parallel>], iteration_bounds = array<i64: 1>, scalar_prefetch = 0 : i64, scratch_operands = 0 : i64, tpu.core_type = #tpu.core_type<tc>, window_params = [{transform_indices = @transform_0, window_bounds = array<i64: 104, 256>}, {pipeline_mode = #tpu.pipeline_mode<synchronous>, transform_indices = @transform_1, window_bounds = array<i64: 1, 256>}, {pipeline_mode = #tpu.pipeline_mode<synchronous>, transform_indices = @transform_2, window_bounds = array<i64: 1, 256>}, {transform_indices = @transform_3, window_bounds = array<i64: 104, 256>}]} {
    %c0 = arith.constant 0 : index
    %c0_0 = arith.constant 0 : index
    %0 = vector.load %arg1[%c0, %c0_0] : memref<104x256xbf16, #tpu.memory_space<vmem>>, vector<104x256xbf16>
    %1 = arith.extf %0 : vector<104x256xbf16> to vector<104x256xf32>
    %c0_1 = arith.constant 0 : index
    %c0_2 = arith.constant 0 : index
    %2 = vector.load %arg2[%c0_1, %c0_2] : memref<1x256xf32, #tpu.memory_space<vmem>>, vector<1x256xf32>
    %3 = vector.broadcast %2 : vector<1x256xf32> to vector<104x256xf32>
    %4 = arith.mulf %1, %3 : vector<104x256xf32>
    %c0_3 = arith.constant 0 : index
    %c0_4 = arith.constant 0 : index
    %5 = vector.load %arg3[%c0_3, %c0_4] : memref<1x256xf32, #tpu.memory_space<vmem>>, vector<1x256xf32>
    %6 = vector.broadcast %5 : vector<1x256xf32> to vector<104x256xf32>
    %7 = arith.addf %4, %6 : vector<104x256xf32>
    %cst = arith.constant 0.000000e+00 : f32
    %8 = vector.broadcast %cst : f32 to vector<104x256xf32>
    %9 = arith.maximumf %7, %8 : vector<104x256xf32>
    %10 = arith.truncf %9 : vector<104x256xf32> to vector<104x256xbf16>
    %c0_5 = arith.constant 0 : index
    %c0_6 = arith.constant 0 : index
    %11 = vector.load %arg4[%c0_5, %c0_6] : memref<104x256xbf16, #tpu.memory_space<vmem>>, vector<104x256xbf16>
    tpu.vector_store %arg4[%c0_5, %c0_6], %10 {strides = array<i32>} : memref<104x256xbf16, #tpu.memory_space<vmem>>, vector<104x256xbf16>,
    return
  }
  func.func @transform_0(%arg0: i32) -> (i32, i32) {
    %c0_i32 = arith.constant 0 : i32
    %c0_i32_0 = arith.constant 0 : i32
    return %arg0, %c0_i32 : i32, i32
  }
  func.func @transform_1(%arg0: i32) -> (i32, i32) {
    %c0_i32 = arith.constant 0 : i32
    %c0_i32_0 = arith.constant 0 : i32
    %c0_i32_1 = arith.constant 0 : i32
    return %c0_i32, %c0_i32_0 : i32, i32
  }
  func.func @transform_2(%arg0: i32) -> (i32, i32) {
    %c0_i32 = arith.constant 0 : i32
    %c0_i32_0 = arith.constant 0 : i32
    %c0_i32_1 = arith.constant 0 : i32
    return %c0_i32, %c0_i32_0 : i32, i32
  }
  func.func @transform_3(%arg0: i32) -> (i32, i32) {
    %c0_i32 = arith.constant 0 : i32
    %c0_i32_0 = arith.constant 0 : i32
    return %arg0, %c0_i32 : i32, i32
  }
}

module attributes {stable_mosaic.version = 11 : i64} {
  func.func @_convT_tanh_kernel(%arg0: i32, %arg1: memref<8x640xbf16, #tpu.memory_space<vmem>>, %arg2: memref<512x640xbf16, #tpu.memory_space<vmem>>, %arg3: memref<8x1xf32, #tpu.memory_space<vmem>>, %arg4: memref<8x512xbf16, #tpu.memory_space<vmem>>) attributes {dimension_semantics = [#tpu.dimension_semantics<parallel>], iteration_bounds = array<i64: 1>, scalar_prefetch = 0 : i64, scratch_operands = 0 : i64, tpu.core_type = #tpu.core_type<tc>, window_params = [{pipeline_mode = #tpu.pipeline_mode<synchronous>, transform_indices = @transform_0, window_bounds = array<i64: 8, 640>}, {transform_indices = @transform_1, window_bounds = array<i64: 512, 640>}, {pipeline_mode = #tpu.pipeline_mode<synchronous>, transform_indices = @transform_2, window_bounds = array<i64: 8, 1>}, {transform_indices = @transform_3, window_bounds = array<i64: 8, 512>}]} {
    %c0 = arith.constant 0 : index
    %c0_0 = arith.constant 0 : index
    %0 = vector.load %arg1[%c0, %c0_0] : memref<8x640xbf16, #tpu.memory_space<vmem>>, vector<8x640xbf16>
    %c0_1 = arith.constant 0 : index
    %c0_2 = arith.constant 0 : index
    %1 = vector.load %arg2[%c0_1, %c0_2] : memref<512x640xbf16, #tpu.memory_space<vmem>>, vector<512x640xbf16>
    %cst = arith.constant dense<0.000000e+00> : vector<8x512xf32>
    %2 = tpu.matmul %0, %1, %cst {dimension_numbers = #tpu.dot_dimension_numbers<[1], [1], [0], [0], [0, 0, 1, 0], [], []>} : vector<8x640xbf16>, vector<512x640xbf16>, vector<8x512xf32> -> vector<8x512xf32>
    %c0_3 = arith.constant 0 : index
    %c0_4 = arith.constant 0 : index
    %3 = vector.load %arg3[%c0_3, %c0_4] : memref<8x1xf32, #tpu.memory_space<vmem>>, vector<8x1xf32>
    %4 = vector.broadcast %3 : vector<8x1xf32> to vector<8x512xf32>
    %5 = arith.addf %2, %4 : vector<8x512xf32>
    %6 = math.tanh %5 : vector<8x512xf32>
    %7 = arith.truncf %6 : vector<8x512xf32> to vector<8x512xbf16>
    %c0_5 = arith.constant 0 : index
    %c0_6 = arith.constant 0 : index
    %8 = vector.load %arg4[%c0_5, %c0_6] : memref<8x512xbf16, #tpu.memory_space<vmem>>, vector<8x512xbf16>
    tpu.vector_store %arg4[%c0_5, %c0_6], %7 {strides = array<i32>} : memref<8x512xbf16, #tpu.memory_space<vmem>>, vector<8x512xbf16>,
    return
  }
  func.func @transform_0(%arg0: i32) -> (i32, i32) {
    %c0_i32 = arith.constant 0 : i32
    %c0_i32_0 = arith.constant 0 : i32
    %c0_i32_1 = arith.constant 0 : i32
    return %c0_i32, %c0_i32_0 : i32, i32
  }
  func.func @transform_1(%arg0: i32) -> (i32, i32) {
    %c0_i32 = arith.constant 0 : i32
    %c0_i32_0 = arith.constant 0 : i32
    return %arg0, %c0_i32 : i32, i32
  }
  func.func @transform_2(%arg0: i32) -> (i32, i32) {
    %c0_i32 = arith.constant 0 : i32
    %c0_i32_0 = arith.constant 0 : i32
    %c0_i32_1 = arith.constant 0 : i32
    return %c0_i32, %c0_i32_0 : i32, i32
  }
  func.func @transform_3(%arg0: i32) -> (i32, i32) {
    %c0_i32 = arith.constant 0 : i32
    %c0_i32_0 = arith.constant 0 : i32
    return %c0_i32, %arg0 : i32, i32
  }
}

</mosaic_0001>

<bundles_post_ra>
// kernel: generator_forward.5
= control target key start
LH: loop header
LB: loop body
LE: loop exit
PB: predicated region body
PF: predicated region fallthrough
CT: control target
= control target key end

     0   :  { %s1683_s15 = smov 0   ;;  %s1685_s16 = smov 0   ;;  %s2015_s0 = inlined_call_operand.vmem [shape: bf16[8,128], index: 0, kind: input, shape index: {}]   ;;  %s2016_s1 = inlined_call_operand.vmem [shape: bf16[128,6272], index: 1, kind: input, shape index: {}]   ;;  %s2017_s2 = inlined_call_operand.vmem [shape: bf16[8,6272], index: 2, kind: output, shape index: {0}]   ;;  %s2018_s3 = inlined_call_operand.vmem [shape: f32[1,6272], index: 3, kind: output, shape index: {1}]   ;;  %s2019_s4 = inlined_call_operand.vmem [shape: f32[1,6272], index: 4, kind: output, shape index: {2}]  }
   0x1   :  { %s1687_s17 = smov 0   ;;  %s1689_s18 = smov 0  }
   0x2   :  { %s1691_s19 = smov 0  }
   0x3 LB: > { %s27_s20 = sadd.s32 1, %s1648_s18  ;;  %p67_p1 = scmp.ne.s32.totalorder %s1640_s16, %s1636_s15  ;;  %s1652_s19 = sphi %s1691_s19, %s15_s19   ;;  %s1648_s18 = sphi %s1689_s18, %s2025_s18   ;;  %s1644_s17 = sphi %s1687_s17, %s2024_s17   ;;  %s1640_s16 = sphi %s1685_s16, %s2023_s16   ;;  %s1636_s15 = sphi %s1683_s15, %s2022_s15  }
   0x4   : > { %p29_p0 = scmp.ge.s32.totalorder %s27_s20, 7  ;;  %p68_p2 = scmp.eq.s32.totalorder %s1652_s19, 0 }
   0x5   : > { %s60_s22 = sadd.s32 1, %s1640_s16  ;;  %p1356_p5 = scmp.ge.s32.totalorder %s1652_s19, 7 }
   0x6   : > { %s2027_s20 = smov (%p29_p0, %s27_s20), 0  ;;  %p69_p3 = por %p68_p2, %p67_p1 }
   0x7   : > { %s57_s21 = ssub.s32 %s1648_s18, %s2027_s20  ;;  %180 = sbr.rel (%p1356_p5) target bundleno = 53 (0x35), region = 20 }
   0x8   : > { %p58_p4 = scmp.eq.s32.totalorder %s57_s21, 0 }
   0xa   : > { %s1718_s23 = scalar_select %p58_p4, %s1640_s16, %s60_s22  }
   0xe   : > { %183 = sbr.rel (!%p69_p3) target bundleno = 53 (0x35), region = 24  ;;  %s185_s24 = sand.u32 (%p69_p3), 1, %s1640_s16  }
   0xf   : > { %s1454_s25 = smul.u32 (%p69_p3), 28, %s1648_s18 }
  0x10   : > { %s1488_s26 = smul.u32 (%p69_p3), 448, %s185_s24 }
  0x11   : > { %s1726_s29 = scalar_lea.vmem (%p69_p3), %s2016_s1, %s1454_s25 }
  0x12   : > { %v205_v0 = vld [vmem:[%s1726_s29] sm:$0xff] (%p69_p3)  ;;  %v207_v1 = vld [vmem:[%s1726_s29 + $0x8] sm:$0xff] (%p69_p3)  ;;  %v209_v2 = vld [vmem:[%s1726_s29 + $0x10] sm:$0xff] (%p69_p3)  ;;  %s1731_s30 = scalar_lea.vmem (%p69_p3), [#allocation2], %s1488_s26 }
  0x13   : > { %206 = vst [vmem:[%s1731_s30] sm:$0xff] (%p69_p3), %v205_v0  ;;  %208 = vst [vmem:[%s1731_s30 + $0x8] sm:$0xff] (%p69_p3), %v207_v1  ;;  %v211_v3 = vld [vmem:[%s1726_s29 + $0xc4] sm:$0xff] (%p69_p3)  ;;  %v213_v4 = vld [vmem:[%s1726_s29 + $0xcc] sm:$0xff] (%p69_p3) }
  0x14   : > { %210 = vst [vmem:[%s1731_s30 + $0x10] sm:$0xff] (%p69_p3), %v209_v2  ;;  %v215_v5 = vld [vmem:[%s1726_s29 + $0xd4] sm:$0xff] (%p69_p3)  ;;  %212 = vst [vmem:[%s1731_s30 + $0x1c] sm:$0xff] (%p69_p3), %v211_v3  ;;  %v217_v6 = vld [vmem:[%s1726_s29 + $0x188] sm:$0xff] (%p69_p3) }
  0x15   : > { %214 = vst [vmem:[%s1731_s30 + $0x24] sm:$0xff] %v213_v4  ;;  %216 = vst [vmem:[%s1731_s30 + $0x2c] sm:$0xff] %v215_v5  ;;  %v219_v7 = vld [vmem:[%s1726_s29 + $0x190] sm:$0xff]  ;;  %v221_v8 = vld [vmem:[%s1726_s29 + $0x198] sm:$0xff] }
  0x16   : > { %218 = vst [vmem:[%s1731_s30 + $0x38] sm:$0xff] %v217_v6  ;;  %220 = vst [vmem:[%s1731_s30 + $0x40] sm:$0xff] %v219_v7  ;;  %v223_v9 = vld [vmem:[%s1726_s29 + $0x24c] sm:$0xff]  ;;  %v225_v10 = vld [vmem:[%s1726_s29 + $0x254] sm:$0xff] }
  0x17   : > { %222 = vst [vmem:[%s1731_s30 + $0x48] sm:$0xff] %v221_v8  ;;  %v227_v11 = vld [vmem:[%s1726_s29 + $0x25c] sm:$0xff]  ;;  %224 = vst [vmem:[%s1731_s30 + $0x54] sm:$0xff] %v223_v9  ;;  %v229_v12 = vld [vmem:[%s1726_s29 + $0x310] sm:$0xff] }
  0x18   : > { %226 = vst [vmem:[%s1731_s30 + $0x5c] sm:$0xff] %v225_v10  ;;  %228 = vst [vmem:[%s1731_s30 + $0x64] sm:$0xff] %v227_v11  ;;  %v231_v13 = vld [vmem:[%s1726_s29 + $0x318] sm:$0xff]  ;;  %v233_v14 = vld [vmem:[%s1726_s29 + $0x320] sm:$0xff] }
  0x19   : > { %230 = vst [vmem:[%s1731_s30 + $0x70] sm:$0xff] %v229_v12  ;;  %232 = vst [vmem:[%s1731_s30 + $0x78] sm:$0xff] %v231_v13  ;;  %v235_v15 = vld [vmem:[%s1726_s29 + $0x3d4] sm:$0xff]  ;;  %v237_v16 = vld [vmem:[%s1726_s29 + $0x3dc] sm:$0xff] }
  0x1a   : > { %234 = vst [vmem:[%s1731_s30 + $0x80] sm:$0xff] %v233_v14  ;;  %v239_v17 = vld [vmem:[%s1726_s29 + $0x3e4] sm:$0xff]  ;;  %236 = vst [vmem:[%s1731_s30 + $0x8c] sm:$0xff] %v235_v15  ;;  %v241_v18 = vld [vmem:[%s1726_s29 + $0x498] sm:$0xff] }
  0x1b   : > { %238 = vst [vmem:[%s1731_s30 + $0x94] sm:$0xff] %v237_v16  ;;  %240 = vst [vmem:[%s1731_s30 + $0x9c] sm:$0xff] %v239_v17  ;;  %v243_v19 = vld [vmem:[%s1726_s29 + $0x4a0] sm:$0xff]  ;;  %v245_v20 = vld [vmem:[%s1726_s29 + $0x4a8] sm:$0xff] }
  0x1c   : > { %242 = vst [vmem:[%s1731_s30 + $0xa8] sm:$0xff] %v241_v18  ;;  %244 = vst [vmem:[%s1731_s30 + $0xb0] sm:$0xff] %v243_v19  ;;  %v247_v21 = vld [vmem:[%s1726_s29 + $0x55c] sm:$0xff]  ;;  %v249_v22 = vld [vmem:[%s1726_s29 + $0x564] sm:$0xff] }
  0x1d   : > { %246 = vst [vmem:[%s1731_s30 + $0xb8] sm:$0xff] %v245_v20  ;;  %v251_v23 = vld [vmem:[%s1726_s29 + $0x56c] sm:$0xff]  ;;  %248 = vst [vmem:[%s1731_s30 + $0xc4] sm:$0xff] %v247_v21  ;;  %v253_v24 = vld [vmem:[%s1726_s29 + $0x620] sm:$0xff] }
  0x1e   : > { %250 = vst [vmem:[%s1731_s30 + $0xcc] sm:$0xff] %v249_v22  ;;  %252 = vst [vmem:[%s1731_s30 + $0xd4] sm:$0xff] %v251_v23  ;;  %v255_v25 = vld [vmem:[%s1726_s29 + $0x628] sm:$0xff]  ;;  %v257_v26 = vld [vmem:[%s1726_s29 + $0x630] sm:$0xff] }
  0x1f   : > { %254 = vst [vmem:[%s1731_s30 + $0xe0] sm:$0xff] %v253_v24  ;;  %256 = vst [vmem:[%s1731_s30 + $0xe8] sm:$0xff] %v255_v25  ;;  %v259_v27 = vld [vmem:[%s1726_s29 + $0x6e4] sm:$0xff]  ;;  %v261_v28 = vld [vmem:[%s1726_s29 + $0x6ec] sm:$0xff] }
  0x20   : > { %258 = vst [vmem:[%s1731_s30 + $0xf0] sm:$0xff] %v257_v26  ;;  %v263_v29 = vld [vmem:[%s1726_s29 + $0x6f4] sm:$0xff]  ;;  %260 = vst [vmem:[%s1731_s30 + $0xfc] sm:$0xff] %v259_v27  ;;  %v265_v30 = vld [vmem:[%s1726_s29 + $0x7a8] sm:$0xff] }
  0x21   : > { %262 = vst [vmem:[%s1731_s30 + $0x104] sm:$0xff] %v261_v28  ;;  %264 = vst [vmem:[%s1731_s30 + $0x10c] sm:$0xff] %v263_v29  ;;  %v267_v31 = vld [vmem:[%s1726_s29 + $0x7b0] sm:$0xff]  ;;  %v269_v32 = vld [vmem:[%s1726_s29 + $0x7b8] sm:$0xff] }
  0x22   : > { %266 = vst [vmem:[%s1731_s30 + $0x118] sm:$0xff] %v265_v30  ;;  %268 = vst [vmem:[%s1731_s30 + $0x120] sm:$0xff] %v267_v31  ;;  %v271_v33 = vld [vmem:[%s1726_s29 + $0x86c] sm:$0xff]  ;;  %v273_v34 = vld [vmem:[%s1726_s29 + $0x874] sm:$0xff] }
  0x23   : > { %270 = vst [vmem:[%s1731_s30 + $0x128] sm:$0xff] %v269_v32  ;;  %v275_v35 = vld [vmem:[%s1726_s29 + $0x87c] sm:$0xff]  ;;  %272 = vst [vmem:[%s1731_s30 + $0x134] sm:$0xff] %v271_v33  ;;  %v277_v36 = vld [vmem:[%s1726_s29 + $0x930] sm:$0xff] }
  0x24   : > { %274 = vst [vmem:[%s1731_s30 + $0x13c] sm:$0xff] %v273_v34  ;;  %276 = vst [vmem:[%s1731_s30 + $0x144] sm:$0xff] %v275_v35  ;;  %v279_v37 = vld [vmem:[%s1726_s29 + $0x938] sm:$0xff]  ;;  %v281_v38 = vld [vmem:[%s1726_s29 + $0x940] sm:$0xff] }
  0x25   : > { %278 = vst [vmem:[%s1731_s30 + $0x150] sm:$0xff] %v277_v36  ;;  %280 = vst [vmem:[%s1731_s30 + $0x158] sm:$0xff] %v279_v37  ;;  %v283_v39 = vld [vmem:[%s1726_s29 + $0x9f4] sm:$0xff]  ;;  %v285_v40 = vld [vmem:[%s1726_s29 + $0x9fc] sm:$0xff] }
  0x26   : > { %282 = vst [vmem:[%s1731_s30 + $0x160] sm:$0xff] %v281_v38  ;;  %v287_v41 = vld [vmem:[%s1726_s29 + $0xa04] sm:$0xff]  ;;  %284 = vst [vmem:[%s1731_s30 + $0x16c] sm:$0xff] %v283_v39  ;;  %v289_v42 = vld [vmem:[%s1726_s29 + $0xab8] sm:$0xff] }
  0x27   : > { %286 = vst [vmem:[%s1731_s30 + $0x174] sm:$0xff] %v285_v40  ;;  %288 = vst [vmem:[%s1731_s30 + $0x17c] sm:$0xff] %v287_v41  ;;  %v291_v43 = vld [vmem:[%s1726_s29 + $0xac0] sm:$0xff]  ;;  %v293_v44 = vld [vmem:[%s1726_s29 + $0xac8] sm:$0xff] }
  0x28   : > { %290 = vst [vmem:[%s1731_s30 + $0x188] sm:$0xff] %v289_v42  ;;  %292 = vst [vmem:[%s1731_s30 + $0x190] sm:$0xff] %v291_v43  ;;  %v295_v45 = vld [vmem:[%s1726_s29 + $0xb7c] sm:$0xff]  ;;  %v297_v46 = vld [vmem:[%s1726_s29 + $0xb84] sm:$0xff] }
  0x29   : > { %294 = vst [vmem:[%s1731_s30 + $0x198] sm:$0xff] %v293_v44  ;;  %v299_v47 = vld [vmem:[%s1726_s29 + $0xb8c] sm:$0xff]  ;;  %296 = vst [vmem:[%s1731_s30 + $0x1a4] sm:$0xff] %v295_v45  ;;  %v1358_v48 = vld [vmem:[%s1726_s29 + $0x18] sm:$0xf] }
  0x2a   : > { %298 = vst [vmem:[%s1731_s30 + $0x1ac] sm:$0xff] %v297_v46  ;;  %300 = vst [vmem:[%s1731_s30 + $0x1b4] sm:$0xff] %v299_v47  ;;  %v1360_v49 = vld [vmem:[%s1726_s29 + $0xdc] sm:$0xf]  ;;  %v1362_v50 = vld [vmem:[%s1726_s29 + $0x1a0] sm:$0xf] }
  0x2b   : > { %1359 = vst [vmem:[%s1731_s30 + $0x18] sm:$0xf] %v1358_v48  ;;  %1361 = vst [vmem:[%s1731_s30 + $0x34] sm:$0xf] %v1360_v49  ;;  %v1364_v51 = vld [vmem:[%s1726_s29 + $0x264] sm:$0xf] }
  0x2c   : > { %1363 = vst [vmem:[%s1731_s30 + $0x50] sm:$0xf] %v1362_v50  ;;  %v1366_v52 = vld [vmem:[%s1726_s29 + $0x328] sm:$0xf]  ;;  %v1368_v53 = vld [vmem:[%s1726_s29 + $0x3ec] sm:$0xf] }
  0x2d   : > { %1365 = vst [vmem:[%s1731_s30 + $0x6c] sm:$0xf] %v1364_v51  ;;  %1367 = vst [vmem:[%s1731_s30 + $0x88] sm:$0xf] %v1366_v52  ;;  %v1370_v54 = vld [vmem:[%s1726_s29 + $0x4b0] sm:$0xf] }
  0x2e   : > { %1369 = vst [vmem:[%s1731_s30 + $0xa4] sm:$0xf] %v1368_v53  ;;  %v1372_v55 = vld [vmem:[%s1726_s29 + $0x574] sm:$0xf]  ;;  %v1374_v56 = vld [vmem:[%s1726_s29 + $0x638] sm:$0xf] }
  0x2f   : > { %1371 = vst [vmem:[%s1731_s30 + $0xc0] sm:$0xf] %v1370_v54  ;;  %1373 = vst [vmem:[%s1731_s30 + $0xdc] sm:$0xf] %v1372_v55  ;;  %v1376_v57 = vld [vmem:[%s1726_s29 + $0x6fc] sm:$0xf] }
  0x30   : > { %1375 = vst [vmem:[%s1731_s30 + $0xf8] sm:$0xf] %v1374_v56  ;;  %v1378_v58 = vld [vmem:[%s1726_s29 + $0x7c0] sm:$0xf]  ;;  %v1380_v59 = vld [vmem:[%s1726_s29 + $0x884] sm:$0xf] }
  0x31   : > { %1377 = vst [vmem:[%s1731_s30 + $0x114] sm:$0xf] %v1376_v57  ;;  %1379 = vst [vmem:[%s1731_s30 + $0x130] sm:$0xf] %v1378_v58  ;;  %v1382_v60 = vld [vmem:[%s1726_s29 + $0x948] sm:$0xf] }
  0x32   : > { %1381 = vst [vmem:[%s1731_s30 + $0x14c] sm:$0xf] %v1380_v59  ;;  %v1384_v61 = vld [vmem:[%s1726_s29 + $0xa0c] sm:$0xf]  ;;  %v1386_v62 = vld [vmem:[%s1726_s29 + $0xad0] sm:$0xf] }
  0x33   : > { %1383 = vst [vmem:[%s1731_s30 + $0x168] sm:$0xf] %v1382_v60  ;;  %1385 = vst [vmem:[%s1731_s30 + $0x184] sm:$0xf] %v1384_v61  ;;  %v1388_v63 = vld [vmem:[%s1726_s29 + $0xb94] sm:$0xf] }
  0x34   : > { %1387 = vst [vmem:[%s1731_s30 + $0x1a0] sm:$0xf] %v1386_v62  ;;  %1389 = vst [vmem:[%s1731_s30 + $0x1bc] sm:$0xf] %v1388_v63 }
  0x35 PF: > { %p1390_p6 = scmp.ge.s32.totalorder %s1652_s19, 1  ;;  %p344_p7 = scmp.lt.s32.totalorder %s1652_s19, 8 }
  0x37   : > { %p345_p8 = pnand %p1390_p6, %p344_p7 }
  0x38   : > { %s351_s5 = sand.u32 (!%p345_p8), 1, %s1636_s15   ;;  %v1654_v0 = vmov (!%p345_p8), 0   ;;  %v1901_v34 = vld [vmem:[%s2015_s0] sm:$0xf] (!%p345_p8)  ;;  %v1655_v37 = vmov (!%p345_p8), 0.0   ;;  %vm1656_vm0 = vmmov (!%p345_p8), 0   ;;  %v971_v59 = vlaneseq (!%p345_p8) }
  0x39   : > { %348 = sbr.rel (%p345_p8) target bundleno = 366 (0x16e), region = 50  ;;  %803 = vmatprep.mubr.bf16.mxu0 (!%p345_p8), %v1654_v0  ;;  %844 = vmatprep.mubr.bf16.mxu1 (!%p345_p8), %v1654_v0  ;;  %v1657_v61 = vmov (!%p345_p8), 1966171168  }
  0x3a   : > { %s1489_s6 = smul.u32 (!%p345_p8), 448, %s351_s5  ;;  %vm1951_vm1 = vcmp.lt.s32.totalorder (!%p345_p8), %v971_v59, 896  ;;  %v1031_v62 = vunpack.c.l.s4 (!%p345_p8), %v1657_v61 }
  0x3b   : > { %s397_s10 = smul.u32 (!%p345_p8), 7, %s1644_s17 }
  0x3c   : > { %s1863_s7 = scalar_lea.vmem (!%p345_p8), [#allocation2], %s1489_s6  ;;  %v1032_v63 = vunpack.c.0.s8 (!%p345_p8), %v1031_v62 }
  0x3d   : > { %v1534_v1 = vld [vmem:[%s1863_s7 + $0x4] ss:$28 sps:$4 sm:$0xff] (!%p345_p8)   ;;  %v1536_v2 = vld [vmem:[%s1863_s7 + $0xc] ss:$28 sps:$4 sm:$0xff] (!%p345_p8)   ;;  %v1540_v5 = vld [vmem:[%s1863_s7 + $0x3c] ss:$28 sps:$4 sm:$0xff] (!%p345_p8)  }
  0x3e   : > { %771 = vmatprep.subr.bf16.mxu0 (!%p345_p8), %v1534_v1  ;;  %v1538_v3 = vld [vmem:[%s1863_s7] ss:$28 sps:$4 sm:$0xff] (!%p345_p8)   ;;  %v1539_v4 = vld [vmem:[%s1863_s7 + $0x8] ss:$28 sps:$4 sm:$0xff] (!%p345_p8)   ;;  %812 = vmatprep.subr.bf16.mxu1 (!%p345_p8), %v1536_v2  ;;  %v1544_v7 = vld [vmem:[%s1863_s7 + $0x38] ss:$28 sps:$4 sm:$0xff] (!%p345_p8)  }
  0x3f   : > { %772 = vmatpush1.bf16.msra.mxu0 (!%p345_p8), %v1538_v3  ;;  %813 = vmatpush1.bf16.msra.mxu1 (!%p345_p8), %v1539_v4  ;;  %v1542_v6 = vld [vmem:[%s1863_s7 + $0x44] ss:$28 sps:$4 sm:$0xff] (!%p345_p8)   ;;  %v1546_v9 = vld [vmem:[%s1863_s7 + $0x74] ss:$28 sps:$4 sm:$0xff] (!%p345_p8)   ;;  %v1548_v10 = vld [vmem:[%s1863_s7 + $0x7c] ss:$28 sps:$4 sm:$0xff] (!%p345_p8)  }
  0x40   : > { %773 = vmatprep.subr.bf16.mxu0 %v1540_v5  ;;  %v1545_v8 = vld [vmem:[%s1863_s7 + $0x40] ss:$28 sps:$4 sm:$0xff]   ;;  %814 = vmatprep.subr.bf16.mxu1 %v1542_v6  ;;  %v1550_v11 = vld [vmem:[%s1863_s7 + $0x70] ss:$28 sps:$4 sm:$0xff]   ;;  %v1551_v12 = vld [vmem:[%s1863_s7 + $0x78] ss:$28 sps:$4 sm:$0xff]  }
  0x41   : > { %v1552_v13 = vld [vmem:[%s1863_s7 + $0xac] ss:$28 sps:$4 sm:$0xff]   ;;  %v1554_v14 = vld [vmem:[%s1863_s7 + $0xb4] ss:$28 sps:$4 sm:$0xff]   ;;  %v1558_v17 = vld [vmem:[%s1863_s7 + $0xe4] ss:$28 sps:$4 sm:$0xff]  }
  0x42   : > { %v1556_v15 = vld [vmem:[%s1863_s7 + $0xa8] ss:$28 sps:$4 sm:$0xff]   ;;  %v1557_v16 = vld [vmem:[%s1863_s7 + $0xb0] ss:$28 sps:$4 sm:$0xff]   ;;  %v1562_v19 = vld [vmem:[%s1863_s7 + $0xe0] ss:$28 sps:$4 sm:$0xff]  }
  0x43   : > { %774 = vmatpush1.bf16.msra.mxu0 %v1544_v7  ;;  %815 = vmatpush1.bf16.msra.mxu1 %v1545_v8  ;;  %v1560_v18 = vld [vmem:[%s1863_s7 + $0xec] ss:$28 sps:$4 sm:$0xff]   ;;  %v1564_v21 = vld [vmem:[%s1863_s7 + $0x11c] ss:$28 sps:$4 sm:$0xff]   ;;  %v1566_v22 = vld [vmem:[%s1863_s7 + $0x124] ss:$28 sps:$4 sm:$0xff]  }
  0x44   : > { %775 = vmatprep.subr.bf16.mxu0 %v1546_v9  ;;  %816 = vmatprep.subr.bf16.mxu1 %v1548_v10  ;;  %v1563_v20 = vld [vmem:[%s1863_s7 + $0xe8] ss:$28 sps:$4 sm:$0xff]   ;;  %v1568_v23 = vld [vmem:[%s1863_s7 + $0x118] ss:$28 sps:$4 sm:$0xff]   ;;  %v1569_v24 = vld [vmem:[%s1863_s7 + $0x120] ss:$28 sps:$4 sm:$0xff]  }
  0x45   : > { %v1570_v25 = vld [vmem:[%s1863_s7 + $0x154] ss:$28 sps:$4 sm:$0xff]   ;;  %v1572_v26 = vld [vmem:[%s1863_s7 + $0x15c] ss:$28 sps:$4 sm:$0xff]   ;;  %v1576_v29 = vld [vmem:[%s1863_s7 + $0x18c] ss:$28 sps:$4 sm:$0xff]  }
  0x46   : > { %v1574_v27 = vld [vmem:[%s1863_s7 + $0x150] ss:$28 sps:$4 sm:$0xff]   ;;  %v1575_v28 = vld [vmem:[%s1863_s7 + $0x158] ss:$28 sps:$4 sm:$0xff]   ;;  %v1580_v31 = vld [vmem:[%s1863_s7 + $0x188] ss:$28 sps:$4 sm:$0xff]  }
  0x47   : > { %776 = vmatpush1.bf16.msra.mxu0 %v1550_v11  ;;  %817 = vmatpush1.bf16.msra.mxu1 %v1551_v12  ;;  %v1578_v30 = vld [vmem:[%s1863_s7 + $0x194] ss:$28 sps:$4 sm:$0xff]   ;;  %v1588_v38 = vld [vmem:[%s1863_s7 + $0x4c] ss:$28 sps:$4 sm:$0xff]   ;;  %v1592_v41 = vld [vmem:[%s1863_s7 + $0x84] ss:$28 sps:$4 sm:$0xff]  }
  0x48   : > { %777 = vmatprep.subr.bf16.mxu0 %v1552_v13  ;;  %818 = vmatprep.subr.bf16.mxu1 %v1554_v14  ;;  %v1581_v32 = vld [vmem:[%s1863_s7 + $0x190] ss:$28 sps:$4 sm:$0xff]   ;;  %v1585_v36 = vld [vmem:[%s1863_s7 + $0x18] ss:$28 sps:$4 sm:$0xff]   ;;  %v1586_v39 = vld [vmem:[%s1863_s7 + $0x48] ss:$28 sps:$4 sm:$0xff]  }
  0x49   : > { %v1584_v33 = vld [vmem:[%s1863_s7 + $0x14] ss:$28 sps:$4 sm:$0xff]   ;;  %v1590_v42 = vld [vmem:[%s1863_s7 + $0x80] ss:$28 sps:$4 sm:$0xff]   ;;  %v1593_v43 = vld [vmem:[%s1863_s7 + $0x88] ss:$28 sps:$4 sm:$0xff]  }
  0x4a   : > { %v1582_v35 = vld [vmem:[%s1863_s7 + $0x10] ss:$28 sps:$4 sm:$0xff]   ;;  %v1596_v44 = vld [vmem:[%s1863_s7 + $0xbc] ss:$28 sps:$4 sm:$0xff]   ;;  %v1602_v51 = vld [vmem:[%s1863_s7 + $0x128] ss:$28 sps:$4 sm:$0xff]  }
  0x4b   : > { %778 = vmatpush1.bf16.msra.mxu0 %v1556_v15  ;;  %819 = vmatpush1.bf16.msra.mxu1 %v1557_v16  ;;  %v1589_v40 = vld [vmem:[%s1863_s7 + $0x50] ss:$28 sps:$4 sm:$0xff]   ;;  %v1594_v45 = vld [vmem:[%s1863_s7 + $0xb8] ss:$28 sps:$4 sm:$0xff]   ;;  %v1597_v46 = vld [vmem:[%s1863_s7 + $0xc0] ss:$28 sps:$4 sm:$0xff]  }
  0x4c   : > { %779 = vmatprep.subr.bf16.mxu0 %v1558_v17  ;;  %820 = vmatprep.subr.bf16.mxu1 %v1560_v18  ;;  %v1600_v47 = vld [vmem:[%s1863_s7 + $0xf4] ss:$28 sps:$4 sm:$0xff]   ;;  %v1604_v50 = vld [vmem:[%s1863_s7 + $0x12c] ss:$28 sps:$4 sm:$0xff]   ;;  %v1608_v53 = vld [vmem:[%s1863_s7 + $0x164] ss:$28 sps:$4 sm:$0xff]  }
  0x4d   : > { %v1598_v48 = vld [vmem:[%s1863_s7 + $0xf0] ss:$28 sps:$4 sm:$0xff]   ;;  %v1601_v49 = vld [vmem:[%s1863_s7 + $0xf8] ss:$28 sps:$4 sm:$0xff]   ;;  %v1606_v54 = vld [vmem:[%s1863_s7 + $0x160] ss:$28 sps:$4 sm:$0xff]  }
  0x4e   : > { %v1605_v52 = vld [vmem:[%s1863_s7 + $0x130] ss:$28 sps:$4 sm:$0xff]   ;;  %v1609_v55 = vld [vmem:[%s1863_s7 + $0x168] ss:$28 sps:$4 sm:$0xff]   ;;  %v1612_v56 = vld [vmem:[%s1863_s7 + $0x19c] ss:$28 sps:$4 sm:$0xff]  }
  0x4f   : > { %780 = vmatpush1.bf16.msra.mxu0 %v1562_v19  ;;  %821 = vmatpush1.bf16.msra.mxu1 %v1563_v20  ;;  %v1610_v57 = vld [vmem:[%s1863_s7 + $0x198] ss:$28 sps:$4 sm:$0xff]   ;;  %v1613_v58 = vld [vmem:[%s1863_s7 + $0x1a0] ss:$28 sps:$4 sm:$0xff]   ;;  %p400_p9 = scmp.lt.s32.totalorder %s397_s10, 48 }
  0x50   : > { %781 = vmatprep.subr.bf16.mxu0 %v1564_v21  ;;  %822 = vmatprep.subr.bf16.mxu1 %v1566_v22 }
  0x51   : > { %s2029_s10 = smov (!%p400_p9, %s397_s10), 48 }
  0x52   : > { %s1944_s13 = scalar_lea.vmem %s2018_s3, %s2029_s10  ;;  %s1949_s21 = scalar_lea.vmem %s2019_s4, %s2029_s10 }
  0x53   : > { %782 = vmatpush1.bf16.msra.mxu0 %v1568_v23  ;;  %823 = vmatpush1.bf16.msra.mxu1 %v1569_v24  ;;  %975 = vst.msk [vmem:[%s1944_s13] sm:$0x7f] %vm1951_vm1, %v1655_v37  ;;  %976 = vst.msk [vmem:[%s1949_s21] sm:$0x7f] %vm1951_vm1, %v1655_v37  ;;  %s1391_s17 = sshll.u32 %s2029_s10, 2 }
  0x54   : > { %783 = vmatprep.subr.bf16.mxu0 %v1570_v25  ;;  %824 = vmatprep.subr.bf16.mxu1 %v1572_v26  ;;  %s1968_s25 = scalar_lea.vmem %s2017_s2, %s1391_s17 }
  0x57   : > { %784 = vmatpush1.bf16.msra.mxu0 %v1574_v27  ;;  %825 = vmatpush1.bf16.msra.mxu1 %v1575_v28 }
  0x58   : > { %785 = vmatprep.subr.bf16.mxu0 %v1576_v29  ;;  %826 = vmatprep.subr.bf16.mxu1 %v1578_v30 }
  0x5b   : > { %786 = vmatpush1.bf16.msra.mxu0 %v1580_v31  ;;  %827 = vmatpush1.bf16.msra.mxu1 %v1581_v32 }
  0x5c   : > { %853 = vmatprep.subr.bf16.mxu0 %v1584_v33  ;;  %1468 = vmatprep.subr.bf16.mxu1 %v1655_v37 }
  0x5e   : > { %804 = vmatmul.mubr.bf16.vlgmr.msra.gmra.mrb[0].mxu0 %v1901_v34  ;;  %845 = vmatmul.mubr.bf16.vlgmr.msra.gmra.mrb[0].mxu1 %v1901_v34 }
  0x5f   : > { %854 = vmatpush1.bf16.msra.mxu0 %v1582_v35  ;;  %1469 = vmatpush3.bf16.msra.mxu1 %v1585_v36 }
  0x60   : > { %855 = vmatprep.subr.bf16.mxu0 %v1588_v38  ;;  %1470 = vmatprep.subr.bf16.mxu1 %v1655_v37 }
  0x61   : > { %885 = vmatprep.mubr.bf16.mxu0 %v1654_v0  ;;  %1484 = vmatprep.mubr.msk.bf16.mxu1 %vm1656_vm0, %v1655_v37  ;;  %v1034_v0 = vshrl.u32 %v971_v59, 7 }
  0x63   : > { %856 = vmatpush1.bf16.msra.mxu0 %v1586_v39  ;;  %1471 = vmatpush3.bf16.msra.mxu1 %v1589_v40  ;;  %v1963_v3 = vsub.s32 %v1032_v63, %v1034_v0 }
  0x64   : > { %857 = vmatprep.subr.bf16.mxu0 %v1592_v41  ;;  %1472 = vmatprep.subr.bf16.mxu1 %v1655_v37 }
  0x67   : > { %858 = vmatpush1.bf16.msra.mxu0 %v1590_v42  ;;  %1473 = vmatpush3.bf16.msra.mxu1 %v1593_v43 }
  0x68   : > { %859 = vmatprep.subr.bf16.mxu0 %v1596_v44  ;;  %1474 = vmatprep.subr.bf16.mxu1 %v1655_v37 }
  0x6b   : > { %860 = vmatpush1.bf16.msra.mxu0 %v1594_v45  ;;  %1475 = vmatpush3.bf16.msra.mxu1 %v1597_v46 }
  0x6c   : > { %861 = vmatprep.subr.bf16.mxu0 %v1600_v47  ;;  %1476 = vmatprep.subr.bf16.mxu1 %v1655_v37 }
  0x6f   : > { %862 = vmatpush1.bf16.msra.mxu0 %v1598_v48  ;;  %1477 = vmatpush3.bf16.msra.mxu1 %v1601_v49 }
  0x70   : > { %863 = vmatprep.subr.bf16.mxu0 %v1604_v50  ;;  %1478 = vmatprep.subr.bf16.mxu1 %v1655_v37 }
  0x73   : > { %864 = vmatpush1.bf16.msra.mxu0 %v1602_v51  ;;  %1479 = vmatpush3.bf16.msra.mxu1 %v1605_v52 }
  0x74   : > { %865 = vmatprep.subr.bf16.mxu0 %v1608_v53  ;;  %1480 = vmatprep.subr.bf16.mxu1 %v1655_v37 }
  0x77   : > { %866 = vmatpush1.bf16.msra.mxu0 %v1606_v54  ;;  %1481 = vmatpush3.bf16.msra.mxu1 %v1609_v55 }
  0x78   : > { %867 = vmatprep.subr.bf16.mxu0 %v1612_v56  ;;  %1482 = vmatprep.subr.bf16.mxu1 %v1655_v37 }
  0x7b   : > { %868 = vmatpush1.bf16.msra.mxu0 %v1610_v57  ;;  %1483 = vmatpush3.bf16.msra.mxu1 %v1613_v58 }
  0x7e   : > { %886 = vmatmul.mubr.bf16.vlgmr.msra.gmra.mrb[4].mxu0 %v1901_v34  ;;  %1485 = vmatmul.mubr.bf16.vlgmr.msra.gmra.mrb[4].mxu1 %v1901_v34 }
 0x131   : > { %v805_v1 = vpop.f32.mrb[0].mxu0  ;;  %v846_v2 = vpop.f32.mrb[0].mxu1 }
 0x132   : > { %v978_v4 = vrot.slane %v805_v1, 4  ;;  %v1083_v5 = vmul.f32 %v805_v1, %v805_v1  ;;  %v990_v6 = vrot.slane %v846_v2, 4  ;;  %v1085_v7 = vmul.f32 %v846_v2, %v846_v2  ;;  %v807_v8 = vpop.f32.mrb[1].mxu0  ;;  %v848_v9 = vpop.f32.mrb[1].mxu1 }
 0x133   : > { %v1455_v10 = vpack.c.bf16 %v807_v8, %v805_v1  ;;  %v984_v11 = vrot.slane %v807_v8, 4  ;;  %v1084_v12 = vmul.f32 %v807_v8, %v807_v8  ;;  %v1456_v13 = vpack.c.bf16 %v848_v9, %v846_v2  ;;  %v809_v14 = vpop.f32.mrb[2].mxu0  ;;  %v850_v15 = vpop.f32.mrb[2].mxu1 }
 0x134   : > { %v979_v16 = vadd.f32 %v978_v4, %v805_v1  ;;  %v1090_v17 = vrot.slane %v1083_v5, 4  ;;  %v991_v18 = vadd.f32 %v990_v6, %v846_v2  ;;  %v1102_v19 = vrot.slane %v1085_v7, 4  ;;  %v810_v20 = vpop.f32.mrb[3].mxu0  ;;  %v851_v21 = vpop.f32.mrb[3].mxu1 }
 0x135   : > { %963 = vst [vmem:[%s1968_s25] sm:$0xff] %v1455_v10  ;;  %v985_v22 = vadd.f32 %v984_v11, %v807_v8  ;;  %v1096_v23 = vrot.slane %v1084_v12, 4  ;;  %964 = vst [vmem:[%s1968_s25 + $0x8] sm:$0xff] %v1456_v13  ;;  %v996_v24 = vrot.slane %v848_v9, 4  ;;  %v1086_v25 = vmul.f32 %v848_v9, %v848_v9 }
 0x136   : > { %v980_v26 = vrot.slane %v979_v16, 2  ;;  %v1091_v27 = vadd.f32 %v1090_v17, %v1083_v5  ;;  %v992_v28 = vrot.slane %v991_v18, 2  ;;  %v1103_v29 = vadd.f32 %v1102_v19, %v1085_v7 }
 0x137   : > { %v986_v30 = vrot.slane %v985_v22, 2  ;;  %v1097_v31 = vadd.f32 %v1096_v23, %v1084_v12  ;;  %v997_v32 = vadd.f32 %v996_v24, %v848_v9  ;;  %v1108_v33 = vrot.slane %v1086_v25, 4 }
 0x138   : > { %v981_v34 = vadd.f32 %v980_v26, %v979_v16  ;;  %v1092_v35 = vrot.slane %v1091_v27, 2  ;;  %v993_v36 = vadd.f32 %v992_v28, %v991_v18  ;;  %v1104_v37 = vrot.slane %v1103_v29, 2 }
 0x139   : > { %v987_v38 = vadd.f32 %v986_v30, %v985_v22  ;;  %v1098_v39 = vrot.slane %v1097_v31, 2  ;;  %v998_v40 = vrot.slane %v997_v32, 2  ;;  %v1109_v41 = vadd.f32 %v1108_v33, %v1086_v25 }
 0x13a   : > { %v982_v42 = vrot.slane %v981_v34, 1  ;;  %v1093_v43 = vadd.f32 %v1092_v35, %v1091_v27  ;;  %v994_v44 = vrot.slane %v993_v36, 1  ;;  %v1105_v45 = vadd.f32 %v1104_v37, %v1103_v29 }
 0x13b   : > { %v988_v46 = vrot.slane %v987_v38, 1  ;;  %v1099_v47 = vadd.f32 %v1098_v39, %v1097_v31  ;;  %v999_v48 = vadd.f32 %v998_v40, %v997_v32  ;;  %v1110_v49 = vrot.slane %v1109_v41, 2 }
 0x13c   : > { %v983_v50 = vadd.f32 %v982_v42, %v981_v34  ;;  %v1094_v51 = vrot.slane %v1093_v43, 1  ;;  %v995_v52 = vadd.f32 %v994_v44, %v993_v36  ;;  %v1106_v53 = vrot.slane %v1105_v45, 1 }
 0x13d   : > { %v989_v54 = vadd.f32 %v988_v46, %v987_v38  ;;  %v1100_v55 = vrot.slane %v1099_v47, 1  ;;  %v1000_v56 = vrot.slane %v999_v48, 1  ;;  %v1111_v57 = vadd.f32 %v1110_v49, %v1109_v41 }
 0x13e   : > { %v1095_v58 = vadd.f32 %v1094_v51, %v1093_v43  ;;  %v1107_v59 = vadd.f32 %v1106_v53, %v1105_v45 }
 0x13f   : > { %v1027_v61 = vcombine.low %v983_v50, %v989_v54  ;;  %v1101_v62 = vadd.f32 %v1100_v55, %v1099_v47  ;;  %v1001_v63 = vadd.f32 %v1000_v56, %v999_v48  ;;  %v1112_v0 = vrot.slane %v1111_v57, 1 }
 0x141   : > { %v1036_v1 = vrot.slane %v1027_v61, %v1963_v3  ;;  %v1139_v2 = vcombine.low %v1095_v58, %v1101_v62  ;;  %v1028_v4 = vcombine.low %v995_v52, %v1001_v63  ;;  %v1113_v5 = vadd.f32 %v1112_v0, %v1111_v57 }
 0x143   : > { %v1148_v6 = vrot.slane %v1139_v2, %v1963_v3  ;;  %v1043_v7 = vrot.slane %v1028_v4, %v1963_v3  ;;  %v1140_v8 = vcombine.low %v1107_v59, %v1113_v5 }
 0x145   : > { %v1058_v9 = vcombine.low %v1036_v1, %v1043_v7  ;;  %v1155_v10 = vrot.slane %v1140_v8, %v1963_v3 }
 0x147   : > { %v1977_v11 = vrot.slane %v1058_v9, %v1963_v3  ;;  %v1170_v12 = vcombine.low %v1148_v6, %v1155_v10  ;;  %v977_v10 = vld [vmem:[%s1944_s13] sm:$0xff] }
 0x149   : > { %v1980_v13 = vrot.slane %v1170_v12, %v1963_v3 }
 0x151   : > { %v887_v14 = vpop.f32.mrb[4].mxu0  ;;  %v928_v15 = vpop.f32.mrb[4].mxu1 }
 0x152   : > { %v1002_v16 = vrot.slane %v887_v14, 4  ;;  %v1087_v17 = vmul.f32 %v887_v14, %v887_v14  ;;  %v1458_v18 = vpack.c.bf16 %v928_v15, %v928_v15  ;;  %v1014_v19 = vrot.slane %v928_v15, 4  ;;  %v889_v20 = vpop.f32.mrb[5].mxu0  ;;  %v1486_v21 = vpop.f32.mrb[5].mxu1 }
 0x153   : > { %v1089_v22 = vmul.f32 %v928_v15, %v928_v15  ;;  %v1457_v23 = vpack.c.bf16 %v889_v20, %v887_v14  ;;  %v1008_v24 = vrot.slane %v889_v20, 4  ;;  %v1088_v25 = vmul.f32 %v889_v20, %v889_v20  ;;  %v891_v26 = vpop.f32.mrb[6].mxu0  ;;  %v931_v27 = vpop.f32.mrb[6].mxu1 }
 0x154   : > { %v1003_v28 = vadd.f32 %v1002_v16, %v887_v14  ;;  %v1114_v29 = vrot.slane %v1087_v17, 4  ;;  %966 = vst [vmem:[%s1968_s25 + $0x18] sm:$0xf] %v1458_v18  ;;  %v1015_v30 = vadd.f32 %v1014_v19, %v928_v15  ;;  %v892_v31 = vpop.f32.mrb[7].mxu0  ;;  %v1487_v32 = vpop.f32.mrb[7].mxu1  ;;  %v1082_v15 = vld [vmem:[%s1949_s21] sm:$0xff] }
 0x155   : > { %v1126_v33 = vrot.slane %v1089_v22, 4  ;;  %965 = vst [vmem:[%s1968_s25 + $0x10] sm:$0xff] %v1457_v23  ;;  %v1009_v34 = vadd.f32 %v1008_v24, %v889_v20  ;;  %v1120_v35 = vrot.slane %v1088_v25, 4 }
 0x156   : > { %v1004_v36 = vrot.slane %v1003_v28, 2  ;;  %v1115_v37 = vadd.f32 %v1114_v29, %v1087_v17  ;;  %v1016_v38 = vrot.slane %v1015_v30, 2 }
 0x157   : > { %v1127_v39 = vadd.f32 %v1126_v33, %v1089_v22  ;;  %v1010_v40 = vrot.slane %v1009_v34, 2  ;;  %v1121_v41 = vadd.f32 %v1120_v35, %v1088_v25 }
 0x158   : > { %v1005_v42 = vadd.f32 %v1004_v36, %v1003_v28  ;;  %v1116_v43 = vrot.slane %v1115_v37, 2  ;;  %v1017_v44 = vadd.f32 %v1016_v38, %v1015_v30 }
 0x159   : > { %v1128_v45 = vrot.slane %v1127_v39, 2  ;;  %v1011_v46 = vadd.f32 %v1010_v40, %v1009_v34  ;;  %v1122_v47 = vrot.slane %v1121_v41, 2 }
 0x15a   : > { %v1006_v48 = vrot.slane %v1005_v42, 1  ;;  %v1117_v49 = vadd.f32 %v1116_v43, %v1115_v37  ;;  %v1018_v50 = vrot.slane %v1017_v44, 1 }
 0x15b   : > { %v1129_v51 = vadd.f32 %v1128_v45, %v1127_v39  ;;  %v1012_v52 = vrot.slane %v1011_v46, 1  ;;  %v1123_v53 = vadd.f32 %v1122_v47, %v1121_v41 }
 0x15c   : > { %v1007_v54 = vadd.f32 %v1006_v48, %v1005_v42  ;;  %v1118_v55 = vrot.slane %v1117_v49, 1  ;;  %v1019_v56 = vadd.f32 %v1018_v50, %v1017_v44 }
 0x15d   : > { %v1130_v57 = vrot.slane %v1129_v51, 1  ;;  %v1013_v58 = vadd.f32 %v1012_v52, %v1011_v46  ;;  %v1124_v59 = vrot.slane %v1123_v53, 1 }
 0x15e   : > { %v1119_v61 = vadd.f32 %v1118_v55, %v1117_v49  ;;  %v1057_v62 = vrot.slane %v1019_v56, %v1963_v3 }
 0x15f   : > { %v1131_v63 = vadd.f32 %v1130_v57, %v1129_v51  ;;  %v1029_v0 = vcombine.low %v1007_v54, %v1013_v58  ;;  %v1125_v1 = vadd.f32 %v1124_v59, %v1123_v53 }
 0x161   : > { %v1169_v2 = vrot.slane %v1131_v63, %v1963_v3  ;;  %v1050_v4 = vrot.slane %v1029_v0, %v1963_v3  ;;  %v1141_v5 = vcombine.low %v1119_v61, %v1125_v1 }
 0x163   : > { %v1059_v6 = vcombine.low %v1050_v4, %v1057_v62  ;;  %v1162_v7 = vrot.slane %v1141_v5, %v1963_v3 }
 0x165   : > { %v1073_v8 = vrot.slane %v1059_v6, %v1963_v3  ;;  %v1171_v9 = vcombine.low %v1162_v7, %v1169_v2 }
 0x167   : > { %v1074_v12 = vcombine.low %v1977_v11, %v1073_v8  ;;  %v1185_v14 = vrot.slane %v1171_v9, %v1963_v3 }
 0x169   : > { %v1076_v16 = vadd.f32 %v1074_v12, %v977_v10  ;;  %v1186_v17 = vcombine.low %v1980_v13, %v1185_v14 }
 0x16b   : > { %1081 = vst.msk [vmem:[%s1944_s13] sm:$0x7f] %vm1951_vm1, %v1076_v16  ;;  %v1188_v18 = vadd.f32 %v1186_v17, %v1082_v15 }
 0x16d   : > { %1189 = vst.msk [vmem:[%s1949_s21] sm:$0x7f] %vm1951_vm1, %v1188_v18 }
 0x16e PF: > { %s15_s19 = sadd.s32 1, %s1652_s19   ;;  %s2022_s15 = smov %s1640_s16 }
 0x16f   : > { %p12_p10 = scmp.ge.s32.totalorder %s15_s19, 9   ;;  %s2023_s16 = smov %s1718_s23 }
 0x170   : > { %s2024_s17 = smov %s1648_s18  ;;  %s2025_s18 = smov %s2027_s20 }
 0x171   :  { %14 = sbr.rel (!%p12_p10) target bundleno = 3 (0x3), region = 126 }

// kernel: generator_forward.6
= control target key start
LH: loop header
LB: loop body
LE: loop exit
PB: predicated region body
PF: predicated region fallthrough
CT: control target
= control target key end

     0   :  { %s1163_s0 = inlined_call_operand.vmem [shape: bf16[392,128], index: 0, kind: input, shape index: {}]   ;;  %s1164_s1 = inlined_call_operand.vmem [shape: f32[1,128], index: 1, kind: input, shape index: {}]   ;;  %s1165_s2 = inlined_call_operand.vmem [shape: f32[1,128], index: 2, kind: input, shape index: {}]   ;;  %s1166_s3 = inlined_call_operand.vmem [shape: bf16[392,128], index: 3, kind: output, shape index: {}]  }
   0x1   :  { %v624_v0 = vld [vmem:[%s1163_s0] sm:$0xff]   ;;  %v839_v4 = vld [vmem:[%s1163_s0 + $0x8] sm:$0xff]   ;;  %v840_v5 = vld [vmem:[%s1163_s0 + $0x10] sm:$0xff]  }
   0x2   :  { %v911_v1 = vld [vmem:[%s1164_s1] ss:$0 sm:$0xff]  ;;  %v625_v2 = vunpack.c.l.bf16 %v624_v0  ;;  %v626_v3 = vunpack.c.h.bf16 %v624_v0  ;;  %v841_v6 = vld [vmem:[%s1163_s0 + $0x18] sm:$0xff]   ;;  %v629_v8 = vunpack.c.l.bf16 %v839_v4  ;;  %v630_v9 = vunpack.c.h.bf16 %v839_v4  ;;  %v843_v33 = vld [vmem:[%s1163_s0 + $0x28] sm:$0xff]  }
   0x3   :  { %v925_v7 = vld [vmem:[%s1165_s2] ss:$0 sm:$0xff]  ;;  %v633_v10 = vunpack.c.l.bf16 %v840_v5  ;;  %v634_v11 = vunpack.c.h.bf16 %v840_v5  ;;  %v637_v14 = vunpack.c.l.bf16 %v841_v6  ;;  %v638_v15 = vunpack.c.h.bf16 %v841_v6  ;;  %v844_v38 = vld [vmem:[%s1163_s0 + $0x30] sm:$0xff]   ;;  %v845_v43 = vld [vmem:[%s1163_s0 + $0x38] sm:$0xff]  }
   0x4   :  { %v119_v12 = vmul.f32 %v625_v2, %v911_v1  ;;  %v120_v13 = vmul.f32 %v626_v3, %v911_v1  ;;  %v121_v16 = vmul.f32 %v629_v8, %v911_v1  ;;  %v122_v17 = vmul.f32 %v630_v9, %v911_v1  ;;  %v842_v28 = vld [vmem:[%s1163_s0 + $0x20] sm:$0xff]  }
   0x5   :  { %v123_v18 = vmul.f32 %v633_v10, %v911_v1  ;;  %v124_v19 = vmul.f32 %v634_v11, %v911_v1  ;;  %v125_v22 = vmul.f32 %v637_v14, %v911_v1  ;;  %v126_v23 = vmul.f32 %v638_v15, %v911_v1  ;;  %v846_v0 = vld [vmem:[%s1163_s0 + $0x40] sm:$0xff]   ;;  %v847_v11 = vld [vmem:[%s1163_s0 + $0x48] sm:$0xff]  }
   0x6   :  { %v175_v20 = vadd.f32 %v925_v7, %v119_v12  ;;  %v176_v21 = vadd.f32 %v925_v7, %v120_v13  ;;  %v177_v24 = vadd.f32 %v925_v7, %v121_v16  ;;  %v178_v25 = vadd.f32 %v925_v7, %v122_v17  ;;  %v848_v16 = vld [vmem:[%s1163_s0 + $0x50] sm:$0xff]  }
   0x7   :  { %v179_v26 = vadd.f32 %v925_v7, %v123_v18  ;;  %v180_v27 = vadd.f32 %v925_v7, %v124_v19  ;;  %v181_v31 = vadd.f32 %v925_v7, %v125_v22  ;;  %v182_v32 = vadd.f32 %v925_v7, %v126_v23 }
   0x8   :  { %v224_v29 = vmax.f32 %v175_v20, 0.0  ;;  %v225_v30 = vmax.f32 %v176_v21, 0.0  ;;  %v226_v34 = vmax.f32 %v177_v24, 0.0  ;;  %v227_v35 = vmax.f32 %v178_v25, 0.0  ;;  %v849_v25 = vld [vmem:[%s1163_s0 + $0x58] sm:$0xff]  }
   0x9   :  { %v228_v36 = vmax.f32 %v179_v26, 0.0  ;;  %v229_v37 = vmax.f32 %v180_v27, 0.0  ;;  %v230_v40 = vmax.f32 %v181_v31, 0.0  ;;  %v231_v41 = vmax.f32 %v182_v32, 0.0 }
   0xa   :  { %v722_v39 = vpack.c.bf16 %v225_v30, %v224_v29  ;;  %v641_v42 = vunpack.c.l.bf16 %v842_v28  ;;  %v727_v44 = vpack.c.bf16 %v227_v35, %v226_v34  ;;  %v642_v46 = vunpack.c.h.bf16 %v842_v28 }
   0xb   :  { %v732_v45 = vpack.c.bf16 %v229_v37, %v228_v36  ;;  %v645_v47 = vunpack.c.l.bf16 %v843_v33  ;;  %v737_v48 = vpack.c.bf16 %v231_v41, %v230_v40  ;;  %v646_v50 = vunpack.c.h.bf16 %v843_v33 }
   0xc   :  { %723 = vst [vmem:[%s1166_s3] sm:$0xff] %v722_v39   ;;  %v127_v49 = vmul.f32 %v641_v42, %v911_v1  ;;  %v649_v51 = vunpack.c.l.bf16 %v844_v38  ;;  %862 = vst [vmem:[%s1166_s3 + $0x8] sm:$0xff] %v727_v44   ;;  %v128_v52 = vmul.f32 %v642_v46, %v911_v1  ;;  %v650_v54 = vunpack.c.h.bf16 %v844_v38  ;;  %v850_v38 = vld [vmem:[%s1163_s0 + $0x60] sm:$0xff]  }
   0xd   :  { %863 = vst [vmem:[%s1166_s3 + $0x10] sm:$0xff] %v732_v45   ;;  %v129_v53 = vmul.f32 %v645_v47, %v911_v1  ;;  %v653_v55 = vunpack.c.l.bf16 %v845_v43  ;;  %864 = vst [vmem:[%s1166_s3 + $0x18] sm:$0xff] %v737_v48   ;;  %v130_v57 = vmul.f32 %v646_v50, %v911_v1  ;;  %v654_v59 = vunpack.c.h.bf16 %v845_v43 }
   0xe   :  { %v183_v56 = vadd.f32 %v925_v7, %v127_v49  ;;  %v131_v58 = vmul.f32 %v649_v51, %v911_v1  ;;  %v184_v60 = vadd.f32 %v925_v7, %v128_v52  ;;  %v132_v62 = vmul.f32 %v650_v54, %v911_v1  ;;  %v851_v51 = vld [vmem:[%s1163_s0 + $0x68] sm:$0xff]  }
   0xf   :  { %v185_v61 = vadd.f32 %v925_v7, %v129_v53  ;;  %v133_v63 = vmul.f32 %v653_v55, %v911_v1  ;;  %v186_v3 = vadd.f32 %v925_v7, %v130_v57  ;;  %v134_v5 = vmul.f32 %v654_v59, %v911_v1 }
  0x10   :  { %v232_v2 = vmax.f32 %v183_v56, 0.0  ;;  %v187_v4 = vadd.f32 %v925_v7, %v131_v58  ;;  %v233_v6 = vmax.f32 %v184_v60, 0.0  ;;  %v188_v9 = vadd.f32 %v925_v7, %v132_v62  ;;  %v852_v60 = vld [vmem:[%s1163_s0 + $0x70] sm:$0xff]  }
  0x11   :  { %v234_v8 = vmax.f32 %v185_v61, 0.0  ;;  %v189_v10 = vadd.f32 %v925_v7, %v133_v63  ;;  %v235_v12 = vmax.f32 %v186_v3, 0.0  ;;  %v190_v14 = vadd.f32 %v925_v7, %v134_v5 }
  0x12   :  { %v236_v13 = vmax.f32 %v187_v4, 0.0  ;;  %v657_v15 = vunpack.c.l.bf16 %v846_v0  ;;  %v742_v17 = vpack.c.bf16 %v233_v6, %v232_v2  ;;  %v237_v18 = vmax.f32 %v188_v9, 0.0  ;;  %v853_v2 = vld [vmem:[%s1163_s0 + $0x78] sm:$0xff]  }
  0x13   :  { %v238_v19 = vmax.f32 %v189_v10, 0.0  ;;  %v658_v20 = vunpack.c.h.bf16 %v846_v0  ;;  %v747_v21 = vpack.c.bf16 %v235_v12, %v234_v8  ;;  %v239_v22 = vmax.f32 %v190_v14, 0.0  ;;  %v854_v12 = vld [vmem:[%s1163_s0 + $0x80] sm:$0xff]  }
  0x14   :  { %v135_v23 = vmul.f32 %v657_v15, %v911_v1  ;;  %v661_v24 = vunpack.c.l.bf16 %v847_v11  ;;  %865 = vst [vmem:[%s1166_s3 + $0x20] sm:$0xff] %v742_v17   ;;  %v752_v26 = vpack.c.bf16 %v237_v18, %v236_v13  ;;  %v662_v28 = vunpack.c.h.bf16 %v847_v11 }
  0x15   :  { %v136_v27 = vmul.f32 %v658_v20, %v911_v1  ;;  %v665_v29 = vunpack.c.l.bf16 %v848_v16  ;;  %866 = vst [vmem:[%s1166_s3 + $0x28] sm:$0xff] %v747_v21   ;;  %v757_v30 = vpack.c.bf16 %v239_v22, %v238_v19  ;;  %v666_v33 = vunpack.c.h.bf16 %v848_v16 }
  0x16   :  { %v191_v31 = vadd.f32 %v925_v7, %v135_v23  ;;  %v137_v32 = vmul.f32 %v661_v24, %v911_v1  ;;  %867 = vst [vmem:[%s1166_s3 + $0x30] sm:$0xff] %v752_v26   ;;  %v138_v35 = vmul.f32 %v662_v28, %v911_v1  ;;  %v669_v37 = vunpack.c.l.bf16 %v849_v25 }
  0x17   :  { %v192_v34 = vadd.f32 %v925_v7, %v136_v27  ;;  %v139_v36 = vmul.f32 %v665_v29, %v911_v1  ;;  %868 = vst [vmem:[%s1166_s3 + $0x38] sm:$0xff] %v757_v30   ;;  %v140_v41 = vmul.f32 %v666_v33, %v911_v1  ;;  %v670_v42 = vunpack.c.h.bf16 %v849_v25  ;;  %v855_v29 = vld [vmem:[%s1163_s0 + $0x88] sm:$0xff]  }
  0x18   :  { %v240_v39 = vmax.f32 %v191_v31, 0.0  ;;  %v193_v40 = vadd.f32 %v925_v7, %v137_v32  ;;  %v194_v44 = vadd.f32 %v925_v7, %v138_v35  ;;  %v141_v46 = vmul.f32 %v669_v37, %v911_v1 }
  0x19   :  { %v241_v43 = vmax.f32 %v192_v34, 0.0  ;;  %v195_v45 = vadd.f32 %v925_v7, %v139_v36  ;;  %v196_v48 = vadd.f32 %v925_v7, %v140_v41  ;;  %v142_v49 = vmul.f32 %v670_v42, %v911_v1  ;;  %v856_v34 = vld [vmem:[%s1163_s0 + $0x90] sm:$0xff]  }
  0x1a   :  { %v242_v47 = vmax.f32 %v193_v40, 0.0  ;;  %v673_v50 = vunpack.c.l.bf16 %v850_v38  ;;  %v243_v53 = vmax.f32 %v194_v44, 0.0  ;;  %v197_v55 = vadd.f32 %v925_v7, %v141_v46 }
  0x1b   :  { %v762_v52 = vpack.c.bf16 %v241_v43, %v240_v39  ;;  %v244_v54 = vmax.f32 %v195_v45, 0.0  ;;  %v245_v56 = vmax.f32 %v196_v48, 0.0  ;;  %v198_v57 = vadd.f32 %v925_v7, %v142_v49  ;;  %v857_v43 = vld [vmem:[%s1163_s0 + $0x98] sm:$0xff]  }
  0x1c   :  { %v674_v58 = vunpack.c.h.bf16 %v850_v38  ;;  %v143_v59 = vmul.f32 %v673_v50, %v911_v1  ;;  %v767_v61 = vpack.c.bf16 %v243_v53, %v242_v47  ;;  %v246_v62 = vmax.f32 %v197_v55, 0.0 }
  0x1d   :  { %869 = vst [vmem:[%s1166_s3 + $0x40] sm:$0xff] %v762_v52   ;;  %v677_v63 = vunpack.c.l.bf16 %v851_v51  ;;  %v678_v0 = vunpack.c.h.bf16 %v851_v51  ;;  %v772_v3 = vpack.c.bf16 %v245_v56, %v244_v54  ;;  %v247_v4 = vmax.f32 %v198_v57, 0.0  ;;  %v858_v56 = vld [vmem:[%s1163_s0 + $0xa0] sm:$0xff]  }
  0x1e   :  { %v144_v5 = vmul.f32 %v674_v58, %v911_v1  ;;  %v199_v6 = vadd.f32 %v925_v7, %v143_v59  ;;  %870 = vst [vmem:[%s1166_s3 + $0x48] sm:$0xff] %v767_v61   ;;  %v681_v10 = vunpack.c.l.bf16 %v852_v60  ;;  %v682_v11 = vunpack.c.h.bf16 %v852_v60 }
  0x1f   :  { %v145_v8 = vmul.f32 %v677_v63, %v911_v1  ;;  %v146_v9 = vmul.f32 %v678_v0, %v911_v1  ;;  %871 = vst [vmem:[%s1166_s3 + $0x50] sm:$0xff] %v772_v3   ;;  %v777_v13 = vpack.c.bf16 %v247_v4, %v246_v62  ;;  %v685_v16 = vunpack.c.l.bf16 %v853_v2 }
  0x20   :  { %v200_v14 = vadd.f32 %v925_v7, %v144_v5  ;;  %v248_v15 = vmax.f32 %v199_v6, 0.0  ;;  %v147_v19 = vmul.f32 %v681_v10, %v911_v1  ;;  %v148_v20 = vmul.f32 %v682_v11, %v911_v1 }
  0x21   :  { %v201_v17 = vadd.f32 %v925_v7, %v145_v8  ;;  %v202_v18 = vadd.f32 %v925_v7, %v146_v9  ;;  %872 = vst [vmem:[%s1166_s3 + $0x58] sm:$0xff] %v777_v13   ;;  %v686_v22 = vunpack.c.h.bf16 %v853_v2  ;;  %v149_v23 = vmul.f32 %v685_v16, %v911_v1  ;;  %v859_v2 = vld [vmem:[%s1163_s0 + $0xa8] sm:$0xff]   ;;  %v860_v16 = vld [vmem:[%s1163_s0 + $0xb0] sm:$0xff]  }
  0x22   :  { %v249_v21 = vmax.f32 %v200_v14, 0.0  ;;  %v689_v24 = vunpack.c.l.bf16 %v854_v12  ;;  %v203_v27 = vadd.f32 %v925_v7, %v147_v19  ;;  %v204_v28 = vadd.f32 %v925_v7, %v148_v20 }
  0x23   :  { %v250_v25 = vmax.f32 %v201_v17, 0.0  ;;  %v251_v26 = vmax.f32 %v202_v18, 0.0  ;;  %v150_v31 = vmul.f32 %v686_v22, %v911_v1  ;;  %v205_v32 = vadd.f32 %v925_v7, %v149_v23 }
  0x24   :  { %v782_v30 = vpack.c.bf16 %v249_v21, %v248_v15  ;;  %v690_v33 = vunpack.c.h.bf16 %v854_v12  ;;  %v252_v36 = vmax.f32 %v203_v27, 0.0  ;;  %v253_v37 = vmax.f32 %v204_v28, 0.0  ;;  %v861_v21 = vld [vmem:[%s1163_s0 + $0xb8] sm:$0xff]  }
  0x25   :  { %v787_v35 = vpack.c.bf16 %v251_v26, %v250_v25  ;;  %v151_v38 = vmul.f32 %v689_v24, %v911_v1  ;;  %v206_v39 = vadd.f32 %v925_v7, %v150_v31  ;;  %v254_v40 = vmax.f32 %v205_v32, 0.0 }
  0x26   :  { %873 = vst [vmem:[%s1166_s3 + $0x60] sm:$0xff] %v782_v30   ;;  %v152_v41 = vmul.f32 %v690_v33, %v911_v1  ;;  %v693_v42 = vunpack.c.l.bf16 %v855_v29  ;;  %v792_v44 = vpack.c.bf16 %v253_v37, %v252_v36  ;;  %v694_v46 = vunpack.c.h.bf16 %v855_v29 }
  0x27   :  { %874 = vst [vmem:[%s1166_s3 + $0x68] sm:$0xff] %v787_v35   ;;  %v207_v45 = vadd.f32 %v925_v7, %v151_v38  ;;  %v697_v47 = vunpack.c.l.bf16 %v856_v34  ;;  %v255_v48 = vmax.f32 %v206_v39, 0.0  ;;  %v698_v51 = vunpack.c.h.bf16 %v856_v34  ;;  %v62_v34 = vld [vmem:[%s1163_s0 + $0xc0] sm:$0xf] }
  0x28   :  { %v208_v49 = vadd.f32 %v925_v7, %v152_v41  ;;  %v153_v50 = vmul.f32 %v693_v42, %v911_v1  ;;  %875 = vst [vmem:[%s1166_s3 + $0x70] sm:$0xff] %v792_v44   ;;  %v154_v53 = vmul.f32 %v694_v46, %v911_v1  ;;  %v701_v55 = vunpack.c.l.bf16 %v857_v43 }
  0x29   :  { %v256_v52 = vmax.f32 %v207_v45, 0.0  ;;  %v155_v54 = vmul.f32 %v697_v47, %v911_v1  ;;  %v797_v57 = vpack.c.bf16 %v255_v48, %v254_v40  ;;  %v156_v60 = vmul.f32 %v698_v51, %v911_v1 }
  0x2a   :  { %v257_v58 = vmax.f32 %v208_v49, 0.0  ;;  %v209_v59 = vadd.f32 %v925_v7, %v153_v50  ;;  %v210_v61 = vadd.f32 %v925_v7, %v154_v53  ;;  %v702_v63 = vunpack.c.h.bf16 %v857_v43 }
  0x2b   :  { %v211_v62 = vadd.f32 %v925_v7, %v155_v54  ;;  %v157_v0 = vmul.f32 %v701_v55, %v911_v1  ;;  %876 = vst [vmem:[%s1166_s3 + $0x78] sm:$0xff] %v797_v57   ;;  %v212_v5 = vadd.f32 %v925_v7, %v156_v60  ;;  %v705_v6 = vunpack.c.l.bf16 %v858_v56 }
  0x2c   :  { %v802_v3 = vpack.c.bf16 %v257_v58, %v256_v52  ;;  %v258_v4 = vmax.f32 %v209_v59, 0.0  ;;  %v259_v8 = vmax.f32 %v210_v61, 0.0  ;;  %v158_v10 = vmul.f32 %v702_v63, %v911_v1 }
  0x2d   :  { %v260_v9 = vmax.f32 %v211_v62, 0.0  ;;  %v213_v11 = vadd.f32 %v925_v7, %v157_v0  ;;  %v261_v12 = vmax.f32 %v212_v5, 0.0  ;;  %v706_v13 = vunpack.c.h.bf16 %v858_v56 }
  0x2e   :  { %877 = vst [vmem:[%s1166_s3 + $0x80] sm:$0xff] %v802_v3   ;;  %v159_v14 = vmul.f32 %v705_v6, %v911_v1  ;;  %v709_v15 = vunpack.c.l.bf16 %v859_v2  ;;  %v807_v17 = vpack.c.bf16 %v259_v8, %v258_v4  ;;  %v214_v18 = vadd.f32 %v925_v7, %v158_v10 }
  0x2f   :  { %v262_v19 = vmax.f32 %v213_v11, 0.0  ;;  %v710_v20 = vunpack.c.h.bf16 %v859_v2  ;;  %v812_v22 = vpack.c.bf16 %v261_v12, %v260_v9  ;;  %v160_v23 = vmul.f32 %v706_v13, %v911_v1 }
  0x30   :  { %v215_v24 = vadd.f32 %v925_v7, %v159_v14  ;;  %v161_v25 = vmul.f32 %v709_v15, %v911_v1  ;;  %878 = vst [vmem:[%s1166_s3 + $0x88] sm:$0xff] %v807_v17   ;;  %v263_v26 = vmax.f32 %v214_v18, 0.0  ;;  %v713_v28 = vunpack.c.l.bf16 %v860_v16 }
  0x31   :  { %v162_v27 = vmul.f32 %v710_v20, %v911_v1  ;;  %v714_v29 = vunpack.c.h.bf16 %v860_v16  ;;  %879 = vst [vmem:[%s1166_s3 + $0x90] sm:$0xff] %v812_v22   ;;  %v216_v30 = vadd.f32 %v925_v7, %v160_v23  ;;  %v717_v33 = vunpack.c.l.bf16 %v861_v21 }
  0x32   :  { %v264_v31 = vmax.f32 %v215_v24, 0.0  ;;  %v217_v32 = vadd.f32 %v925_v7, %v161_v25  ;;  %v817_v35 = vpack.c.bf16 %v263_v26, %v262_v19  ;;  %v163_v37 = vmul.f32 %v713_v28, %v911_v1 }
  0x33   :  { %v218_v36 = vadd.f32 %v925_v7, %v162_v27  ;;  %v164_v38 = vmul.f32 %v714_v29, %v911_v1  ;;  %v265_v39 = vmax.f32 %v216_v30, 0.0  ;;  %v718_v41 = vunpack.c.h.bf16 %v861_v21 }
  0x34   :  { %v266_v40 = vmax.f32 %v217_v32, 0.0  ;;  %v165_v42 = vmul.f32 %v717_v33, %v911_v1  ;;  %880 = vst [vmem:[%s1166_s3 + $0x98] sm:$0xff] %v817_v35   ;;  %v219_v44 = vadd.f32 %v925_v7, %v163_v37  ;;  %v111_v46 = vunpack.c.l.bf16 %v62_v34 }
  0x35   :  { %v267_v43 = vmax.f32 %v218_v36, 0.0  ;;  %v220_v45 = vadd.f32 %v925_v7, %v164_v38  ;;  %v822_v47 = vpack.c.bf16 %v265_v39, %v264_v31  ;;  %v166_v48 = vmul.f32 %v718_v41, %v911_v1 }
  0x36   :  { %v221_v49 = vadd.f32 %v925_v7, %v165_v42  ;;  %v268_v51 = vmax.f32 %v219_v44, 0.0  ;;  %v167_v53 = vmul.f32 %v911_v1, %v111_v46 }
  0x37   :  { %v827_v50 = vpack.c.bf16 %v267_v43, %v266_v40  ;;  %v269_v52 = vmax.f32 %v220_v45, 0.0  ;;  %881 = vst [vmem:[%s1166_s3 + $0xa0] sm:$0xff] %v822_v47   ;;  %v222_v54 = vadd.f32 %v925_v7, %v166_v48 }
  0x38   :  { %v270_v55 = vmax.f32 %v221_v49, 0.0  ;;  %v223_v57 = vadd.f32 %v925_v7, %v167_v53 }
  0x39   :  { %882 = vst [vmem:[%s1166_s3 + $0xa8] sm:$0xff] %v827_v50   ;;  %v832_v56 = vpack.c.bf16 %v269_v52, %v268_v51  ;;  %v271_v58 = vmax.f32 %v222_v54, 0.0 }
  0x3a   :  { %v272_v1 = vmax.f32 %v223_v57, 0.0 }
  0x3b   :  { %883 = vst [vmem:[%s1166_s3 + $0xb0] sm:$0xff] %v832_v56   ;;  %v837_v59 = vpack.c.bf16 %v271_v58, %v270_v55 }
  0x3c   :  { %v622_v60 = vpack.c.bf16 %v272_v1, %v272_v1 }
  0x3d   :  { %884 = vst [vmem:[%s1166_s3 + $0xb8] sm:$0xff] %v837_v59  }
  0x3e   :  { %518 = vst [vmem:[%s1166_s3 + $0xc0] sm:$0xf] %v622_v60 }

// kernel: tile.13
= control target key start
LH: loop header
LB: loop body
LE: loop exit
PB: predicated region body
PF: predicated region fallthrough
CT: control target
= control target key end

     0   :  { %s22_s0 = inlined_call_operand.vmem [shape: f32[64], index: 0, kind: input, shape index: {}]   ;;  %s23_s1 = inlined_call_operand.vmem [shape: f32[4,64], index: 1, kind: output, shape index: {}]  }
   0x1   :  { %v4_v0 = vld [vmem:[%s22_s0] ss:$0 sm:$0xff] }
   0x2   :  { %5 = vst [vmem:[%s23_s1] sm:$0xf] %v4_v0 }

// kernel: tile.18
= control target key start
LH: loop header
LB: loop body
LE: loop exit
PB: predicated region body
PF: predicated region fallthrough
CT: control target
= control target key end

     0   :  { %s6_s8 = smov 3  ;;  %vm8_vm0 = vcmask 523264   ;;  %s30_s9 = smov 64   ;;  %vm15_vm1 = vcmask 1048064   ;;  %s50_s0 = inlined_call_operand.vmem [shape: f32[4,64], index: 0, kind: input, shape index: {}]   ;;  %s51_s1 = inlined_call_operand.vmem [shape: f32[1,256], index: 1, kind: output, shape index: {}]  }
   0x1   :  { %v4_v0 = vld [vmem:[%s50_s0] sm:$0xf]  ;;  %s11_s0 = smov 3 }
   0x2   :  { %5 = vst [vmem:[#allocation1] sm:$0xf] %v4_v0 }
   0x9   :  { %v12_v1 = vld [vmem:[#allocation1 + $0x1] ss:$2 sm:%s11_s0]   ;;  %v7_v2 = vld [vmem:[#allocation1] ss:$2 sm:%s6_s8]  }
   0xa   :  { %13 = vrot.lane.b32.xlu0 %v12_v1, %s30_s9  ;;  %9 = vst.msk [vmem:[#allocation0] ss:$8 sm:$0x3] %vm8_vm0, %v7_v2  }
  0x7c   :  { %v14_v3 = vpop.permute.xlu0 %13  }
  0x7d   :  { %16 = vst.msk [vmem:[#allocation0] ss:$8 sm:$0x3] %vm15_vm1, %v14_v3  }
  0x84   :  { %v20_v4 = vld [vmem:[#allocation0] sm:$0x1]  ;;  %v24_v5 = vld [vmem:[#allocation0 + $0x8] sm:$0x1] }
  0x85   :  { %22 = vst [vmem:[%s51_s1] sm:$0x1] %v20_v4  ;;  %28 = vst [vmem:[%s51_s1 + $0x1] sm:$0x1] %v24_v5 }

// kernel: generator_forward.8
= control target key start
LH: loop header
LB: loop body
LE: loop exit
PB: predicated region body
PF: predicated region fallthrough
CT: control target
= control target key end

     0   :  { %v55_v0 = vlaneseq  ;;  %s442_s0 = inlined_call_operand.vmem [shape: bf16[104,256], index: 0, kind: input, shape index: {}]   ;;  %s443_s1 = inlined_call_operand.vmem [shape: f32[1,256], index: 1, kind: input, shape index: {}]   ;;  %s444_s2 = inlined_call_operand.vmem [shape: f32[1,256], index: 2, kind: input, shape index: {}]   ;;  %s445_s3 = inlined_call_operand.vmem [shape: bf16[104,256], index: 3, kind: output, shape index: {}]  }
   0x1   :  { %v14_v1 = vld [vmem:[%s442_s0] sm:$0xff]  ;;  %v15_v6 = vld [vmem:[%s442_s0 + $0x8] sm:$0xff]  ;;  %v16_v7 = vld [vmem:[%s442_s0 + $0x10] sm:$0xff] }
   0x2   :  { %v53_v2 = vld [vmem:[%s443_s1] sm:$0x3]  ;;  %v27_v3 = vunpack.c.l.bf16 %v14_v1  ;;  %v28_v4 = vunpack.c.h.bf16 %v14_v1  ;;  %v56_v5 = vshrl.u32 %v55_v0, 7  ;;  %v17_v8 = vld [vmem:[%s442_s0 + $0x18] sm:$0xff]  ;;  %v29_v10 = vunpack.c.l.bf16 %v15_v6  ;;  %v19_v15 = vld [vmem:[%s442_s0 + $0x28] sm:$0xff] }
   0x3   :  { %v91_v9 = vld [vmem:[%s444_s2] sm:$0x3]  ;;  %v30_v11 = vunpack.c.h.bf16 %v15_v6  ;;  %v31_v12 = vunpack.c.l.bf16 %v16_v7  ;;  %v32_v13 = vunpack.c.h.bf16 %v16_v7  ;;  %v33_v18 = vunpack.c.l.bf16 %v17_v8  ;;  %v20_v20 = vld [vmem:[%s442_s0 + $0x30] sm:$0xff]  ;;  %v21_v21 = vld [vmem:[%s442_s0 + $0x38] sm:$0xff] }
   0x4   :  { %v18_v14 = vld [vmem:[%s442_s0 + $0x20] sm:$0xff]  ;;  %v57_v16 = vsub.s32 0, %v56_v5  ;;  %v61_v17 = vsub.s32 1, %v56_v5  ;;  %v34_v19 = vunpack.c.h.bf16 %v17_v8  ;;  %v37_v24 = vunpack.c.l.bf16 %v19_v15 }
   0x5   :  { %v35_v22 = vunpack.c.l.bf16 %v18_v14  ;;  %v36_v23 = vunpack.c.h.bf16 %v18_v14  ;;  %v38_v25 = vunpack.c.h.bf16 %v19_v15  ;;  %v39_v30 = vunpack.c.l.bf16 %v20_v20 }
   0x6   :  { %v328_v26 = vrot.slane %v53_v2, %v57_v16  ;;  %v330_v27 = vrot.slane %v53_v2, %v61_v17  ;;  %v332_v28 = vrot.slane %v91_v9, %v57_v16  ;;  %v334_v29 = vrot.slane %v91_v9, %v61_v17 }
   0x7   :  { %v40_v31 = vunpack.c.h.bf16 %v20_v20  ;;  %v41_v32 = vunpack.c.l.bf16 %v21_v21  ;;  %v42_v33 = vunpack.c.h.bf16 %v21_v21 }
   0x8   :  { %v65_v34 = vmul.f32 %v328_v26, %v27_v3  ;;  %v66_v35 = vmul.f32 %v330_v27, %v28_v4  ;;  %v67_v36 = vmul.f32 %v328_v26, %v29_v10  ;;  %v68_v37 = vmul.f32 %v330_v27, %v30_v11  ;;  %v22_v10 = vld [vmem:[%s442_s0 + $0x40] sm:$0xff] }
   0x9   :  { %v69_v38 = vmul.f32 %v328_v26, %v31_v12  ;;  %v70_v39 = vmul.f32 %v330_v27, %v32_v13  ;;  %v71_v40 = vmul.f32 %v328_v26, %v33_v18  ;;  %v72_v41 = vmul.f32 %v330_v27, %v34_v19  ;;  %v23_v19 = vld [vmem:[%s442_s0 + $0x48] sm:$0xff] }
   0xa   :  { %v103_v42 = vadd.f32 %v332_v28, %v65_v34  ;;  %v104_v43 = vadd.f32 %v334_v29, %v66_v35  ;;  %v105_v44 = vadd.f32 %v332_v28, %v67_v36  ;;  %v106_v45 = vadd.f32 %v334_v29, %v68_v37 }
   0xb   :  { %v107_v46 = vadd.f32 %v332_v28, %v69_v38  ;;  %v108_v47 = vadd.f32 %v334_v29, %v70_v39  ;;  %v109_v48 = vadd.f32 %v332_v28, %v71_v40  ;;  %v110_v49 = vadd.f32 %v334_v29, %v72_v41 }
   0xc   :  { %v129_v50 = vmax.f32 %v103_v42, 0.0  ;;  %v130_v51 = vmax.f32 %v104_v43, 0.0  ;;  %v131_v52 = vmax.f32 %v105_v44, 0.0  ;;  %v132_v53 = vmax.f32 %v106_v45, 0.0 }
   0xd   :  { %v133_v54 = vmax.f32 %v107_v46, 0.0  ;;  %v134_v55 = vmax.f32 %v108_v47, 0.0  ;;  %v135_v56 = vmax.f32 %v109_v48, 0.0  ;;  %v136_v57 = vmax.f32 %v110_v49, 0.0 }
   0xe   :  { %v265_v58 = vpack.c.bf16 %v130_v51, %v129_v50  ;;  %v266_v59 = vpack.c.bf16 %v132_v53, %v131_v52  ;;  %v73_v60 = vmul.f32 %v328_v26, %v35_v22  ;;  %v74_v61 = vmul.f32 %v330_v27, %v36_v23  ;;  %v26_v50 = vld [vmem:[%s442_s0 + $0x60] sm:$0xff] }
   0xf   :  { %v267_v62 = vpack.c.bf16 %v134_v55, %v133_v54  ;;  %v268_v63 = vpack.c.bf16 %v136_v57, %v135_v56  ;;  %v75_v0 = vmul.f32 %v328_v26, %v37_v24  ;;  %v76_v1 = vmul.f32 %v330_v27, %v38_v25  ;;  %v24_v24 = vld [vmem:[%s442_s0 + $0x50] sm:$0xff] }
  0x10   :  { %235 = vst [vmem:[%s445_s3] sm:$0xff] %v265_v58  ;;  %236 = vst [vmem:[%s445_s3 + $0x8] sm:$0xff] %v266_v59  ;;  %v111_v2 = vadd.f32 %v332_v28, %v73_v60  ;;  %v112_v3 = vadd.f32 %v334_v29, %v74_v61  ;;  %v77_v4 = vmul.f32 %v328_v26, %v39_v30  ;;  %v43_v23 = vunpack.c.l.bf16 %v22_v10 }
  0x11   :  { %v78_v5 = vmul.f32 %v330_v27, %v40_v31  ;;  %237 = vst [vmem:[%s445_s3 + $0x10] sm:$0xff] %v267_v62  ;;  %238 = vst [vmem:[%s445_s3 + $0x18] sm:$0xff] %v268_v63  ;;  %v113_v6 = vadd.f32 %v332_v28, %v75_v0  ;;  %v114_v7 = vadd.f32 %v334_v29, %v76_v1  ;;  %v45_v36 = vunpack.c.l.bf16 %v23_v19 }
  0x12   :  { %v79_v8 = vmul.f32 %v328_v26, %v41_v32  ;;  %v80_v9 = vmul.f32 %v330_v27, %v42_v33  ;;  %v137_v11 = vmax.f32 %v111_v2, 0.0  ;;  %v138_v12 = vmax.f32 %v112_v3, 0.0  ;;  %v25_v33 = vld [vmem:[%s442_s0 + $0x58] sm:$0xff] }
  0x13   :  { %v115_v13 = vadd.f32 %v332_v28, %v77_v4  ;;  %v116_v14 = vadd.f32 %v334_v29, %v78_v5  ;;  %v139_v15 = vmax.f32 %v113_v6, 0.0  ;;  %v140_v16 = vmax.f32 %v114_v7, 0.0 }
  0x14   :  { %v117_v17 = vadd.f32 %v332_v28, %v79_v8  ;;  %v118_v18 = vadd.f32 %v334_v29, %v80_v9  ;;  %v269_v20 = vpack.c.bf16 %v138_v12, %v137_v11  ;;  %v44_v32 = vunpack.c.h.bf16 %v22_v10 }
  0x15   :  { %v141_v21 = vmax.f32 %v115_v13, 0.0  ;;  %v142_v22 = vmax.f32 %v116_v14, 0.0  ;;  %v270_v25 = vpack.c.bf16 %v140_v16, %v139_v15  ;;  %v81_v35 = vmul.f32 %v328_v26, %v43_v23 }
  0x16   :  { %v143_v30 = vmax.f32 %v117_v17, 0.0  ;;  %v144_v31 = vmax.f32 %v118_v18, 0.0  ;;  %239 = vst [vmem:[%s445_s3 + $0x20] sm:$0xff] %v269_v20  ;;  %v46_v37 = vunpack.c.h.bf16 %v23_v19  ;;  %v82_v39 = vmul.f32 %v330_v27, %v44_v32 }
  0x17   :  { %v271_v34 = vpack.c.bf16 %v142_v22, %v141_v21  ;;  %240 = vst [vmem:[%s445_s3 + $0x28] sm:$0xff] %v270_v25  ;;  %v47_v40 = vunpack.c.l.bf16 %v24_v24  ;;  %v48_v41 = vunpack.c.h.bf16 %v24_v24  ;;  %v119_v42 = vadd.f32 %v332_v28, %v81_v35 }
  0x18   :  { %v272_v38 = vpack.c.bf16 %v144_v31, %v143_v30  ;;  %v83_v43 = vmul.f32 %v328_v26, %v45_v36  ;;  %v84_v44 = vmul.f32 %v330_v27, %v46_v37  ;;  %v49_v45 = vunpack.c.l.bf16 %v25_v33 }
  0x19   :  { %241 = vst [vmem:[%s445_s3 + $0x30] sm:$0xff] %v271_v34  ;;  %v120_v46 = vadd.f32 %v334_v29, %v82_v39  ;;  %v85_v47 = vmul.f32 %v328_v26, %v47_v40  ;;  %v86_v48 = vmul.f32 %v330_v27, %v48_v41  ;;  %v50_v49 = vunpack.c.h.bf16 %v25_v33 }
  0x1a   :  { %242 = vst [vmem:[%s445_s3 + $0x38] sm:$0xff] %v272_v38  ;;  %v145_v51 = vmax.f32 %v119_v42, 0.0  ;;  %v121_v52 = vadd.f32 %v332_v28, %v83_v43  ;;  %v122_v53 = vadd.f32 %v334_v29, %v84_v44  ;;  %v87_v54 = vmul.f32 %v328_v26, %v49_v45 }
  0x1b   :  { %v146_v55 = vmax.f32 %v120_v46, 0.0  ;;  %v123_v56 = vadd.f32 %v332_v28, %v85_v47  ;;  %v124_v57 = vadd.f32 %v334_v29, %v86_v48  ;;  %v88_v58 = vmul.f32 %v330_v27, %v50_v49 }
  0x1c   :  { %v147_v59 = vmax.f32 %v121_v52, 0.0  ;;  %v148_v60 = vmax.f32 %v122_v53, 0.0  ;;  %v125_v61 = vadd.f32 %v332_v28, %v87_v54  ;;  %v51_v62 = vunpack.c.l.bf16 %v26_v50 }
  0x1d   :  { %v273_v63 = vpack.c.bf16 %v146_v55, %v145_v51  ;;  %v149_v0 = vmax.f32 %v123_v56, 0.0  ;;  %v150_v1 = vmax.f32 %v124_v57, 0.0  ;;  %v126_v2 = vadd.f32 %v334_v29, %v88_v58 }
  0x1e   :  { %v274_v3 = vpack.c.bf16 %v148_v60, %v147_v59  ;;  %v151_v4 = vmax.f32 %v125_v61, 0.0  ;;  %v52_v5 = vunpack.c.h.bf16 %v26_v50  ;;  %v89_v6 = vmul.f32 %v328_v26, %v51_v62 }
  0x1f   :  { %243 = vst [vmem:[%s445_s3 + $0x40] sm:$0xff] %v273_v63  ;;  %v275_v7 = vpack.c.bf16 %v150_v1, %v149_v0  ;;  %v152_v8 = vmax.f32 %v126_v2, 0.0 }
  0x20   :  { %244 = vst [vmem:[%s445_s3 + $0x48] sm:$0xff] %v274_v3  ;;  %v90_v9 = vmul.f32 %v330_v27, %v52_v5  ;;  %v127_v10 = vadd.f32 %v332_v28, %v89_v6 }
  0x21   :  { %245 = vst [vmem:[%s445_s3 + $0x50] sm:$0xff] %v275_v7  ;;  %v276_v11 = vpack.c.bf16 %v152_v8, %v151_v4 }
  0x22   :  { %v128_v26 = vadd.f32 %v334_v29, %v90_v9  ;;  %v153_v12 = vmax.f32 %v127_v10, 0.0 }
  0x23   :  { %246 = vst [vmem:[%s445_s3 + $0x58] sm:$0xff] %v276_v11 }
  0x24   :  { %v154_v13 = vmax.f32 %v128_v26, 0.0 }
  0x26   :  { %v277_v14 = vpack.c.bf16 %v154_v13, %v153_v12 }
  0x28   :  { %247 = vst [vmem:[%s445_s3 + $0x60] sm:$0xff] %v277_v14 }

// kernel: generator_forward.7
= control target key start
LH: loop header
LB: loop body
LE: loop exit
PB: predicated region body
PF: predicated region fallthrough
CT: control target
= control target key end

     0   :  { %s3595_s1 = inlined_call_operand.vmem [shape: bf16[1152,256], index: 1, kind: input, shape index: {}]   ;;  %s3596_s0 = inlined_call_operand.vmem [shape: bf16[104,1152], index: 0, kind: input, shape index: {}]   ;;  %s3597_s3 = inlined_call_operand.vmem [shape: f32[1,256], index: 3, kind: output, shape index: {1}]   ;;  %s3598_s4 = inlined_call_operand.vmem [shape: f32[1,256], index: 4, kind: output, shape index: {2}]   ;;  %s3599_s2 = inlined_call_operand.vmem [shape: bf16[104,256], index: 2, kind: output, shape index: {0}]  }
   0x1   :  { %v2390_v0 = vld [vmem:[%s3595_s1 + $0x4] ss:$8 sps:$4 sm:$0xff]   ;;  %v2394_v2 = vld [vmem:[%s3595_s1] ss:$8 sps:$4 sm:$0xff]   ;;  %v2396_v4 = vld [vmem:[%s3595_s1 + $0x14] ss:$8 sps:$4 sm:$0xff]  }
   0x2   :  { %v2392_v1 = vld [vmem:[%s3595_s1 + $0x204] ss:$8 sps:$4 sm:$0xff]   ;;  %1252 = vmatprep.subr.bf16.mxu1 %v2390_v0  ;;  %v2395_v3 = vld [vmem:[%s3595_s1 + $0x200] ss:$8 sps:$4 sm:$0xff]   ;;  %v2398_v5 = vld [vmem:[%s3595_s1 + $0x214] ss:$8 sps:$4 sm:$0xff]  }
   0x3   :  { %1454 = vmatprep.subr.bf16.mxu0 %v2392_v1  ;;  %1253 = vmatpush1.bf16.msra.mxu1 %v2394_v2  ;;  %v2400_v6 = vld [vmem:[%s3595_s1 + $0x10] ss:$8 sps:$4 sm:$0xff]   ;;  %v2402_v8 = vld [vmem:[%s3595_s1 + $0x24] ss:$8 sps:$4 sm:$0xff]   ;;  %v2406_v10 = vld [vmem:[%s3595_s1 + $0x20] ss:$8 sps:$4 sm:$0xff]  }
   0x4   :  { %1455 = vmatpush1.bf16.msra.mxu0 %v2395_v3  ;;  %1254 = vmatprep.subr.bf16.mxu1 %v2396_v4  ;;  %v2401_v7 = vld [vmem:[%s3595_s1 + $0x210] ss:$8 sps:$4 sm:$0xff]   ;;  %v2404_v9 = vld [vmem:[%s3595_s1 + $0x224] ss:$8 sps:$4 sm:$0xff]   ;;  %v2407_v11 = vld [vmem:[%s3595_s1 + $0x220] ss:$8 sps:$4 sm:$0xff]  }
   0x5   :  { %1456 = vmatprep.subr.bf16.mxu0 %v2398_v5  ;;  %v2408_v12 = vld [vmem:[%s3595_s1 + $0x34] ss:$8 sps:$4 sm:$0xff]   ;;  %v2412_v14 = vld [vmem:[%s3595_s1 + $0x30] ss:$8 sps:$4 sm:$0xff]   ;;  %v2414_v16 = vld [vmem:[%s3595_s1 + $0x44] ss:$8 sps:$4 sm:$0xff]  }
   0x6   :  { %v2410_v13 = vld [vmem:[%s3595_s1 + $0x234] ss:$8 sps:$4 sm:$0xff]   ;;  %v2413_v15 = vld [vmem:[%s3595_s1 + $0x230] ss:$8 sps:$4 sm:$0xff]   ;;  %v2416_v17 = vld [vmem:[%s3595_s1 + $0x244] ss:$8 sps:$4 sm:$0xff]  }
   0x7   :  { %1255 = vmatpush1.bf16.msra.mxu1 %v2400_v6  ;;  %v2418_v18 = vld [vmem:[%s3595_s1 + $0x40] ss:$8 sps:$4 sm:$0xff]   ;;  %v2420_v20 = vld [vmem:[%s3595_s1 + $0x54] ss:$8 sps:$4 sm:$0xff]   ;;  %v2424_v22 = vld [vmem:[%s3595_s1 + $0x50] ss:$8 sps:$4 sm:$0xff]  }
   0x8   :  { %1457 = vmatpush1.bf16.msra.mxu0 %v2401_v7  ;;  %1256 = vmatprep.subr.bf16.mxu1 %v2402_v8  ;;  %v2419_v19 = vld [vmem:[%s3595_s1 + $0x240] ss:$8 sps:$4 sm:$0xff]   ;;  %v2422_v21 = vld [vmem:[%s3595_s1 + $0x254] ss:$8 sps:$4 sm:$0xff]   ;;  %v2425_v23 = vld [vmem:[%s3595_s1 + $0x250] ss:$8 sps:$4 sm:$0xff]  }
   0x9   :  { %1458 = vmatprep.subr.bf16.mxu0 %v2404_v9  ;;  %v2426_v24 = vld [vmem:[%s3595_s1 + $0x64] ss:$8 sps:$4 sm:$0xff]   ;;  %v2430_v26 = vld [vmem:[%s3595_s1 + $0x60] ss:$8 sps:$4 sm:$0xff]   ;;  %v2432_v28 = vld [vmem:[%s3595_s1 + $0x74] ss:$8 sps:$4 sm:$0xff]  }
   0xa   :  { %v2428_v25 = vld [vmem:[%s3595_s1 + $0x264] ss:$8 sps:$4 sm:$0xff]   ;;  %v2431_v27 = vld [vmem:[%s3595_s1 + $0x260] ss:$8 sps:$4 sm:$0xff]   ;;  %v2434_v29 = vld [vmem:[%s3595_s1 + $0x274] ss:$8 sps:$4 sm:$0xff]  }
   0xb   :  { %1257 = vmatpush1.bf16.msra.mxu1 %v2406_v10  ;;  %v2436_v30 = vld [vmem:[%s3595_s1 + $0x70] ss:$8 sps:$4 sm:$0xff]   ;;  %v2438_v32 = vld [vmem:[%s3595_s1 + $0x84] ss:$8 sps:$4 sm:$0xff]   ;;  %v2442_v34 = vld [vmem:[%s3595_s1 + $0x80] ss:$8 sps:$4 sm:$0xff]  }
   0xc   :  { %1459 = vmatpush1.bf16.msra.mxu0 %v2407_v11  ;;  %1258 = vmatprep.subr.bf16.mxu1 %v2408_v12  ;;  %v2437_v31 = vld [vmem:[%s3595_s1 + $0x270] ss:$8 sps:$4 sm:$0xff]   ;;  %v2440_v33 = vld [vmem:[%s3595_s1 + $0x284] ss:$8 sps:$4 sm:$0xff]   ;;  %v2443_v35 = vld [vmem:[%s3595_s1 + $0x280] ss:$8 sps:$4 sm:$0xff]  }
   0xd   :  { %1460 = vmatprep.subr.bf16.mxu0 %v2410_v13  ;;  %v2444_v36 = vld [vmem:[%s3595_s1 + $0x94] ss:$8 sps:$4 sm:$0xff]   ;;  %v2448_v38 = vld [vmem:[%s3595_s1 + $0x90] ss:$8 sps:$4 sm:$0xff]   ;;  %v2450_v40 = vld [vmem:[%s3595_s1 + $0xa4] ss:$8 sps:$4 sm:$0xff]  }
   0xe   :  { %v2446_v37 = vld [vmem:[%s3595_s1 + $0x294] ss:$8 sps:$4 sm:$0xff]   ;;  %v2449_v39 = vld [vmem:[%s3595_s1 + $0x290] ss:$8 sps:$4 sm:$0xff]   ;;  %v2452_v41 = vld [vmem:[%s3595_s1 + $0x2a4] ss:$8 sps:$4 sm:$0xff]  }
   0xf   :  { %1259 = vmatpush1.bf16.msra.mxu1 %v2412_v14  ;;  %v2454_v42 = vld [vmem:[%s3595_s1 + $0xa0] ss:$8 sps:$4 sm:$0xff]   ;;  %v2456_v44 = vld [vmem:[%s3595_s1 + $0xb4] ss:$8 sps:$4 sm:$0xff]   ;;  %v2460_v46 = vld [vmem:[%s3595_s1 + $0xb0] ss:$8 sps:$4 sm:$0xff]  }
  0x10   :  { %1461 = vmatpush1.bf16.msra.mxu0 %v2413_v15  ;;  %1260 = vmatprep.subr.bf16.mxu1 %v2414_v16  ;;  %v2455_v43 = vld [vmem:[%s3595_s1 + $0x2a0] ss:$8 sps:$4 sm:$0xff]   ;;  %v2458_v45 = vld [vmem:[%s3595_s1 + $0x2b4] ss:$8 sps:$4 sm:$0xff]   ;;  %v2461_v47 = vld [vmem:[%s3595_s1 + $0x2b0] ss:$8 sps:$4 sm:$0xff]  }
  0x11   :  { %1462 = vmatprep.subr.bf16.mxu0 %v2416_v17  ;;  %v2488_v48 = vld [vmem:[%s3596_s0 + $0x4] ss:$36 sps:$4 sm:$0xff]   ;;  %v2494_v51 = vld [vmem:[%s3596_s0 + $0x14] ss:$36 sps:$4 sm:$0xff]   ;;  %v2516_v10 = vld [vmem:[%s3596_s0 + $0x5c] ss:$36 sps:$4 sm:$0xff]  }
  0x12   :  { %v2462_v49 = vld [vmem:[%s3595_s1 + $0xc4] ss:$8 sps:$4 sm:$0xff]   ;;  %1284 = vmatprep.mubr.bf16.mxu1 %v2488_v48  ;;  %v2466_v52 = vld [vmem:[%s3595_s1 + $0xc0] ss:$8 sps:$4 sm:$0xff]   ;;  %v2468_v54 = vld [vmem:[%s3595_s1 + $0xd4] ss:$8 sps:$4 sm:$0xff]   ;;  %1486 = vmatprep.mubr.bf16.mxu0 %v2494_v51 }
  0x13   :  { %1261 = vmatpush1.bf16.msra.mxu1 %v2418_v18  ;;  %v2464_v50 = vld [vmem:[%s3595_s1 + $0x2c4] ss:$8 sps:$4 sm:$0xff]   ;;  %v2467_v53 = vld [vmem:[%s3595_s1 + $0x2c0] ss:$8 sps:$4 sm:$0xff]   ;;  %v2470_v55 = vld [vmem:[%s3595_s1 + $0x2d4] ss:$8 sps:$4 sm:$0xff]  }
  0x14   :  { %1463 = vmatpush1.bf16.msra.mxu0 %v2419_v19  ;;  %1262 = vmatprep.subr.bf16.mxu1 %v2420_v20  ;;  %v2472_v56 = vld [vmem:[%s3595_s1 + $0xd0] ss:$8 sps:$4 sm:$0xff]   ;;  %v2474_v58 = vld [vmem:[%s3595_s1 + $0xe4] ss:$8 sps:$4 sm:$0xff]   ;;  %v2478_v60 = vld [vmem:[%s3595_s1 + $0xe0] ss:$8 sps:$4 sm:$0xff]  }
  0x15   :  { %1464 = vmatprep.subr.bf16.mxu0 %v2422_v21  ;;  %v2473_v57 = vld [vmem:[%s3595_s1 + $0x2d0] ss:$8 sps:$4 sm:$0xff]   ;;  %v2476_v59 = vld [vmem:[%s3595_s1 + $0x2e4] ss:$8 sps:$4 sm:$0xff]   ;;  %v2479_v61 = vld [vmem:[%s3595_s1 + $0x2e0] ss:$8 sps:$4 sm:$0xff]  }
  0x16   :  { %v2480_v62 = vld [vmem:[%s3595_s1 + $0xf4] ss:$8 sps:$4 sm:$0xff]   ;;  %v2484_v0 = vld [vmem:[%s3595_s1 + $0xf0] ss:$8 sps:$4 sm:$0xff]   ;;  %v2491_v2 = vld [vmem:[%s3595_s1 + $0x104] ss:$8 sps:$4 sm:$0xff]  }
  0x17   :  { %1263 = vmatpush1.bf16.msra.mxu1 %v2424_v22  ;;  %v2482_v63 = vld [vmem:[%s3595_s1 + $0x2f4] ss:$8 sps:$4 sm:$0xff]   ;;  %v2485_v1 = vld [vmem:[%s3595_s1 + $0x2f0] ss:$8 sps:$4 sm:$0xff]   ;;  %v2925_v3 = vld [vmem:[%s3595_s1 + $0x304] ss:$8 sps:$4 sm:$0xff]  }
  0x18   :  { %1465 = vmatpush1.bf16.msra.mxu0 %v2425_v23  ;;  %1264 = vmatprep.subr.bf16.mxu1 %v2426_v24  ;;  %v2486_v4 = vld [vmem:[%s3596_s0] ss:$36 sps:$4 sm:$0xff]   ;;  %v2492_v6 = vld [vmem:[%s3596_s0 + $0x10] ss:$36 sps:$4 sm:$0xff]   ;;  %v2520_v18 = vld [vmem:[%s3596_s0 + $0x58] ss:$36 sps:$4 sm:$0xff]  }
  0x19   :  { %1466 = vmatprep.subr.bf16.mxu0 %v2428_v25  ;;  %v2489_v5 = vld [vmem:[%s3595_s1 + $0x100] ss:$8 sps:$4 sm:$0xff]   ;;  %v2500_v8 = vld [vmem:[%s3595_s1 + $0x114] ss:$8 sps:$4 sm:$0xff]   ;;  %v2518_v11 = vld [vmem:[%s3596_s0 + $0x4c] ss:$36 sps:$4 sm:$0xff]  }
  0x1a   :  { %v2939_v7 = vld [vmem:[%s3595_s1 + $0x300] ss:$8 sps:$4 sm:$0xff]   ;;  %v2948_v9 = vld [vmem:[%s3595_s1 + $0x314] ss:$8 sps:$4 sm:$0xff]   ;;  %v2498_v12 = vld [vmem:[%s3595_s1 + $0x110] ss:$8 sps:$4 sm:$0xff]  }
  0x1b   :  { %1265 = vmatpush1.bf16.msra.mxu1 %v2430_v26  ;;  %v2962_v13 = vld [vmem:[%s3595_s1 + $0x310] ss:$8 sps:$4 sm:$0xff]   ;;  %v2506_v14 = vld [vmem:[%s3595_s1 + $0x124] ss:$8 sps:$4 sm:$0xff]   ;;  %v2504_v16 = vld [vmem:[%s3595_s1 + $0x120] ss:$8 sps:$4 sm:$0xff]  }
  0x1c   :  { %1467 = vmatpush1.bf16.msra.mxu0 %v2431_v27  ;;  %1266 = vmatprep.subr.bf16.mxu1 %v2432_v28  ;;  %v2972_v15 = vld [vmem:[%s3595_s1 + $0x324] ss:$8 sps:$4 sm:$0xff]   ;;  %v2980_v17 = vld [vmem:[%s3595_s1 + $0x320] ss:$8 sps:$4 sm:$0xff]   ;;  %v2512_v20 = vld [vmem:[%s3595_s1 + $0x134] ss:$8 sps:$4 sm:$0xff]  }
  0x1d   :  { %1468 = vmatprep.subr.bf16.mxu0 %v2434_v29  ;;  %v2521_v19 = vld [vmem:[%s3596_s0 + $0x48] ss:$36 sps:$4 sm:$0xff]   ;;  %v2996_v21 = vld [vmem:[%s3595_s1 + $0x334] ss:$8 sps:$4 sm:$0xff]   ;;  %v2510_v24 = vld [vmem:[%s3595_s1 + $0x130] ss:$8 sps:$4 sm:$0xff]  }
  0x1e   :  { %v2534_v22 = vld [vmem:[%s3596_s0 + $0xa4] ss:$36 sps:$4 sm:$0xff]   ;;  %v2536_v23 = vld [vmem:[%s3596_s0 + $0x94] ss:$36 sps:$4 sm:$0xff]  }
  0x1f   :  { %1267 = vmatpush1.bf16.msra.mxu1 %v2436_v30  ;;  %v3010_v25 = vld [vmem:[%s3595_s1 + $0x330] ss:$8 sps:$4 sm:$0xff]   ;;  %v2524_v26 = vld [vmem:[%s3595_s1 + $0x144] ss:$8 sps:$4 sm:$0xff]   ;;  %v2522_v28 = vld [vmem:[%s3595_s1 + $0x140] ss:$8 sps:$4 sm:$0xff]  }
  0x20   :  { %1469 = vmatpush1.bf16.msra.mxu0 %v2437_v31  ;;  %1268 = vmatprep.subr.bf16.mxu1 %v2438_v32  ;;  %v3020_v27 = vld [vmem:[%s3595_s1 + $0x344] ss:$8 sps:$4 sm:$0xff]   ;;  %v3028_v29 = vld [vmem:[%s3595_s1 + $0x340] ss:$8 sps:$4 sm:$0xff]   ;;  %v2539_v31 = vld [vmem:[%s3596_s0 + $0x90] ss:$36 sps:$4 sm:$0xff]  }
  0x21   :  { %1470 = vmatprep.subr.bf16.mxu0 %v2440_v33  ;;  %v2538_v30 = vld [vmem:[%s3596_s0 + $0xa0] ss:$36 sps:$4 sm:$0xff]   ;;  %v2530_v32 = vld [vmem:[%s3595_s1 + $0x154] ss:$8 sps:$4 sm:$0xff]   ;;  %v2546_v48 = vld [vmem:[%s3595_s1 + $0x170] ss:$8 sps:$4 sm:$0xff]  }
  0x22   :  { %v3044_v33 = vld [vmem:[%s3595_s1 + $0x354] ss:$8 sps:$4 sm:$0xff]   ;;  %v3116_v51 = vld [vmem:[%s3595_s1 + $0x384] ss:$8 sps:$4 sm:$0xff]  }
  0x23   :  { %1269 = vmatpush1.bf16.msra.mxu1 %v2442_v34  ;;  %v2552_v34 = vld [vmem:[%s3596_s0 + $0xec] ss:$36 sps:$4 sm:$0xff]  }
  0x24   :  { %1471 = vmatpush1.bf16.msra.mxu0 %v2443_v35  ;;  %1270 = vmatprep.subr.bf16.mxu1 %v2444_v36  ;;  %v2554_v35 = vld [vmem:[%s3596_s0 + $0xdc] ss:$36 sps:$4 sm:$0xff]   ;;  %v2528_v36 = vld [vmem:[%s3595_s1 + $0x150] ss:$8 sps:$4 sm:$0xff]  }
  0x25   :  { %1472 = vmatprep.subr.bf16.mxu0 %v2446_v37  ;;  %v3058_v37 = vld [vmem:[%s3595_s1 + $0x350] ss:$8 sps:$4 sm:$0xff]  }
  0x27   :  { %1271 = vmatpush1.bf16.msra.mxu1 %v2448_v38  ;;  %v2542_v38 = vld [vmem:[%s3595_s1 + $0x164] ss:$8 sps:$4 sm:$0xff]  }
  0x28   :  { %1473 = vmatpush1.bf16.msra.mxu0 %v2449_v39  ;;  %1272 = vmatprep.subr.bf16.mxu1 %v2450_v40  ;;  %v3068_v39 = vld [vmem:[%s3595_s1 + $0x364] ss:$8 sps:$4 sm:$0xff]   ;;  %v2540_v40 = vld [vmem:[%s3595_s1 + $0x160] ss:$8 sps:$4 sm:$0xff]  }
  0x29   :  { %1474 = vmatprep.subr.bf16.mxu0 %v2452_v41  ;;  %v3076_v41 = vld [vmem:[%s3595_s1 + $0x360] ss:$8 sps:$4 sm:$0xff]  }
  0x2b   :  { %1273 = vmatpush1.bf16.msra.mxu1 %v2454_v42  ;;  %v2556_v42 = vld [vmem:[%s3596_s0 + $0xe8] ss:$36 sps:$4 sm:$0xff]  }
  0x2c   :  { %1475 = vmatpush1.bf16.msra.mxu0 %v2455_v43  ;;  %1274 = vmatprep.subr.bf16.mxu1 %v2456_v44  ;;  %v2557_v43 = vld [vmem:[%s3596_s0 + $0xd8] ss:$36 sps:$4 sm:$0xff]  }
  0x2d   :  { %1476 = vmatprep.subr.bf16.mxu0 %v2458_v45  ;;  %v2548_v44 = vld [vmem:[%s3595_s1 + $0x174] ss:$8 sps:$4 sm:$0xff]  }
  0x2e   :  { %v3092_v45 = vld [vmem:[%s3595_s1 + $0x374] ss:$8 sps:$4 sm:$0xff]  }
  0x2f   :  { %1275 = vmatpush1.bf16.msra.mxu1 %v2460_v46  ;;  %v2570_v46 = vld [vmem:[%s3596_s0 + $0x134] ss:$36 sps:$4 sm:$0xff]  }
  0x30   :  { %1477 = vmatpush1.bf16.msra.mxu0 %v2461_v47  ;;  %1276 = vmatprep.subr.bf16.mxu1 %v2462_v49  ;;  %v2572_v47 = vld [vmem:[%s3596_s0 + $0x124] ss:$36 sps:$4 sm:$0xff]   ;;  %v3106_v49 = vld [vmem:[%s3595_s1 + $0x370] ss:$8 sps:$4 sm:$0xff]  }
  0x31   :  { %1478 = vmatprep.subr.bf16.mxu0 %v2464_v50  ;;  %v2560_v50 = vld [vmem:[%s3595_s1 + $0x184] ss:$8 sps:$4 sm:$0xff]  }
  0x33   :  { %1277 = vmatpush1.bf16.msra.mxu1 %v2466_v52  ;;  %v2558_v52 = vld [vmem:[%s3595_s1 + $0x180] ss:$8 sps:$4 sm:$0xff]  }
  0x34   :  { %1479 = vmatpush1.bf16.msra.mxu0 %v2467_v53  ;;  %1278 = vmatprep.subr.bf16.mxu1 %v2468_v54  ;;  %v2574_v53 = vld [vmem:[%s3596_s0 + $0x130] ss:$36 sps:$4 sm:$0xff]   ;;  %v2575_v54 = vld [vmem:[%s3596_s0 + $0x120] ss:$36 sps:$4 sm:$0xff]  }
  0x35   :  { %1480 = vmatprep.subr.bf16.mxu0 %v2470_v55  ;;  %v3131_v55 = vld [vmem:[%s3595_s1 + $0x380] ss:$8 sps:$4 sm:$0xff]  }
  0x37   :  { %1279 = vmatpush1.bf16.msra.mxu1 %v2472_v56  ;;  %v2566_v56 = vld [vmem:[%s3595_s1 + $0x194] ss:$8 sps:$4 sm:$0xff]  }
  0x38   :  { %1481 = vmatpush1.bf16.msra.mxu0 %v2473_v57  ;;  %1280 = vmatprep.subr.bf16.mxu1 %v2474_v58  ;;  %v3140_v57 = vld [vmem:[%s3595_s1 + $0x394] ss:$8 sps:$4 sm:$0xff]  }
  0x39   :  { %1482 = vmatprep.subr.bf16.mxu0 %v2476_v59  ;;  %v2588_v58 = vld [vmem:[%s3596_s0 + $0x17c] ss:$36 sps:$4 sm:$0xff]   ;;  %v2564_v59 = vld [vmem:[%s3595_s1 + $0x190] ss:$8 sps:$4 sm:$0xff]  }
  0x3b   :  { %1281 = vmatpush1.bf16.msra.mxu1 %v2478_v60  ;;  %v2590_v60 = vld [vmem:[%s3596_s0 + $0x16c] ss:$36 sps:$4 sm:$0xff]  }
  0x3c   :  { %1483 = vmatpush1.bf16.msra.mxu0 %v2479_v61  ;;  %1282 = vmatprep.subr.bf16.mxu1 %v2480_v62  ;;  %v3154_v61 = vld [vmem:[%s3595_s1 + $0x390] ss:$8 sps:$4 sm:$0xff]   ;;  %v2578_v62 = vld [vmem:[%s3595_s1 + $0x1a4] ss:$8 sps:$4 sm:$0xff]  }
  0x3d   :  { %1484 = vmatprep.subr.bf16.mxu0 %v2482_v63  ;;  %v3163_v63 = vld [vmem:[%s3595_s1 + $0x3a4] ss:$8 sps:$4 sm:$0xff]  }
  0x3f   :  { %1283 = vmatpush1.bf16.msra.mxu1 %v2484_v0  ;;  %v2592_v0 = vld [vmem:[%s3596_s0 + $0x178] ss:$36 sps:$4 sm:$0xff]  }
  0x40   :  { %1485 = vmatpush1.bf16.msra.mxu0 %v2485_v1  ;;  %1353 = vmatprep.subr.bf16.mxu1 %v2491_v2  ;;  %v2593_v1 = vld [vmem:[%s3596_s0 + $0x168] ss:$36 sps:$4 sm:$0xff]   ;;  %v77_v2 = vld [vmem:[%s3596_s0 + $0x1c0] sm:$0xff] }
  0x41   :  { %1555 = vmatprep.subr.bf16.mxu0 %v2925_v3 }
  0x42   :  { %1285 = vmatmul.mubr.bf16.vlgmr.msra.gmra.mrb[0].mxu1 %v2486_v4  ;;  %v75_v4 = vld [vmem:[%s3596_s0 + $0x1b0] sm:$0xff] }
  0x43   :  { %1487 = vmatmul.mubr.bf16.vlgmr.msra.gmra.mrb[0].mxu0 %v2492_v6  ;;  %1354 = vmatpush1.bf16.msra.mxu1 %v2489_v5  ;;  %v2576_v5 = vld [vmem:[%s3595_s1 + $0x1a0] ss:$8 sps:$4 sm:$0xff]  }
  0x44   :  { %1556 = vmatpush1.bf16.msra.mxu0 %v2939_v7  ;;  %1355 = vmatprep.subr.bf16.mxu1 %v2500_v8  ;;  %v3185_v6 = vld [vmem:[%s3595_s1 + $0x3a0] ss:$8 sps:$4 sm:$0xff]   ;;  %v2584_v8 = vld [vmem:[%s3595_s1 + $0x1b4] ss:$8 sps:$4 sm:$0xff]  }
  0x45   :  { %1557 = vmatprep.subr.bf16.mxu0 %v2948_v9  ;;  %1496 = vmatprep.mubr.bf16.mxu0 %v2516_v10  ;;  %v3194_v10 = vld [vmem:[%s3595_s1 + $0x3b4] ss:$8 sps:$4 sm:$0xff]  }
  0x46   :  { %1294 = vmatprep.mubr.bf16.mxu1 %v2518_v11  ;;  %v2075_v11 = vcombine.high %v77_v2, %v77_v2 }
  0x47   :  { %1356 = vmatpush1.bf16.msra.mxu1 %v2498_v12  ;;  %v2071_v12 = vcombine.high %v75_v4, %v75_v4 }
  0x48   :  { %1558 = vmatpush1.bf16.msra.mxu0 %v2962_v13  ;;  %1357 = vmatprep.subr.bf16.mxu1 %v2506_v14  ;;  %v2582_v14 = vld [vmem:[%s3595_s1 + $0x1b0] ss:$8 sps:$4 sm:$0xff]  }
  0x49   :  { %1559 = vmatprep.subr.bf16.mxu0 %v2972_v15 }
  0x4a   :  { %1295 = vmatmul.mubr.bf16.gmra.mrb[4].mxu1 %v2521_v19  ;;  %v3212_v19 = vld [vmem:[%s3595_s1 + $0x3c4] ss:$8 sps:$4 sm:$0xff]  }
  0x4b   :  { %1497 = vmatmul.mubr.bf16.gmra.mrb[4].mxu0 %v2520_v18  ;;  %1358 = vmatpush1.bf16.msra.mxu1 %v2504_v16  ;;  %v3203_v16 = vld [vmem:[%s3595_s1 + $0x3b0] ss:$8 sps:$4 sm:$0xff]   ;;  %v2596_v18 = vld [vmem:[%s3595_s1 + $0x1c4] ss:$8 sps:$4 sm:$0xff]  }
  0x4c   :  { %1560 = vmatpush1.bf16.msra.mxu0 %v2980_v17  ;;  %1359 = vmatprep.subr.bf16.mxu1 %v2512_v20  ;;  %v2594_v20 = vld [vmem:[%s3595_s1 + $0x1c0] ss:$8 sps:$4 sm:$0xff]  }
  0x4d   :  { %1561 = vmatprep.subr.bf16.mxu0 %v2996_v21  ;;  %1506 = vmatprep.mubr.bf16.mxu0 %v2534_v22  ;;  %v2074_v22 = vcombine.low %v77_v2, %v77_v2  ;;  %v2657_v2 = vld [vmem:[%s3595_s1 + $0x454] ss:$8 sps:$4 sm:$0xff]  }
  0x4e   :  { %1304 = vmatprep.mubr.bf16.mxu1 %v2536_v23  ;;  %v2070_v23 = vcombine.low %v75_v4, %v75_v4  ;;  %v2658_v4 = vld [vmem:[%s3596_s0 + $0xe4] ss:$36 sps:$4 sm:$0xff]  }
  0x4f   :  { %1360 = vmatpush1.bf16.msra.mxu1 %v2510_v24  ;;  %v3221_v24 = vld [vmem:[%s3595_s1 + $0x3c0] ss:$8 sps:$4 sm:$0xff]  }
  0x50   :  { %1562 = vmatpush1.bf16.msra.mxu0 %v3010_v25  ;;  %1361 = vmatprep.subr.bf16.mxu1 %v2524_v26  ;;  %v2602_v26 = vld [vmem:[%s3595_s1 + $0x1d4] ss:$8 sps:$4 sm:$0xff]  }
  0x51   :  { %1563 = vmatprep.subr.bf16.mxu0 %v3020_v27 }
  0x52   :  { %1305 = vmatmul.mubr.bf16.gmra.mrb[8].mxu1 %v2539_v31  ;;  %v2627_v31 = vld [vmem:[%s3596_s0 + $0x1c] ss:$36 sps:$4 sm:$0xff]  }
  0x53   :  { %1507 = vmatmul.mubr.bf16.gmra.mrb[8].mxu0 %v2538_v30  ;;  %1362 = vmatpush1.bf16.msra.mxu1 %v2522_v28  ;;  %v3230_v28 = vld [vmem:[%s3595_s1 + $0x3d4] ss:$8 sps:$4 sm:$0xff]   ;;  %v2624_v30 = vld [vmem:[%s3596_s0 + $0xc] ss:$36 sps:$4 sm:$0xff]  }
  0x54   :  { %1564 = vmatpush1.bf16.msra.mxu0 %v3028_v29  ;;  %1363 = vmatprep.subr.bf16.mxu1 %v2530_v32  ;;  %v2600_v32 = vld [vmem:[%s3595_s1 + $0x1d0] ss:$8 sps:$4 sm:$0xff]  }
  0x55   :  { %1565 = vmatprep.subr.bf16.mxu0 %v3044_v33  ;;  %1516 = vmatprep.mubr.bf16.mxu0 %v2552_v34  ;;  %v3245_v34 = vld [vmem:[%s3595_s1 + $0x3d0] ss:$8 sps:$4 sm:$0xff]  }
  0x56   :  { %1314 = vmatprep.mubr.bf16.mxu1 %v2554_v35  ;;  %v2612_v35 = vld [vmem:[%s3595_s1 + $0x1e4] ss:$8 sps:$4 sm:$0xff]  }
  0x57   :  { %1364 = vmatpush1.bf16.msra.mxu1 %v2528_v36  ;;  %v3254_v36 = vld [vmem:[%s3595_s1 + $0x3e4] ss:$8 sps:$4 sm:$0xff]  }
  0x58   :  { %1566 = vmatpush1.bf16.msra.mxu0 %v3058_v37  ;;  %1365 = vmatprep.subr.bf16.mxu1 %v2542_v38  ;;  %v2610_v38 = vld [vmem:[%s3595_s1 + $0x1e0] ss:$8 sps:$4 sm:$0xff]  }
  0x59   :  { %1567 = vmatprep.subr.bf16.mxu0 %v3068_v39 }
  0x5a   :  { %1315 = vmatmul.mubr.bf16.gmra.mrb[12].mxu1 %v2557_v43  ;;  %v3272_v43 = vld [vmem:[%s3595_s1 + $0x3f4] ss:$8 sps:$4 sm:$0xff]  }
  0x5b   :  { %1517 = vmatmul.mubr.bf16.gmra.mrb[12].mxu0 %v2556_v42  ;;  %1366 = vmatpush1.bf16.msra.mxu1 %v2540_v40  ;;  %v3263_v40 = vld [vmem:[%s3595_s1 + $0x3e0] ss:$8 sps:$4 sm:$0xff]   ;;  %v2618_v42 = vld [vmem:[%s3595_s1 + $0x1f4] ss:$8 sps:$4 sm:$0xff]  }
  0x5c   :  { %1568 = vmatpush1.bf16.msra.mxu0 %v3076_v41  ;;  %1367 = vmatprep.subr.bf16.mxu1 %v2548_v44  ;;  %v2616_v44 = vld [vmem:[%s3595_s1 + $0x1f0] ss:$8 sps:$4 sm:$0xff]  }
  0x5d   :  { %1569 = vmatprep.subr.bf16.mxu0 %v3092_v45  ;;  %1526 = vmatprep.mubr.bf16.mxu0 %v2570_v46  ;;  %v3281_v46 = vld [vmem:[%s3595_s1 + $0x3f0] ss:$8 sps:$4 sm:$0xff]  }
  0x5e   :  { %1324 = vmatprep.mubr.bf16.mxu1 %v2572_v47  ;;  %v2630_v47 = vld [vmem:[%s3595_s1 + $0x404] ss:$8 sps:$4 sm:$0xff]  }
  0x5f   :  { %1368 = vmatpush1.bf16.msra.mxu1 %v2546_v48  ;;  %v2622_v48 = vld [vmem:[%s3596_s0 + $0x8] ss:$36 sps:$4 sm:$0xff]  }
  0x60   :  { %1570 = vmatpush1.bf16.msra.mxu0 %v3106_v49  ;;  %1369 = vmatprep.subr.bf16.mxu1 %v2560_v50  ;;  %v2625_v50 = vld [vmem:[%s3596_s0 + $0x18] ss:$36 sps:$4 sm:$0xff]  }
  0x61   :  { %1571 = vmatprep.subr.bf16.mxu0 %v3116_v51 }
  0x62   :  { %1325 = vmatmul.mubr.bf16.gmra.mrb[16].mxu1 %v2575_v54  ;;  %v2634_v54 = vld [vmem:[%s3596_s0 + $0x54] ss:$36 sps:$4 sm:$0xff]  }
  0x63   :  { %1527 = vmatmul.mubr.bf16.gmra.mrb[16].mxu0 %v2574_v53  ;;  %1370 = vmatpush1.bf16.msra.mxu1 %v2558_v52  ;;  %v2628_v52 = vld [vmem:[%s3595_s1 + $0x400] ss:$8 sps:$4 sm:$0xff]   ;;  %v2633_v53 = vld [vmem:[%s3595_s1 + $0x414] ss:$8 sps:$4 sm:$0xff]  }
  0x64   :  { %1572 = vmatpush1.bf16.msra.mxu0 %v3131_v55  ;;  %1371 = vmatprep.subr.bf16.mxu1 %v2566_v56  ;;  %v2636_v56 = vld [vmem:[%s3596_s0 + $0x64] ss:$36 sps:$4 sm:$0xff]  }
  0x65   :  { %1573 = vmatprep.subr.bf16.mxu0 %v3140_v57  ;;  %1536 = vmatprep.mubr.bf16.mxu0 %v2588_v58  ;;  %v2631_v58 = vld [vmem:[%s3595_s1 + $0x410] ss:$8 sps:$4 sm:$0xff]  }
  0x66   :  { %1334 = vmatprep.mubr.bf16.mxu1 %v2590_v60  ;;  %v2645_v60 = vld [vmem:[%s3595_s1 + $0x434] ss:$8 sps:$4 sm:$0xff]  }
  0x67   :  { %1372 = vmatpush1.bf16.msra.mxu1 %v2564_v59  ;;  %v2638_v59 = vld [vmem:[%s3596_s0 + $0x50] ss:$36 sps:$4 sm:$0xff]  }
  0x68   :  { %1574 = vmatpush1.bf16.msra.mxu0 %v3154_v61  ;;  %1373 = vmatprep.subr.bf16.mxu1 %v2578_v62  ;;  %v2646_v62 = vld [vmem:[%s3596_s0 + $0x9c] ss:$36 sps:$4 sm:$0xff]  }
  0x69   :  { %1575 = vmatprep.subr.bf16.mxu0 %v3163_v63 }
  0x6a   :  { %1335 = vmatmul.mubr.bf16.gmra.mrb[20].mxu1 %v2593_v1  ;;  %v2650_v1 = vld [vmem:[%s3596_s0 + $0x98] ss:$36 sps:$4 sm:$0xff]  }
  0x6b   :  { %1537 = vmatmul.mubr.bf16.gmra.mrb[20].mxu0 %v2592_v0  ;;  %1374 = vmatpush1.bf16.msra.mxu1 %v2576_v5  ;;  %v2654_v0 = vld [vmem:[%s3595_s1 + $0x444] ss:$8 sps:$4 sm:$0xff]  }
  0x6c   :  { %1576 = vmatpush1.bf16.msra.mxu0 %v3185_v6  ;;  %1375 = vmatprep.subr.bf16.mxu1 %v2584_v8  ;;  %v2666_v5 = vld [vmem:[%s3595_s1 + $0x464] ss:$8 sps:$4 sm:$0xff]  }
  0x6d   :  { %1577 = vmatprep.subr.bf16.mxu0 %v3194_v10  ;;  %1546 = vmatprep.mubr.bf16.mxu0 %v2075_v11  ;;  %v2662_v8 = vld [vmem:[%s3596_s0 + $0xe0] ss:$36 sps:$4 sm:$0xff]   ;;  %v2669_v11 = vld [vmem:[%s3595_s1 + $0x474] ss:$8 sps:$4 sm:$0xff]  }
  0x6e   :  { %1344 = vmatprep.mubr.bf16.mxu1 %v2071_v12  ;;  %v2670_v12 = vld [vmem:[%s3596_s0 + $0x12c] ss:$36 sps:$4 sm:$0xff]  }
  0x6f   :  { %1376 = vmatpush1.bf16.msra.mxu1 %v2582_v14  ;;  %v2672_v14 = vld [vmem:[%s3596_s0 + $0x128] ss:$36 sps:$4 sm:$0xff]  }
  0x70   :  { %1578 = vmatpush1.bf16.msra.mxu0 %v3203_v16  ;;  %1377 = vmatprep.subr.bf16.mxu1 %v2596_v18  ;;  %v2673_v18 = vld [vmem:[%s3596_s0 + $0x20] ss:$36 sps:$4 sm:$0xff]  }
  0x71   :  { %1579 = vmatprep.subr.bf16.mxu0 %v3212_v19 }
  0x72   :  { %1345 = vmatmul.mubr.bf16.gmra.mrb[24].mxu1 %v2070_v23  ;;  %v2689_v23 = vld [vmem:[%s3596_s0 + $0x188] ss:$36 sps:$4 sm:$0xff]  }
  0x73   :  { %1547 = vmatmul.mubr.bf16.gmra.mrb[24].mxu0 %v2074_v22  ;;  %1378 = vmatpush1.bf16.msra.mxu1 %v2594_v20  ;;  %v2688_v22 = vld [vmem:[%s3596_s0 + $0x180] ss:$36 sps:$4 sm:$0xff]  }
  0x74   :  { %1580 = vmatpush1.bf16.msra.mxu0 %v3221_v24  ;;  %1379 = vmatprep.subr.bf16.mxu1 %v2602_v26 }
  0x75   :  { %1581 = vmatprep.subr.bf16.mxu0 %v3230_v28  ;;  %1385 = vmatprep.mubr.bf16.mxu1 %v2624_v30 }
  0x76   :  { %1587 = vmatprep.mubr.bf16.mxu0 %v2627_v31  ;;  %v1854_v31 = vlaneseq }
  0x77   :  { %1380 = vmatpush1.bf16.msra.mxu1 %v2600_v32 }
  0x78   :  { %1582 = vmatpush1.bf16.msra.mxu0 %v3245_v34  ;;  %1381 = vmatprep.subr.bf16.mxu1 %v2612_v35  ;;  %vm3459_vm0 = vcmp.lt.s32.totalorder %v1854_v31, 256 }
  0x79   :  { %1583 = vmatprep.subr.bf16.mxu0 %v3254_v36 }
  0x7b   :  { %1382 = vmatpush1.bf16.msra.mxu1 %v2610_v38  ;;  %v2694_v38 = vmov 0.0  }
  0x7c   :  { %1584 = vmatpush1.bf16.msra.mxu0 %v3263_v40  ;;  %1383 = vmatprep.subr.bf16.mxu1 %v2618_v42  ;;  %1858 = vst.msk [vmem:[%s3597_s3] sm:$0x3] %vm3459_vm0, %v2694_v38  ;;  %1859 = vst.msk [vmem:[%s3598_s4] sm:$0x3] %vm3459_vm0, %v2694_v38 }
  0x7d   :  { %1585 = vmatprep.subr.bf16.mxu0 %v3272_v43 }
  0x7f   :  { %1384 = vmatpush1.bf16.msra.mxu1 %v2616_v44 }
  0x80   :  { %1586 = vmatpush1.bf16.msra.mxu0 %v3281_v46  ;;  %2249 = vmatprep.subr.bf16.mxu1 %v2925_v3  ;;  %v2642_v3 = vld [vmem:[%s3595_s1 + $0x424] ss:$8 sps:$4 sm:$0xff]  }
  0x81   :  { %1656 = vmatprep.subr.bf16.mxu0 %v2630_v47 }
  0x82   :  { %1386 = vmatmul.mubr.bf16.vlgmr.msra.gmra.mrb[0].mxu1 %v2622_v48 }
  0x83   :  { %1588 = vmatmul.mubr.bf16.vlgmr.msra.gmra.mrb[0].mxu0 %v2625_v50  ;;  %2265 = vmatpush1.bf16.msra.mxu1 %v2939_v7  ;;  %v2639_v7 = vld [vmem:[%s3596_s0 + $0x60] ss:$36 sps:$4 sm:$0xff]  }
  0x84   :  { %1657 = vmatpush1.bf16.msra.mxu0 %v2628_v52  ;;  %2250 = vmatprep.subr.bf16.mxu1 %v2948_v9  ;;  %v2640_v9 = vld [vmem:[%s3595_s1 + $0x420] ss:$8 sps:$4 sm:$0xff]  }
  0x85   :  { %1658 = vmatprep.subr.bf16.mxu0 %v2633_v53  ;;  %1395 = vmatprep.mubr.bf16.mxu1 %v2634_v54 }
  0x86   :  { %1597 = vmatprep.mubr.bf16.mxu0 %v2636_v56 }
  0x87   :  { %2266 = vmatpush1.bf16.msra.mxu1 %v2962_v13  ;;  %v2648_v13 = vld [vmem:[%s3596_s0 + $0xac] ss:$36 sps:$4 sm:$0xff]  }
  0x88   :  { %1659 = vmatpush1.bf16.msra.mxu0 %v2631_v58  ;;  %2251 = vmatprep.subr.bf16.mxu1 %v2972_v15  ;;  %v2643_v15 = vld [vmem:[%s3595_s1 + $0x430] ss:$8 sps:$4 sm:$0xff]  }
  0x89   :  { %1660 = vmatprep.subr.bf16.mxu0 %v2642_v3 }
  0x8a   :  { %1396 = vmatmul.mubr.bf16.gmra.mrb[4].mxu1 %v2638_v59 }
  0x8b   :  { %1598 = vmatmul.mubr.bf16.gmra.mrb[4].mxu0 %v2639_v7  ;;  %2267 = vmatpush1.bf16.msra.mxu1 %v2980_v17  ;;  %v2651_v17 = vld [vmem:[%s3596_s0 + $0xa8] ss:$36 sps:$4 sm:$0xff]  }
  0x8c   :  { %1661 = vmatpush1.bf16.msra.mxu0 %v2640_v9  ;;  %2252 = vmatprep.subr.bf16.mxu1 %v2996_v21  ;;  %v2652_v21 = vld [vmem:[%s3595_s1 + $0x440] ss:$8 sps:$4 sm:$0xff]  }
  0x8d   :  { %1662 = vmatprep.subr.bf16.mxu0 %v2645_v60  ;;  %1405 = vmatprep.mubr.bf16.mxu1 %v2646_v62 }
  0x8e   :  { %1607 = vmatprep.mubr.bf16.mxu0 %v2648_v13 }
  0x8f   :  { %2268 = vmatpush1.bf16.msra.mxu1 %v3010_v25  ;;  %v2660_v25 = vld [vmem:[%s3596_s0 + $0xf4] ss:$36 sps:$4 sm:$0xff]  }
  0x90   :  { %1663 = vmatpush1.bf16.msra.mxu0 %v2643_v15  ;;  %2253 = vmatprep.subr.bf16.mxu1 %v3020_v27  ;;  %v2655_v27 = vld [vmem:[%s3595_s1 + $0x450] ss:$8 sps:$4 sm:$0xff]  }
  0x91   :  { %1664 = vmatprep.subr.bf16.mxu0 %v2654_v0 }
  0x92   :  { %1406 = vmatmul.mubr.bf16.gmra.mrb[8].mxu1 %v2650_v1 }
  0x93   :  { %1608 = vmatmul.mubr.bf16.gmra.mrb[8].mxu0 %v2651_v17  ;;  %2269 = vmatpush1.bf16.msra.mxu1 %v3028_v29  ;;  %v2663_v29 = vld [vmem:[%s3596_s0 + $0xf0] ss:$36 sps:$4 sm:$0xff]  }
  0x94   :  { %1665 = vmatpush1.bf16.msra.mxu0 %v2652_v21  ;;  %2254 = vmatprep.subr.bf16.mxu1 %v3044_v33  ;;  %v2664_v33 = vld [vmem:[%s3595_s1 + $0x460] ss:$8 sps:$4 sm:$0xff]  }
  0x95   :  { %1666 = vmatprep.subr.bf16.mxu0 %v2657_v2  ;;  %1415 = vmatprep.mubr.bf16.mxu1 %v2658_v4 }
  0x96   :  { %1617 = vmatprep.mubr.bf16.mxu0 %v2660_v25 }
  0x97   :  { %2270 = vmatpush1.bf16.msra.mxu1 %v3058_v37  ;;  %v2667_v37 = vld [vmem:[%s3595_s1 + $0x470] ss:$8 sps:$4 sm:$0xff]  }
  0x98   :  { %1667 = vmatpush1.bf16.msra.mxu0 %v2655_v27  ;;  %2255 = vmatprep.subr.bf16.mxu1 %v3068_v39  ;;  %v2693_v39 = vmov 0  }
  0x99   :  { %1668 = vmatprep.subr.bf16.mxu0 %v2666_v5 }
  0x9a   :  { %1416 = vmatmul.mubr.bf16.gmra.mrb[12].mxu1 %v2662_v8 }
  0x9b   :  { %1618 = vmatmul.mubr.bf16.gmra.mrb[12].mxu0 %v2663_v29  ;;  %2271 = vmatpush1.bf16.msra.mxu1 %v3076_v41  ;;  %v2674_v41 = vld [vmem:[%s3596_s0 + $0x174] ss:$36 sps:$4 sm:$0xff]  }
  0x9c   :  { %1669 = vmatpush1.bf16.msra.mxu0 %v2664_v33  ;;  %2256 = vmatprep.subr.bf16.mxu1 %v3092_v45  ;;  %v76_v45 = vld [vmem:[%s3596_s0 + $0x1b8] sm:$0xff] }
  0x9d   :  { %1670 = vmatprep.subr.bf16.mxu0 %v2669_v11  ;;  %1425 = vmatprep.mubr.bf16.mxu1 %v2670_v12  ;;  %v2073_v20 = vcombine.high %v76_v45, %v76_v45 }
  0x9e   :  { %1688 = vmatprep.mubr.bf16.mxu0 %v2693_v39 }
  0x9f   :  { %2272 = vmatpush1.bf16.msra.mxu1 %v3106_v49  ;;  %v2676_v49 = vld [vmem:[%s3596_s0 + $0x170] ss:$36 sps:$4 sm:$0xff]  }
  0xa0   :  { %1671 = vmatpush1.bf16.msra.mxu0 %v2667_v37  ;;  %2257 = vmatprep.subr.bf16.mxu1 %v3116_v51  ;;  %v2677_v51 = vld [vmem:[%s3596_s0 + $0x68] ss:$36 sps:$4 sm:$0xff]  }
  0xa2   :  { %1426 = vmatmul.mubr.bf16.gmra.mrb[16].mxu1 %v2672_v14 }
  0xa3   :  { %1689 = vmatmul.mubr.bf16.vlgmr.msra.gmra.mrb[0].mxu0 %v2673_v18  ;;  %2273 = vmatpush1.bf16.msra.mxu1 %v3131_v55  ;;  %v2072_v55 = vcombine.low %v76_v45, %v76_v45 }
  0xa4   :  { %1435 = vmatprep.mubr.bf16.mxu1 %v2674_v41  ;;  %2258 = vmatprep.subr.bf16.mxu1 %v3140_v57  ;;  %v2680_v57 = vld [vmem:[%s3596_s0 + $0xb0] ss:$36 sps:$4 sm:$0xff]  }
  0xa5   :  { %1698 = vmatprep.mubr.bf16.mxu0 %v2693_v39 }
  0xa7   :  { %2274 = vmatpush1.bf16.msra.mxu1 %v3154_v61  ;;  %v2684_v61 = vld [vmem:[%s3596_s0 + $0x13c] ss:$36 sps:$4 sm:$0xff]  }
  0xa8   :  { %2259 = vmatprep.subr.bf16.mxu1 %v3163_v63  ;;  %v2681_v63 = vld [vmem:[%s3596_s0 + $0xf8] ss:$36 sps:$4 sm:$0xff]  }
  0xaa   :  { %1436 = vmatmul.mubr.bf16.gmra.mrb[20].mxu1 %v2676_v49 }
  0xab   :  { %1699 = vmatmul.mubr.bf16.gmra.mrb[4].mxu0 %v2677_v51  ;;  %2275 = vmatpush1.bf16.msra.mxu1 %v3185_v6  ;;  %v2682_v6 = vld [vmem:[%s3596_s0 + $0x138] ss:$36 sps:$4 sm:$0xff]  }
  0xac   :  { %1445 = vmatprep.mubr.bf16.mxu1 %v2073_v20  ;;  %2260 = vmatprep.subr.bf16.mxu1 %v3194_v10  ;;  %v2685_v10 = vld [vmem:[%s3596_s0 + $0x140] ss:$36 sps:$4 sm:$0xff]  }
  0xad   :  { %1708 = vmatprep.mubr.bf16.mxu0 %v2693_v39 }
  0xaf   :  { %2276 = vmatpush1.bf16.msra.mxu1 %v3203_v16  ;;  %v2686_v16 = vld [vmem:[%s3596_s0 + $0x184] ss:$36 sps:$4 sm:$0xff]  }
  0xb0   :  { %2261 = vmatprep.subr.bf16.mxu1 %v3212_v19  ;;  %v78_v19 = vld [vmem:[%s3596_s0 + $0x1c8] sm:$0xff] }
  0xb1   :  { %v2076_v26 = vcombine.low %v78_v19, %v78_v19 }
  0xb2   :  { %1446 = vmatmul.mubr.bf16.gmra.mrb[24].mxu1 %v2072_v55 }
  0xb3   :  { %1709 = vmatmul.mubr.bf16.gmra.mrb[8].mxu0 %v2680_v57  ;;  %2277 = vmatpush1.bf16.msra.mxu1 %v3221_v24  ;;  %v2077_v24 = vcombine.high %v78_v19, %v78_v19 }
  0xb4   :  { %1718 = vmatprep.mubr.bf16.mxu0 %v2693_v39  ;;  %2262 = vmatprep.subr.bf16.mxu1 %v3230_v28  ;;  %v2692_v28 = vld [vmem:[%s3596_s0 + $0x1d0] ss:$0 sps:$4 sm:$0xff]  }
  0xb5   :  { %1627 = vmatprep.mubr.bf16.mxu1 %v2684_v61 }
  0xb7   :  { %2278 = vmatpush1.bf16.msra.mxu1 %v3245_v34 }
  0xb8   :  { %2263 = vmatprep.subr.bf16.mxu1 %v3254_v36 }
  0xbb   :  { %1719 = vmatmul.mubr.bf16.gmra.mrb[12].mxu0 %v2681_v63  ;;  %2279 = vmatpush1.bf16.msra.mxu1 %v3263_v40 }
  0xbc   :  { %1728 = vmatprep.mubr.bf16.mxu0 %v2693_v39  ;;  %2264 = vmatprep.subr.bf16.mxu1 %v3272_v43 }
  0xbf   :  { %2280 = vmatpush1.bf16.msra.mxu1 %v3281_v46 }
  0xc2   :  { %1628 = vmatmul.mubr.bf16.vlgmr.msra.gmra.mrb[28].mxu1 %v2682_v6 }
  0xc3   :  { %1729 = vmatmul.mubr.bf16.gmra.mrb[28].mxu0 %v2685_v10  ;;  %1637 = vmatprep.mubr.bf16.mxu1 %v2686_v16 }
  0xc4   :  { %1738 = vmatprep.mubr.bf16.mxu0 %v2693_v39 }
  0xca   :  { %1638 = vmatmul.mubr.bf16.gmra.mrb[32].mxu1 %v2688_v22 }
  0xcb   :  { %1739 = vmatmul.mubr.bf16.gmra.mrb[32].mxu0 %v2689_v23  ;;  %1647 = vmatprep.mubr.bf16.mxu1 %v2077_v24 }
  0xcc   :  { %1748 = vmatprep.mubr.bf16.mxu0 %v2693_v39 }
  0xd2   :  { %1648 = vmatmul.mubr.bf16.gmra.mrb[36].mxu1 %v2076_v26 }
  0xd3   :  { %1749 = vmatmul.mubr.bf16.gmra.mrb[36].mxu0 %v2692_v28 }
 0x136   :  { %v1528_v30 = vpop.f32.mrb[16].mxu0 }
 0x137   :  { %v1530_v32 = vpop.f32.mrb[17].mxu0 }
 0x138   :  { %v1532_v34 = vpop.f32.mrb[18].mxu0 }
 0x139   :  { %v1534_v36 = vpop.f32.mrb[19].mxu0 }
 0x13e   :  { %v1538_v40 = vpop.f32.mrb[20].mxu0 }
 0x13f   :  { %v1540_v42 = vpop.f32.mrb[21].mxu0 }
 0x140   :  { %v3473_v43 = vpop.f32.mrb[22].mxu0 }
 0x141   :  { %v3475_v44 = vpop.f32.mrb[23].mxu0 }
 0x146   :  { %v3477_v46 = vpop.f32.mrb[24].mxu0 }
 0x147   :  { %v3479_v47 = vpop.f32.mrb[25].mxu0 }
 0x148   :  { %v1552_v48 = vpop.f32.mrb[26].mxu0 }
 0x149   :  { %v1553_v50 = vpop.f32.mrb[27].mxu0 }
 0x155   :  { %v1387_v52 = vpop.f32.mrb[0].mxu1 }
 0x156   :  { %v1389_v53 = vpop.f32.mrb[1].mxu1 }
 0x157   :  { %v1391_v54 = vpop.f32.mrb[2].mxu1 }
 0x158   :  { %v1393_v56 = vpop.f32.mrb[3].mxu1 }
 0x15d   :  { %v1397_v58 = vpop.f32.mrb[4].mxu1 }
 0x15e   :  { %v1399_v3 = vpop.f32.mrb[5].mxu1 }
 0x15f   :  { %v1401_v59 = vpop.f32.mrb[6].mxu1 }
 0x160   :  { %v1403_v7 = vpop.f32.mrb[7].mxu1 }
 0x165   :  { %v3481_v9 = vpop.f32.mrb[8].mxu1 }
 0x166   :  { %v3483_v60 = vpop.f32.mrb[9].mxu1 }
 0x167   :  { %v3485_v62 = vpop.f32.mrb[10].mxu1 }
 0x168   :  { %v3487_v13 = vpop.f32.mrb[11].mxu1 }
 0x16d   :  { %v3489_v15 = vpop.f32.mrb[12].mxu1 }
 0x16e   :  { %v3491_v0 = vpop.f32.mrb[13].mxu1 }
 0x16f   :  { %v3493_v1 = vpop.f32.mrb[14].mxu1 }
 0x170   :  { %v3495_v17 = vpop.f32.mrb[15].mxu1 }
 0x175   :  { %v1427_v21 = vpop.f32.mrb[16].mxu1 }
 0x176   :  { %v1690_v2 = vpop.f32.mrb[0].mxu0  ;;  %v3497_v4 = vadd.f32 %v1528_v30, %v1427_v21  ;;  %v1429_v27 = vpop.f32.mrb[17].mxu1 }
 0x177   :  { %v2281_v25 = vadd.f32 %v1690_v2, %v1387_v52  ;;  %v1692_v5 = vpop.f32.mrb[1].mxu0  ;;  %v3499_v8 = vadd.f32 %v1530_v32, %v1429_v27  ;;  %v1431_v33 = vpop.f32.mrb[18].mxu1 }
 0x178   :  { %v2282_v29 = vadd.f32 %v1692_v5, %v1389_v53  ;;  %v1694_v11 = vpop.f32.mrb[2].mxu0  ;;  %v3501_v12 = vadd.f32 %v1532_v34, %v1431_v33  ;;  %v1433_v39 = vpop.f32.mrb[19].mxu1 }
 0x179   :  { %v2283_v37 = vadd.f32 %v1694_v11, %v1391_v54  ;;  %v1696_v14 = vpop.f32.mrb[3].mxu0  ;;  %v3503_v41 = vadd.f32 %v1534_v36, %v1433_v39  ;;  %v1922_v49 = vmul.f32 %v2281_v25, %v2281_v25 }
 0x17a   :  { %v2236_v18 = vpack.c.bf16 %v2282_v29, %v2281_v25  ;;  %v2284_v45 = vadd.f32 %v1696_v14, %v1393_v56  ;;  %v1923_v55 = vmul.f32 %v2282_v29, %v2282_v29 }
 0x17b   :  { %v1861_v51 = vadd.f32 %v2283_v37, %v2281_v25  ;;  %v1924_v20 = vmul.f32 %v2283_v37, %v2283_v37 }
 0x17c   :  { %1837 = vst [vmem:[%s3599_s2] sm:$0xff] %v2236_v18  ;;  %v2237_v57 = vpack.c.bf16 %v2284_v45, %v2283_v37  ;;  %v1879_v61 = vadd.f32 %v2284_v45, %v2282_v29  ;;  %v1925_v63 = vmul.f32 %v2284_v45, %v2284_v45 }
 0x17d   :  { %v1948_v6 = vadd.f32 %v1924_v20, %v1922_v49  ;;  %v1437_v16 = vpop.f32.mrb[20].mxu1 }
 0x17e   :  { %1838 = vst [vmem:[%s3599_s2 + $0x8] sm:$0xff] %v2237_v57  ;;  %v1966_v10 = vadd.f32 %v1925_v63, %v1923_v55  ;;  %v1700_v19 = vpop.f32.mrb[4].mxu0  ;;  %v3511_v22 = vadd.f32 %v1538_v40, %v1437_v16  ;;  %v1439_v24 = vpop.f32.mrb[21].mxu1 }
 0x17f   :  { %v2285_v23 = vadd.f32 %v1700_v19, %v1397_v58  ;;  %v1702_v26 = vpop.f32.mrb[5].mxu0  ;;  %v3513_v28 = vadd.f32 %v1540_v42, %v1439_v24  ;;  %v1441_v32 = vpop.f32.mrb[22].mxu1 }
 0x180   :  { %v2286_v30 = vadd.f32 %v1702_v26, %v1399_v3  ;;  %v1704_v34 = vpop.f32.mrb[6].mxu0  ;;  %v3516_v48 = vadd.f32 %v3473_v43, %v1441_v32  ;;  %v1443_v52 = vpop.f32.mrb[23].mxu1 }
 0x181   :  { %v1862_v36 = vadd.f32 %v2285_v23, %v1861_v51  ;;  %v1926_v38 = vmul.f32 %v2285_v23, %v2285_v23  ;;  %v2287_v50 = vadd.f32 %v1704_v34, %v1401_v59  ;;  %v1706_v53 = vpop.f32.mrb[7].mxu0  ;;  %v3519_v58 = vadd.f32 %v3475_v44, %v1443_v52 }
 0x182   :  { %v2238_v54 = vpack.c.bf16 %v2286_v30, %v2285_v23  ;;  %v1880_v56 = vadd.f32 %v2286_v30, %v1879_v61  ;;  %v1927_v40 = vmul.f32 %v2286_v30, %v2286_v30  ;;  %v2288_v3 = vadd.f32 %v1706_v53, %v1403_v7 }
 0x183   :  { %v1949_v21 = vadd.f32 %v1948_v6, %v1926_v38  ;;  %v1863_v42 = vadd.f32 %v2287_v50, %v1862_v36  ;;  %v1928_v2 = vmul.f32 %v2287_v50, %v2287_v50 }
 0x184   :  { %1839 = vst [vmem:[%s3599_s2 + $0x10] sm:$0xff] %v2238_v54  ;;  %v1967_v25 = vadd.f32 %v1966_v10, %v1927_v40  ;;  %v2239_v27 = vpack.c.bf16 %v2288_v3, %v2287_v50  ;;  %v1881_v59 = vadd.f32 %v2288_v3, %v1880_v56  ;;  %v1929_v5 = vmul.f32 %v2288_v3, %v2288_v3 }
 0x185   :  { %v1950_v43 = vadd.f32 %v1949_v21, %v1928_v2  ;;  %v1447_v29 = vpop.f32.mrb[24].mxu1 }
 0x186   :  { %v1710_v33 = vpop.f32.mrb[8].mxu0  ;;  %1840 = vst [vmem:[%s3599_s2 + $0x18] sm:$0xff] %v2239_v27  ;;  %v1968_v44 = vadd.f32 %v1967_v25, %v1929_v5  ;;  %v3528_v11 = vadd.f32 %v3477_v46, %v1447_v29  ;;  %v1449_v37 = vpop.f32.mrb[25].mxu1 }
 0x187   :  { %v2289_v7 = vadd.f32 %v1710_v33, %v3481_v9  ;;  %v1712_v39 = vpop.f32.mrb[9].mxu0  ;;  %v3532_v14 = vadd.f32 %v3479_v47, %v1449_v37  ;;  %v1451_v45 = vpop.f32.mrb[26].mxu1 }
 0x188   :  { %v2290_v18 = vadd.f32 %v1712_v39, %v3483_v60  ;;  %v1714_v49 = vpop.f32.mrb[10].mxu0  ;;  %v1452_v57 = vpop.f32.mrb[27].mxu1 }
 0x189   :  { %v1864_v51 = vadd.f32 %v2289_v7, %v1863_v42  ;;  %v1930_v20 = vmul.f32 %v2289_v7, %v2289_v7  ;;  %v2291_v55 = vadd.f32 %v1714_v49, %v3485_v62  ;;  %v1716_v61 = vpop.f32.mrb[11].mxu0 }
 0x18a   :  { %v2240_v63 = vpack.c.bf16 %v2290_v18, %v2289_v7  ;;  %v1882_v46 = vadd.f32 %v2290_v18, %v1881_v59  ;;  %v1931_v6 = vmul.f32 %v2290_v18, %v2290_v18  ;;  %v2292_v9 = vadd.f32 %v1716_v61, %v3487_v13 }
 0x18b   :  { %v1951_v10 = vadd.f32 %v1950_v43, %v1930_v20  ;;  %v1865_v16 = vadd.f32 %v2291_v55, %v1864_v51  ;;  %v1932_v19 = vmul.f32 %v2291_v55, %v2291_v55 }
 0x18c   :  { %1841 = vst [vmem:[%s3599_s2 + $0x20] sm:$0xff] %v2240_v63  ;;  %v1969_v47 = vadd.f32 %v1968_v44, %v1931_v6  ;;  %v2241_v60 = vpack.c.bf16 %v2292_v9, %v2291_v55  ;;  %v1883_v23 = vadd.f32 %v2292_v9, %v1882_v46  ;;  %v1933_v24 = vmul.f32 %v2292_v9, %v2292_v9 }
 0x18d   :  { %v1952_v26 = vadd.f32 %v1951_v10, %v1932_v19 }
 0x18e   :  { %1842 = vst [vmem:[%s3599_s2 + $0x28] sm:$0xff] %v2241_v60  ;;  %v1970_v62 = vadd.f32 %v1969_v47, %v1933_v24  ;;  %v1720_v30 = vpop.f32.mrb[12].mxu0 }
 0x18f   :  { %v2293_v13 = vadd.f32 %v1720_v30, %v3489_v15  ;;  %v1722_v32 = vpop.f32.mrb[13].mxu0 }
 0x190   :  { %v2294_v34 = vadd.f32 %v1722_v32, %v3491_v0  ;;  %v1724_v36 = vpop.f32.mrb[14].mxu0 }
 0x191   :  { %v1866_v38 = vadd.f32 %v2293_v13, %v1865_v16  ;;  %v1934_v50 = vmul.f32 %v2293_v13, %v2293_v13  ;;  %v2295_v52 = vadd.f32 %v1724_v36, %v3493_v1  ;;  %v1726_v53 = vpop.f32.mrb[15].mxu0 }
 0x192   :  { %v2242_v54 = vpack.c.bf16 %v2294_v34, %v2293_v13  ;;  %v1884_v56 = vadd.f32 %v2294_v34, %v1883_v23  ;;  %v1935_v40 = vmul.f32 %v2294_v34, %v2294_v34  ;;  %v2296_v21 = vadd.f32 %v1726_v53, %v3495_v17 }
 0x193   :  { %v1953_v42 = vadd.f32 %v1952_v26, %v1934_v50  ;;  %v1867_v2 = vadd.f32 %v2295_v52, %v1866_v38  ;;  %v1936_v3 = vmul.f32 %v2295_v52, %v2295_v52 }
 0x194   :  { %1843 = vst [vmem:[%s3599_s2 + $0x30] sm:$0xff] %v2242_v54  ;;  %v1971_v15 = vadd.f32 %v1970_v62, %v1935_v40  ;;  %v2243_v0 = vpack.c.bf16 %v2296_v21, %v2295_v52  ;;  %v1885_v25 = vadd.f32 %v2296_v21, %v1884_v56  ;;  %v1937_v43 = vmul.f32 %v2296_v21, %v2296_v21 }
 0x195   :  { %v1954_v27 = vadd.f32 %v1953_v42, %v1936_v3  ;;  %v1629_v59 = vpop.f32.mrb[28].mxu1 }
 0x196   :  { %1844 = vst [vmem:[%s3599_s2 + $0x38] sm:$0xff] %v2243_v0  ;;  %v1972_v1 = vadd.f32 %v1971_v15, %v1937_v43  ;;  %v1730_v5 = vpop.f32.mrb[28].mxu0  ;;  %v2298_v17 = vadd.f32 %v3497_v4, %v1629_v59  ;;  %v1631_v29 = vpop.f32.mrb[29].mxu1 }
 0x197   :  { %v1732_v33 = vpop.f32.mrb[29].mxu0  ;;  %v2301_v44 = vadd.f32 %v3499_v8, %v1631_v29  ;;  %v1633_v7 = vpop.f32.mrb[30].mxu1 }
 0x198   :  { %v1734_v37 = vpop.f32.mrb[30].mxu0  ;;  %v2299_v39 = vadd.f32 %v2298_v17, %v1730_v5  ;;  %v2304_v18 = vadd.f32 %v3501_v12, %v1633_v7  ;;  %v1635_v45 = vpop.f32.mrb[31].mxu1 }
 0x199   :  { %v1736_v49 = vpop.f32.mrb[31].mxu0  ;;  %v2302_v51 = vadd.f32 %v2301_v44, %v1732_v33  ;;  %v2307_v20 = vadd.f32 %v3503_v41, %v1635_v45 }
 0x19a   :  { %v1868_v55 = vadd.f32 %v2299_v39, %v1867_v2  ;;  %v1938_v57 = vmul.f32 %v2299_v39, %v2299_v39  ;;  %v2305_v61 = vadd.f32 %v2304_v18, %v1734_v37 }
 0x19b   :  { %v2244_v63 = vpack.c.bf16 %v2302_v51, %v2299_v39  ;;  %v1886_v46 = vadd.f32 %v2302_v51, %v1885_v25  ;;  %v1939_v4 = vmul.f32 %v2302_v51, %v2302_v51  ;;  %v2308_v6 = vadd.f32 %v2307_v20, %v1736_v49 }
 0x19c   :  { %v1955_v9 = vadd.f32 %v1954_v27, %v1938_v57  ;;  %v1869_v10 = vadd.f32 %v2305_v61, %v1868_v55  ;;  %v1940_v8 = vmul.f32 %v2305_v61, %v2305_v61 }
 0x19d   :  { %1845 = vst [vmem:[%s3599_s2 + $0x40] sm:$0xff] %v2244_v63  ;;  %v1973_v12 = vadd.f32 %v1972_v1, %v1939_v4  ;;  %v2245_v16 = vpack.c.bf16 %v2308_v6, %v2305_v61  ;;  %v1887_v19 = vadd.f32 %v2308_v6, %v1886_v46  ;;  %v1941_v47 = vmul.f32 %v2308_v6, %v2308_v6  ;;  %v1639_v60 = vpop.f32.mrb[32].mxu1 }
 0x19e   :  { %v1740_v41 = vpop.f32.mrb[32].mxu0  ;;  %v1956_v23 = vadd.f32 %v1955_v9, %v1940_v8  ;;  %v2310_v24 = vadd.f32 %v3511_v22, %v1639_v60  ;;  %v1641_v26 = vpop.f32.mrb[33].mxu1 }
 0x19f   :  { %v1742_v62 = vpop.f32.mrb[33].mxu0  ;;  %1846 = vst [vmem:[%s3599_s2 + $0x48] sm:$0xff] %v2245_v16  ;;  %v1974_v30 = vadd.f32 %v1973_v12, %v1941_v47  ;;  %v2313_v13 = vadd.f32 %v3513_v28, %v1641_v26  ;;  %v1643_v32 = vpop.f32.mrb[34].mxu1 }
 0x1a0   :  { %v1744_v34 = vpop.f32.mrb[34].mxu0  ;;  %v2311_v36 = vadd.f32 %v2310_v24, %v1740_v41  ;;  %v2316_v38 = vadd.f32 %v3516_v48, %v1643_v32  ;;  %v1645_v50 = vpop.f32.mrb[35].mxu1 }
 0x1a1   :  { %v1746_v52 = vpop.f32.mrb[35].mxu0  ;;  %v2314_v53 = vadd.f32 %v2313_v13, %v1742_v62  ;;  %v2319_v54 = vadd.f32 %v3519_v58, %v1645_v50  ;;  %v1904_v62 = vshrl.u32 %v1854_v31, 7 }
 0x1a2   :  { %v1870_v22 = vadd.f32 %v2311_v36, %v1869_v10  ;;  %v1942_v56 = vmul.f32 %v2311_v36, %v2311_v36  ;;  %v2317_v40 = vadd.f32 %v2316_v38, %v1744_v34  ;;  %v2695_v10 = vmov 1966171168  }
 0x1a3   :  { %v2246_v21 = vpack.c.bf16 %v2314_v53, %v2311_v36  ;;  %v1888_v42 = vadd.f32 %v2314_v53, %v1887_v19  ;;  %v1943_v2 = vmul.f32 %v2314_v53, %v2314_v53  ;;  %v2320_v3 = vadd.f32 %v2319_v54, %v1746_v52 }
 0x1a4   :  { %v1957_v15 = vadd.f32 %v1956_v23, %v1942_v56  ;;  %v1871_v0 = vadd.f32 %v2317_v40, %v1870_v22  ;;  %v1944_v28 = vmul.f32 %v2317_v40, %v2317_v40  ;;  %v1901_v8 = vunpack.c.l.s4 %v2695_v10 }
 0x1a5   :  { %1847 = vst [vmem:[%s3599_s2 + $0x50] sm:$0xff] %v2246_v21  ;;  %v1975_v48 = vadd.f32 %v1974_v30, %v1943_v2  ;;  %v2247_v25 = vpack.c.bf16 %v2320_v3, %v2317_v40  ;;  %v1889_v43 = vadd.f32 %v2320_v3, %v1888_v42  ;;  %v1945_v27 = vmul.f32 %v2320_v3, %v2320_v3  ;;  %v1649_v1 = vpop.f32.mrb[36].mxu1  ;;  %v1860_v2 = vld [vmem:[%s3597_s3] sm:$0x3] }
 0x1a6   :  { %v1750_v58 = vpop.f32.mrb[36].mxu0  ;;  %v1958_v59 = vadd.f32 %v1957_v15, %v1944_v28  ;;  %v2322_v5 = vadd.f32 %v3528_v11, %v1649_v1  ;;  %v1651_v17 = vpop.f32.mrb[37].mxu1  ;;  %v1902_v26 = vunpack.c.0.s8 %v1901_v8  ;;  %v1921_v15 = vld [vmem:[%s3598_s4] sm:$0x3] }
 0x1a7   :  { %v1752_v29 = vpop.f32.mrb[37].mxu0  ;;  %1848 = vst [vmem:[%s3599_s2 + $0x58] sm:$0xff] %v2247_v25  ;;  %v1976_v33 = vadd.f32 %v1975_v48, %v1945_v27  ;;  %v2325_v44 = vadd.f32 %v3532_v14, %v1651_v17  ;;  %v1653_v7 = vpop.f32.mrb[38].mxu1 }
 0x1a8   :  { %v1754_v37 = vpop.f32.mrb[38].mxu0  ;;  %v2323_v39 = vadd.f32 %v2322_v5, %v1750_v58  ;;  %v1654_v18 = vpop.f32.mrb[39].mxu1  ;;  %v1905_v53 = vsub.s32 %v1902_v26, %v1904_v62 }
 0x1a9   :  { %v1755_v45 = vpop.f32.mrb[39].mxu0  ;;  %v2326_v49 = vadd.f32 %v2325_v44, %v1752_v29 }
 0x1aa   :  { %v1872_v51 = vadd.f32 %v2323_v39, %v1871_v0  ;;  %v1946_v20 = vmul.f32 %v2323_v39, %v2323_v39 }
 0x1ab   :  { %v2248_v55 = vpack.c.bf16 %v2326_v49, %v2323_v39  ;;  %v1890_v57 = vadd.f32 %v2326_v49, %v1889_v43  ;;  %v1947_v11 = vmul.f32 %v2326_v49, %v2326_v49 }
 0x1ac   :  { %v1873_v61 = vrot.slane %v1872_v51, 4  ;;  %v1959_v63 = vadd.f32 %v1958_v59, %v1946_v20 }
 0x1ad   :  { %1849 = vst [vmem:[%s3599_s2 + $0x60] sm:$0xff] %v2248_v55  ;;  %v1891_v46 = vrot.slane %v1890_v57, 4  ;;  %v1977_v4 = vadd.f32 %v1976_v33, %v1947_v11 }
 0x1ae   :  { %v1874_v14 = vadd.f32 %v1873_v61, %v1872_v51  ;;  %v1960_v6 = vrot.slane %v1959_v63, 4 }
 0x1af   :  { %v1892_v9 = vadd.f32 %v1891_v46, %v1890_v57  ;;  %v1978_v12 = vrot.slane %v1977_v4, 4 }
 0x1b0   :  { %v1875_v16 = vrot.slane %v1874_v14, 2  ;;  %v1961_v19 = vadd.f32 %v1960_v6, %v1959_v63 }
 0x1b1   :  { %v1893_v47 = vrot.slane %v1892_v9, 2  ;;  %v1979_v60 = vadd.f32 %v1978_v12, %v1977_v4 }
 0x1b2   :  { %v1876_v41 = vadd.f32 %v1875_v16, %v1874_v14  ;;  %v1962_v23 = vrot.slane %v1961_v19, 2 }
 0x1b3   :  { %v1894_v24 = vadd.f32 %v1893_v47, %v1892_v9  ;;  %v1980_v30 = vrot.slane %v1979_v60, 2 }
 0x1b4   :  { %v1877_v13 = vrot.slane %v1876_v41, 1  ;;  %v1963_v32 = vadd.f32 %v1962_v23, %v1961_v19 }
 0x1b5   :  { %v1895_v34 = vrot.slane %v1894_v24, 1  ;;  %v1981_v36 = vadd.f32 %v1980_v30, %v1979_v60 }
 0x1b6   :  { %v1878_v38 = vadd.f32 %v1877_v13, %v1876_v41  ;;  %v1964_v50 = vrot.slane %v1963_v32, 1 }
 0x1b7   :  { %v1896_v52 = vadd.f32 %v1895_v34, %v1894_v24  ;;  %v1982_v54 = vrot.slane %v1981_v36, 1 }
 0x1b8   :  { %v1965_v22 = vadd.f32 %v1964_v50, %v1963_v32 }
 0x1b9   :  { %v1899_v56 = vcombine.low %v1878_v38, %v1896_v52  ;;  %v1983_v40 = vadd.f32 %v1982_v54, %v1981_v36 }
 0x1bb   :  { %v1906_v21 = vrot.slane %v1899_v56, %v1905_v53  ;;  %v1986_v42 = vcombine.low %v1965_v22, %v1983_v40 }
 0x1bd   :  { %v1913_v31 = vrot.slane %v1906_v21, %v1905_v53  ;;  %v1993_v3 = vrot.slane %v1986_v42, %v1905_v53 }
 0x1bf   :  { %v1915_v0 = vadd.f32 %v1913_v31, %v1860_v2  ;;  %v2000_v28 = vrot.slane %v1993_v3, %v1905_v53 }
 0x1c1   :  { %1920 = vst.msk [vmem:[%s3597_s3] sm:$0x3] %vm3459_vm0, %v1915_v0  ;;  %v2002_v48 = vadd.f32 %v2000_v28, %v1921_v15 }
 0x1c3   :  { %2003 = vst.msk [vmem:[%s3598_s4] sm:$0x3] %vm3459_vm0, %v2002_v48 }

// kernel: generator_forward.9
= control target key start
LH: loop header
LB: loop body
LE: loop exit
PB: predicated region body
PF: predicated region fallthrough
CT: control target
= control target key end

     0   :  { %s2333_s1 = inlined_call_operand.vmem [shape: bf16[512,640], index: 1, kind: input, shape index: {}]   ;;  %s2334_s0 = inlined_call_operand.vmem [shape: bf16[8,640], index: 0, kind: input, shape index: {}]   ;;  %s2335_s2 = inlined_call_operand.vmem [shape: f32[8,1], index: 2, kind: input, shape index: {}]   ;;  %s2336_s3 = inlined_call_operand.vmem [shape: bf16[8,512], index: 3, kind: output, shape index: {}]  }
   0x1   :  { %v1565_v0 = vld [vmem:[%s2333_s1 + $0x4] ss:$20 sps:$4 sm:$0xff]   ;;  %v1569_v2 = vld [vmem:[%s2333_s1] ss:$20 sps:$4 sm:$0xff]   ;;  %v1575_v6 = vld [vmem:[%s2333_s1 + $0x28] ss:$20 sps:$4 sm:$0xff]  }
   0x2   :  { %v1567_v1 = vld [vmem:[%s2333_s1 + $0x284] ss:$20 sps:$4 sm:$0xff]   ;;  %1066 = vmatprep.subr.bf16.mxu0 %v1565_v0  ;;  %v1570_v3 = vld [vmem:[%s2333_s1 + $0x280] ss:$20 sps:$4 sm:$0xff]   ;;  %v1576_v7 = vld [vmem:[%s2333_s1 + $0x2a8] ss:$20 sps:$4 sm:$0xff]  }
   0x3   :  { %1189 = vmatprep.subr.bf16.mxu1 %v1567_v1  ;;  %v1571_v4 = vld [vmem:[%s2333_s1 + $0x2c] ss:$20 sps:$4 sm:$0xff]   ;;  %1067 = vmatpush1.bf16.xpose.msra.mxu0 %v1569_v2  ;;  %v1577_v8 = vld [vmem:[%s2333_s1 + $0x54] ss:$20 sps:$4 sm:$0xff]   ;;  %v1581_v10 = vld [vmem:[%s2333_s1 + $0x50] ss:$20 sps:$4 sm:$0xff]  }
   0x4   :  { %1190 = vmatpush1.bf16.xpose.msra.mxu1 %v1570_v3  ;;  %v1573_v5 = vld [vmem:[%s2333_s1 + $0x2ac] ss:$20 sps:$4 sm:$0xff]   ;;  %1068 = vmatprep.subr.bf16.mxu0 %v1571_v4  ;;  %v1579_v9 = vld [vmem:[%s2333_s1 + $0x2d4] ss:$20 sps:$4 sm:$0xff]   ;;  %v1582_v11 = vld [vmem:[%s2333_s1 + $0x2d0] ss:$20 sps:$4 sm:$0xff]  }
   0x5   :  { %1191 = vmatprep.subr.bf16.mxu1 %v1573_v5  ;;  %v1583_v12 = vld [vmem:[%s2333_s1 + $0x7c] ss:$20 sps:$4 sm:$0xff]   ;;  %v1587_v14 = vld [vmem:[%s2333_s1 + $0x78] ss:$20 sps:$4 sm:$0xff]   ;;  %v1593_v18 = vld [vmem:[%s2333_s1 + $0xa0] ss:$20 sps:$4 sm:$0xff]  }
   0x6   :  { %v1585_v13 = vld [vmem:[%s2333_s1 + $0x2fc] ss:$20 sps:$4 sm:$0xff]   ;;  %v1588_v15 = vld [vmem:[%s2333_s1 + $0x2f8] ss:$20 sps:$4 sm:$0xff]   ;;  %v1594_v19 = vld [vmem:[%s2333_s1 + $0x320] ss:$20 sps:$4 sm:$0xff]  }
   0x7   :  { %v1589_v16 = vld [vmem:[%s2333_s1 + $0xa4] ss:$20 sps:$4 sm:$0xff]   ;;  %v1595_v20 = vld [vmem:[%s2333_s1 + $0xcc] ss:$20 sps:$4 sm:$0xff]   ;;  %v1599_v22 = vld [vmem:[%s2333_s1 + $0xc8] ss:$20 sps:$4 sm:$0xff]  }
   0x8   :  { %v1591_v17 = vld [vmem:[%s2333_s1 + $0x324] ss:$20 sps:$4 sm:$0xff]   ;;  %v1597_v21 = vld [vmem:[%s2333_s1 + $0x34c] ss:$20 sps:$4 sm:$0xff]   ;;  %v1600_v23 = vld [vmem:[%s2333_s1 + $0x348] ss:$20 sps:$4 sm:$0xff]  }
   0x9   :  { %v1601_v24 = vld [vmem:[%s2333_s1 + $0xf4] ss:$20 sps:$4 sm:$0xff]   ;;  %v1904_v26 = vld [vmem:[%s2334_s0] sm:$0xff]  ;;  %v1607_v30 = vld [vmem:[%s2333_s1 + $0x11c] ss:$20 sps:$4 sm:$0xff]  }
   0xa   :  { %v1603_v25 = vld [vmem:[%s2333_s1 + $0x374] ss:$20 sps:$4 sm:$0xff]   ;;  %v1339_v27 = vcombine.high %v1904_v26, %v1904_v26  ;;  %v1605_v28 = vld [vmem:[%s2333_s1 + $0xf0] ss:$20 sps:$4 sm:$0xff]   ;;  %v1611_v32 = vld [vmem:[%s2333_s1 + $0x118] ss:$20 sps:$4 sm:$0xff]   ;;  %v1338_v4 = vcombine.low %v1904_v26, %v1904_v26 }
   0xb   :  { %1069 = vmatpush1.bf16.xpose.msra.mxu0 %v1575_v6  ;;  %v1606_v29 = vld [vmem:[%s2333_s1 + $0x370] ss:$20 sps:$4 sm:$0xff]   ;;  %v1612_v33 = vld [vmem:[%s2333_s1 + $0x398] ss:$20 sps:$4 sm:$0xff]   ;;  %v1617_v36 = vld [vmem:[%s2333_s1 + $0x140] ss:$20 sps:$4 sm:$0xff]  }
   0xc   :  { %1192 = vmatpush1.bf16.xpose.msra.mxu1 %v1576_v7  ;;  %1070 = vmatprep.subr.bf16.mxu0 %v1577_v8  ;;  %v1609_v31 = vld [vmem:[%s2333_s1 + $0x39c] ss:$20 sps:$4 sm:$0xff]   ;;  %v1613_v34 = vld [vmem:[%s2333_s1 + $0x144] ss:$20 sps:$4 sm:$0xff]   ;;  %v1618_v37 = vld [vmem:[%s2333_s1 + $0x3c0] ss:$20 sps:$4 sm:$0xff]  }
   0xd   :  { %1193 = vmatprep.subr.bf16.mxu1 %v1579_v9  ;;  %1098 = vmatprep.mubr.bf16.mxu0 %v1339_v27  ;;  %v1615_v35 = vld [vmem:[%s2333_s1 + $0x3c4] ss:$20 sps:$4 sm:$0xff]   ;;  %v1619_v38 = vld [vmem:[%s2333_s1 + $0x16c] ss:$20 sps:$4 sm:$0xff]   ;;  %v1623_v40 = vld [vmem:[%s2333_s1 + $0x168] ss:$20 sps:$4 sm:$0xff]  }
   0xe   :  { %1221 = vmatprep.mubr.bf16.mxu1 %v1339_v27  ;;  %v1621_v39 = vld [vmem:[%s2333_s1 + $0x3ec] ss:$20 sps:$4 sm:$0xff]   ;;  %v1624_v41 = vld [vmem:[%s2333_s1 + $0x3e8] ss:$20 sps:$4 sm:$0xff]   ;;  %v1629_v44 = vld [vmem:[%s2333_s1 + $0x190] ss:$20 sps:$4 sm:$0xff]  }
   0xf   :  { %v1625_v42 = vld [vmem:[%s2333_s1 + $0x194] ss:$20 sps:$4 sm:$0xff]   ;;  %v1630_v45 = vld [vmem:[%s2333_s1 + $0x410] ss:$20 sps:$4 sm:$0xff]   ;;  %v1635_v48 = vld [vmem:[%s2333_s1 + $0x1b8] ss:$20 sps:$4 sm:$0xff]  }
  0x10   :  { %v1627_v43 = vld [vmem:[%s2333_s1 + $0x414] ss:$20 sps:$4 sm:$0xff]   ;;  %v1631_v46 = vld [vmem:[%s2333_s1 + $0x1bc] ss:$20 sps:$4 sm:$0xff]   ;;  %v1636_v49 = vld [vmem:[%s2333_s1 + $0x438] ss:$20 sps:$4 sm:$0xff]  }
  0x11   :  { %v1633_v47 = vld [vmem:[%s2333_s1 + $0x43c] ss:$20 sps:$4 sm:$0xff]   ;;  %v1637_v50 = vld [vmem:[%s2333_s1 + $0x1e4] ss:$20 sps:$4 sm:$0xff]   ;;  %v1641_v52 = vld [vmem:[%s2333_s1 + $0x1e0] ss:$20 sps:$4 sm:$0xff]  }
  0x12   :  { %v1639_v51 = vld [vmem:[%s2333_s1 + $0x464] ss:$20 sps:$4 sm:$0xff]   ;;  %v1642_v53 = vld [vmem:[%s2333_s1 + $0x460] ss:$20 sps:$4 sm:$0xff]   ;;  %v1647_v56 = vld [vmem:[%s2333_s1 + $0x208] ss:$20 sps:$4 sm:$0xff]  }
  0x13   :  { %1071 = vmatpush1.bf16.xpose.msra.mxu0 %v1581_v10  ;;  %v1643_v54 = vld [vmem:[%s2333_s1 + $0x20c] ss:$20 sps:$4 sm:$0xff]   ;;  %v1648_v57 = vld [vmem:[%s2333_s1 + $0x488] ss:$20 sps:$4 sm:$0xff]   ;;  %v1653_v60 = vld [vmem:[%s2333_s1 + $0x230] ss:$20 sps:$4 sm:$0xff]  }
  0x14   :  { %1194 = vmatpush1.bf16.xpose.msra.mxu1 %v1582_v11  ;;  %1072 = vmatprep.subr.bf16.mxu0 %v1583_v12  ;;  %v1645_v55 = vld [vmem:[%s2333_s1 + $0x48c] ss:$20 sps:$4 sm:$0xff]   ;;  %v1649_v58 = vld [vmem:[%s2333_s1 + $0x234] ss:$20 sps:$4 sm:$0xff]   ;;  %v1654_v61 = vld [vmem:[%s2333_s1 + $0x4b0] ss:$20 sps:$4 sm:$0xff]  }
  0x15   :  { %1195 = vmatprep.subr.bf16.mxu1 %v1585_v13  ;;  %v1651_v59 = vld [vmem:[%s2333_s1 + $0x4b4] ss:$20 sps:$4 sm:$0xff]   ;;  %v1655_v62 = vld [vmem:[%s2333_s1 + $0x25c] ss:$20 sps:$4 sm:$0xff]   ;;  %v1659_v0 = vld [vmem:[%s2333_s1 + $0x258] ss:$20 sps:$4 sm:$0xff]  }
  0x16   :  { %v1657_v63 = vld [vmem:[%s2333_s1 + $0x4dc] ss:$20 sps:$4 sm:$0xff]   ;;  %v1660_v1 = vld [vmem:[%s2333_s1 + $0x4d8] ss:$20 sps:$4 sm:$0xff]   ;;  %v1672_v8 = vld [vmem:[%s2333_s1 + $0x34] ss:$20 sps:$4 sm:$0xff]  }
  0x17   :  { %v1666_v2 = vld [vmem:[%s2333_s1 + $0xc] ss:$20 sps:$4 sm:$0xff]   ;;  %v1664_v6 = vld [vmem:[%s2333_s1 + $0x8] ss:$20 sps:$4 sm:$0xff]   ;;  %v1670_v11 = vld [vmem:[%s2333_s1 + $0x30] ss:$20 sps:$4 sm:$0xff]  }
  0x18   :  { %v1669_v3 = vld [vmem:[%s2333_s1 + $0x28c] ss:$20 sps:$4 sm:$0xff]   ;;  %v1667_v7 = vld [vmem:[%s2333_s1 + $0x288] ss:$20 sps:$4 sm:$0xff]   ;;  %v1673_v12 = vld [vmem:[%s2333_s1 + $0x2b0] ss:$20 sps:$4 sm:$0xff]  }
  0x19   :  { %v2033_v5 = vld [vmem:[%s2334_s0 + $0x8] sm:$0xff]  ;;  %v1678_v13 = vld [vmem:[%s2333_s1 + $0x5c] ss:$20 sps:$4 sm:$0xff]  }
  0x1a   :  { %v1675_v9 = vld [vmem:[%s2333_s1 + $0x2b4] ss:$20 sps:$4 sm:$0xff]   ;;  %v1341_v10 = vcombine.high %v2033_v5, %v2033_v5  ;;  %v1694_v27 = vld [vmem:[%s2333_s1 + $0xd0] ss:$20 sps:$4 sm:$0xff]  }
  0x1b   :  { %1073 = vmatpush1.bf16.xpose.msra.mxu0 %v1587_v14  ;;  %v1681_v14 = vld [vmem:[%s2333_s1 + $0x2dc] ss:$20 sps:$4 sm:$0xff]   ;;  %v1699_v26 = vld [vmem:[%s2333_s1 + $0x354] ss:$20 sps:$4 sm:$0xff]  }
  0x1c   :  { %1196 = vmatpush1.bf16.xpose.msra.mxu1 %v1588_v15  ;;  %1074 = vmatprep.subr.bf16.mxu0 %v1589_v16  ;;  %v1676_v15 = vld [vmem:[%s2333_s1 + $0x58] ss:$20 sps:$4 sm:$0xff]  }
  0x1d   :  { %1197 = vmatprep.subr.bf16.mxu1 %v1591_v17  ;;  %v1679_v16 = vld [vmem:[%s2333_s1 + $0x2d8] ss:$20 sps:$4 sm:$0xff]  }
  0x1e   :  { %v1684_v17 = vld [vmem:[%s2333_s1 + $0x84] ss:$20 sps:$4 sm:$0xff]  }
  0x23   :  { %1075 = vmatpush1.bf16.xpose.msra.mxu0 %v1593_v18  ;;  %v1687_v18 = vld [vmem:[%s2333_s1 + $0x304] ss:$20 sps:$4 sm:$0xff]  }
  0x24   :  { %1198 = vmatpush1.bf16.xpose.msra.mxu1 %v1594_v19  ;;  %1076 = vmatprep.subr.bf16.mxu0 %v1595_v20  ;;  %v1682_v19 = vld [vmem:[%s2333_s1 + $0x80] ss:$20 sps:$4 sm:$0xff]  }
  0x25   :  { %1199 = vmatprep.subr.bf16.mxu1 %v1597_v21  ;;  %v1685_v20 = vld [vmem:[%s2333_s1 + $0x300] ss:$20 sps:$4 sm:$0xff]  }
  0x26   :  { %v1690_v21 = vld [vmem:[%s2333_s1 + $0xac] ss:$20 sps:$4 sm:$0xff]  }
  0x2b   :  { %1077 = vmatpush1.bf16.xpose.msra.mxu0 %v1599_v22  ;;  %v1693_v22 = vld [vmem:[%s2333_s1 + $0x32c] ss:$20 sps:$4 sm:$0xff]  }
  0x2c   :  { %1200 = vmatpush1.bf16.xpose.msra.mxu1 %v1600_v23  ;;  %1078 = vmatprep.subr.bf16.mxu0 %v1601_v24  ;;  %v1688_v23 = vld [vmem:[%s2333_s1 + $0xa8] ss:$20 sps:$4 sm:$0xff]  }
  0x2d   :  { %1201 = vmatprep.subr.bf16.mxu1 %v1603_v25  ;;  %v1691_v24 = vld [vmem:[%s2333_s1 + $0x328] ss:$20 sps:$4 sm:$0xff]  }
  0x2e   :  { %v1696_v25 = vld [vmem:[%s2333_s1 + $0xd4] ss:$20 sps:$4 sm:$0xff]  }
  0x33   :  { %1079 = vmatpush1.bf16.xpose.msra.mxu0 %v1605_v28  ;;  %v1697_v28 = vld [vmem:[%s2333_s1 + $0x350] ss:$20 sps:$4 sm:$0xff]  }
  0x34   :  { %1202 = vmatpush1.bf16.xpose.msra.mxu1 %v1606_v29  ;;  %1080 = vmatprep.subr.bf16.mxu0 %v1607_v30  ;;  %v1702_v29 = vld [vmem:[%s2333_s1 + $0xfc] ss:$20 sps:$4 sm:$0xff]  }
  0x35   :  { %1203 = vmatprep.subr.bf16.mxu1 %v1609_v31  ;;  %v1705_v30 = vld [vmem:[%s2333_s1 + $0x37c] ss:$20 sps:$4 sm:$0xff]   ;;  %v1700_v31 = vld [vmem:[%s2333_s1 + $0xf8] ss:$20 sps:$4 sm:$0xff]  }
  0x3b   :  { %1081 = vmatpush1.bf16.xpose.msra.mxu0 %v1611_v32  ;;  %v1703_v32 = vld [vmem:[%s2333_s1 + $0x378] ss:$20 sps:$4 sm:$0xff]  }
  0x3c   :  { %1204 = vmatpush1.bf16.xpose.msra.mxu1 %v1612_v33  ;;  %1082 = vmatprep.subr.bf16.mxu0 %v1613_v34  ;;  %v1708_v33 = vld [vmem:[%s2333_s1 + $0x124] ss:$20 sps:$4 sm:$0xff]  }
  0x3d   :  { %1205 = vmatprep.subr.bf16.mxu1 %v1615_v35  ;;  %v1711_v34 = vld [vmem:[%s2333_s1 + $0x3a4] ss:$20 sps:$4 sm:$0xff]   ;;  %v1706_v35 = vld [vmem:[%s2333_s1 + $0x120] ss:$20 sps:$4 sm:$0xff]  }
  0x43   :  { %1083 = vmatpush1.bf16.xpose.msra.mxu0 %v1617_v36  ;;  %v1709_v36 = vld [vmem:[%s2333_s1 + $0x3a0] ss:$20 sps:$4 sm:$0xff]  }
  0x44   :  { %1206 = vmatpush1.bf16.xpose.msra.mxu1 %v1618_v37  ;;  %1084 = vmatprep.subr.bf16.mxu0 %v1619_v38  ;;  %v1714_v37 = vld [vmem:[%s2333_s1 + $0x14c] ss:$20 sps:$4 sm:$0xff]  }
  0x45   :  { %1207 = vmatprep.subr.bf16.mxu1 %v1621_v39  ;;  %v1717_v38 = vld [vmem:[%s2333_s1 + $0x3cc] ss:$20 sps:$4 sm:$0xff]   ;;  %v1712_v39 = vld [vmem:[%s2333_s1 + $0x148] ss:$20 sps:$4 sm:$0xff]  }
  0x4b   :  { %1085 = vmatpush1.bf16.xpose.msra.mxu0 %v1623_v40  ;;  %v1715_v40 = vld [vmem:[%s2333_s1 + $0x3c8] ss:$20 sps:$4 sm:$0xff]  }
  0x4c   :  { %1208 = vmatpush1.bf16.xpose.msra.mxu1 %v1624_v41  ;;  %1086 = vmatprep.subr.bf16.mxu0 %v1625_v42  ;;  %v1720_v41 = vld [vmem:[%s2333_s1 + $0x174] ss:$20 sps:$4 sm:$0xff]  }
  0x4d   :  { %1209 = vmatprep.subr.bf16.mxu1 %v1627_v43  ;;  %v1723_v42 = vld [vmem:[%s2333_s1 + $0x3f4] ss:$20 sps:$4 sm:$0xff]   ;;  %v210_v43 = vld [vmem:[%s2335_s2] sm:$0xff] }
  0x53   :  { %1087 = vmatpush1.bf16.xpose.msra.mxu0 %v1629_v44  ;;  %v1802_v44 = vmov 0  }
  0x54   :  { %1210 = vmatpush1.bf16.xpose.msra.mxu1 %v1630_v45  ;;  %1088 = vmatprep.subr.bf16.mxu0 %v1631_v46  ;;  %v1718_v45 = vld [vmem:[%s2333_s1 + $0x170] ss:$20 sps:$4 sm:$0xff]  }
  0x55   :  { %1211 = vmatprep.subr.bf16.mxu1 %v1633_v47  ;;  %1564 = vset.pattern.permute.xlu0 %v1802_v44  ;;  %v1721_v46 = vld [vmem:[%s2333_s1 + $0x3f0] ss:$20 sps:$4 sm:$0xff]  }
  0x56   :  { %213 = vperm.xlu0 %1564, %v210_v43   ;;  %v1726_v47 = vld [vmem:[%s2333_s1 + $0x19c] ss:$20 sps:$4 sm:$0xff]  }
  0x5b   :  { %1089 = vmatpush1.bf16.xpose.msra.mxu0 %v1635_v48  ;;  %v1729_v48 = vld [vmem:[%s2333_s1 + $0x41c] ss:$20 sps:$4 sm:$0xff]  }
  0x5c   :  { %1212 = vmatpush1.bf16.xpose.msra.mxu1 %v1636_v49  ;;  %1090 = vmatprep.subr.bf16.mxu0 %v1637_v50  ;;  %v1724_v49 = vld [vmem:[%s2333_s1 + $0x198] ss:$20 sps:$4 sm:$0xff]  }
  0x5d   :  { %1213 = vmatprep.subr.bf16.mxu1 %v1639_v51  ;;  %v1727_v50 = vld [vmem:[%s2333_s1 + $0x418] ss:$20 sps:$4 sm:$0xff]  }
  0x5e   :  { %v1732_v51 = vld [vmem:[%s2333_s1 + $0x1c4] ss:$20 sps:$4 sm:$0xff]  }
  0x63   :  { %1091 = vmatpush1.bf16.xpose.msra.mxu0 %v1641_v52  ;;  %v1735_v52 = vld [vmem:[%s2333_s1 + $0x444] ss:$20 sps:$4 sm:$0xff]  }
  0x64   :  { %1214 = vmatpush1.bf16.xpose.msra.mxu1 %v1642_v53  ;;  %1092 = vmatprep.subr.bf16.mxu0 %v1643_v54  ;;  %v1730_v53 = vld [vmem:[%s2333_s1 + $0x1c0] ss:$20 sps:$4 sm:$0xff]  }
  0x65   :  { %1215 = vmatprep.subr.bf16.mxu1 %v1645_v55  ;;  %v1733_v54 = vld [vmem:[%s2333_s1 + $0x440] ss:$20 sps:$4 sm:$0xff]  }
  0x66   :  { %v1738_v55 = vld [vmem:[%s2333_s1 + $0x1ec] ss:$20 sps:$4 sm:$0xff]  }
  0x6b   :  { %1093 = vmatpush1.bf16.xpose.msra.mxu0 %v1647_v56  ;;  %v1741_v56 = vld [vmem:[%s2333_s1 + $0x46c] ss:$20 sps:$4 sm:$0xff]  }
  0x6c   :  { %1216 = vmatpush1.bf16.xpose.msra.mxu1 %v1648_v57  ;;  %1094 = vmatprep.subr.bf16.mxu0 %v1649_v58  ;;  %v1736_v57 = vld [vmem:[%s2333_s1 + $0x1e8] ss:$20 sps:$4 sm:$0xff]  }
  0x6d   :  { %1217 = vmatprep.subr.bf16.mxu1 %v1651_v59  ;;  %v1739_v58 = vld [vmem:[%s2333_s1 + $0x468] ss:$20 sps:$4 sm:$0xff]  }
  0x6e   :  { %v1744_v59 = vld [vmem:[%s2333_s1 + $0x214] ss:$20 sps:$4 sm:$0xff]  }
  0x73   :  { %1095 = vmatpush1.bf16.xpose.msra.mxu0 %v1653_v60  ;;  %v1747_v60 = vld [vmem:[%s2333_s1 + $0x494] ss:$20 sps:$4 sm:$0xff]  }
  0x74   :  { %1218 = vmatpush1.bf16.xpose.msra.mxu1 %v1654_v61  ;;  %1096 = vmatprep.subr.bf16.mxu0 %v1655_v62  ;;  %v1742_v61 = vld [vmem:[%s2333_s1 + $0x210] ss:$20 sps:$4 sm:$0xff]  }
  0x75   :  { %1219 = vmatprep.subr.bf16.mxu1 %v1657_v63  ;;  %v1745_v62 = vld [vmem:[%s2333_s1 + $0x490] ss:$20 sps:$4 sm:$0xff]  }
  0x76   :  { %v1750_v63 = vld [vmem:[%s2333_s1 + $0x23c] ss:$20 sps:$4 sm:$0xff]  }
  0x7b   :  { %1097 = vmatpush1.bf16.xpose.msra.mxu0 %v1659_v0  ;;  %v1753_v0 = vld [vmem:[%s2333_s1 + $0x4bc] ss:$20 sps:$4 sm:$0xff]  }
  0x7c   :  { %1220 = vmatpush1.bf16.xpose.msra.mxu1 %v1660_v1  ;;  %1107 = vmatprep.subr.bf16.mxu0 %v1666_v2  ;;  %v1748_v1 = vld [vmem:[%s2333_s1 + $0x238] ss:$20 sps:$4 sm:$0xff]  }
  0x7d   :  { %1230 = vmatprep.subr.bf16.mxu1 %v1669_v3  ;;  %v1751_v2 = vld [vmem:[%s2333_s1 + $0x4b8] ss:$20 sps:$4 sm:$0xff]  }
  0x7e   :  { %v1756_v3 = vld [vmem:[%s2333_s1 + $0x264] ss:$20 sps:$4 sm:$0xff]  }
  0x82   :  { %1099 = vmatmul.mubr.bf16.vlgmr.msra.gmra.mrb[0].mxu0 %v1338_v4 }
  0x83   :  { %1222 = vmatmul.mubr.bf16.vlgmr.msra.gmra.mrb[0].mxu1 %v1338_v4  ;;  %1108 = vmatpush1.bf16.xpose.msra.mxu0 %v1664_v6  ;;  %v1759_v4 = vld [vmem:[%s2333_s1 + $0x4e4] ss:$20 sps:$4 sm:$0xff]   ;;  %v1754_v6 = vld [vmem:[%s2333_s1 + $0x260] ss:$20 sps:$4 sm:$0xff]  }
  0x84   :  { %1231 = vmatpush1.bf16.xpose.msra.mxu1 %v1667_v7  ;;  %1109 = vmatprep.subr.bf16.mxu0 %v1672_v8  ;;  %v1757_v7 = vld [vmem:[%s2333_s1 + $0x4e0] ss:$20 sps:$4 sm:$0xff]   ;;  %v1762_v8 = vld [vmem:[%s2333_s1 + $0x150] ss:$20 sps:$4 sm:$0xff]  }
  0x85   :  { %1232 = vmatprep.subr.bf16.mxu1 %v1675_v9  ;;  %1139 = vmatprep.mubr.bf16.mxu0 %v1341_v10  ;;  %v1763_v9 = vld [vmem:[%s2333_s1 + $0x3d0] ss:$20 sps:$4 sm:$0xff]  }
  0x86   :  { %1262 = vmatprep.mubr.bf16.mxu1 %v1341_v10  ;;  %v1340_v10 = vcombine.low %v2033_v5, %v2033_v5  ;;  %v1663_v5 = vld [vmem:[%s2334_s0 + $0x10] ss:$0 sps:$4 sm:$0xff]  }
  0x8b   :  { %1110 = vmatpush1.bf16.xpose.msra.mxu0 %v1670_v11  ;;  %v1764_v11 = vld [vmem:[%s2333_s1 + $0x10] ss:$20 sps:$4 sm:$0xff]  }
  0x8c   :  { %1233 = vmatpush1.bf16.xpose.msra.mxu1 %v1673_v12  ;;  %1111 = vmatprep.subr.bf16.mxu0 %v1678_v13  ;;  %v1765_v12 = vld [vmem:[%s2333_s1 + $0x290] ss:$20 sps:$4 sm:$0xff]   ;;  %v1766_v13 = vld [vmem:[%s2333_s1 + $0x178] ss:$20 sps:$4 sm:$0xff]  }
  0x8d   :  { %1234 = vmatprep.subr.bf16.mxu1 %v1681_v14  ;;  %v1767_v14 = vld [vmem:[%s2333_s1 + $0x3f8] ss:$20 sps:$4 sm:$0xff]  }
  0x93   :  { %1112 = vmatpush1.bf16.xpose.msra.mxu0 %v1676_v15  ;;  %v1768_v15 = vld [vmem:[%s2333_s1 + $0x38] ss:$20 sps:$4 sm:$0xff]  }
  0x94   :  { %1235 = vmatpush1.bf16.xpose.msra.mxu1 %v1679_v16  ;;  %1113 = vmatprep.subr.bf16.mxu0 %v1684_v17  ;;  %v1769_v16 = vld [vmem:[%s2333_s1 + $0x2b8] ss:$20 sps:$4 sm:$0xff]   ;;  %v1770_v17 = vld [vmem:[%s2333_s1 + $0x1a0] ss:$20 sps:$4 sm:$0xff]  }
  0x95   :  { %1236 = vmatprep.subr.bf16.mxu1 %v1687_v18  ;;  %v1771_v18 = vld [vmem:[%s2333_s1 + $0x420] ss:$20 sps:$4 sm:$0xff]  }
  0x9b   :  { %1114 = vmatpush1.bf16.xpose.msra.mxu0 %v1682_v19  ;;  %v1772_v19 = vld [vmem:[%s2333_s1 + $0x60] ss:$20 sps:$4 sm:$0xff]  }
  0x9c   :  { %1237 = vmatpush1.bf16.xpose.msra.mxu1 %v1685_v20  ;;  %1115 = vmatprep.subr.bf16.mxu0 %v1690_v21  ;;  %v1773_v20 = vld [vmem:[%s2333_s1 + $0x2e0] ss:$20 sps:$4 sm:$0xff]   ;;  %v1774_v21 = vld [vmem:[%s2333_s1 + $0x1c8] ss:$20 sps:$4 sm:$0xff]  }
  0x9d   :  { %1238 = vmatprep.subr.bf16.mxu1 %v1693_v22  ;;  %v1775_v22 = vld [vmem:[%s2333_s1 + $0x448] ss:$20 sps:$4 sm:$0xff]  }
  0xa3   :  { %1116 = vmatpush1.bf16.xpose.msra.mxu0 %v1688_v23  ;;  %v1776_v23 = vld [vmem:[%s2333_s1 + $0x88] ss:$20 sps:$4 sm:$0xff]  }
  0xa4   :  { %1239 = vmatpush1.bf16.xpose.msra.mxu1 %v1691_v24  ;;  %1117 = vmatprep.subr.bf16.mxu0 %v1696_v25  ;;  %v1777_v24 = vld [vmem:[%s2333_s1 + $0x308] ss:$20 sps:$4 sm:$0xff]   ;;  %v1778_v25 = vld [vmem:[%s2333_s1 + $0x1f0] ss:$20 sps:$4 sm:$0xff]  }
  0xa5   :  { %1240 = vmatprep.subr.bf16.mxu1 %v1699_v26  ;;  %v1779_v26 = vld [vmem:[%s2333_s1 + $0x470] ss:$20 sps:$4 sm:$0xff]  }
  0xab   :  { %1118 = vmatpush1.bf16.xpose.msra.mxu0 %v1694_v27  ;;  %v1780_v27 = vld [vmem:[%s2333_s1 + $0xb0] ss:$20 sps:$4 sm:$0xff]  }
  0xac   :  { %1241 = vmatpush1.bf16.xpose.msra.mxu1 %v1697_v28  ;;  %1119 = vmatprep.subr.bf16.mxu0 %v1702_v29  ;;  %v1781_v28 = vld [vmem:[%s2333_s1 + $0x330] ss:$20 sps:$4 sm:$0xff]   ;;  %v1782_v29 = vld [vmem:[%s2333_s1 + $0x218] ss:$20 sps:$4 sm:$0xff]  }
  0xad   :  { %1242 = vmatprep.subr.bf16.mxu1 %v1705_v30  ;;  %v1783_v30 = vld [vmem:[%s2333_s1 + $0x498] ss:$20 sps:$4 sm:$0xff]  }
  0xb3   :  { %1120 = vmatpush1.bf16.xpose.msra.mxu0 %v1700_v31  ;;  %v1784_v31 = vld [vmem:[%s2333_s1 + $0xd8] ss:$20 sps:$4 sm:$0xff]  }
  0xb4   :  { %1243 = vmatpush1.bf16.xpose.msra.mxu1 %v1703_v32  ;;  %1121 = vmatprep.subr.bf16.mxu0 %v1708_v33  ;;  %v1785_v32 = vld [vmem:[%s2333_s1 + $0x358] ss:$20 sps:$4 sm:$0xff]   ;;  %v1786_v33 = vld [vmem:[%s2333_s1 + $0x240] ss:$20 sps:$4 sm:$0xff]  }
  0xb5   :  { %1244 = vmatprep.subr.bf16.mxu1 %v1711_v34  ;;  %v1787_v34 = vld [vmem:[%s2333_s1 + $0x4c0] ss:$20 sps:$4 sm:$0xff]  }
  0xbb   :  { %1122 = vmatpush1.bf16.xpose.msra.mxu0 %v1706_v35  ;;  %v1788_v35 = vld [vmem:[%s2333_s1 + $0x100] ss:$20 sps:$4 sm:$0xff]  }
  0xbc   :  { %1245 = vmatpush1.bf16.xpose.msra.mxu1 %v1709_v36  ;;  %1123 = vmatprep.subr.bf16.mxu0 %v1714_v37  ;;  %v1789_v36 = vld [vmem:[%s2333_s1 + $0x380] ss:$20 sps:$4 sm:$0xff]   ;;  %v1790_v37 = vld [vmem:[%s2333_s1 + $0x268] ss:$20 sps:$4 sm:$0xff]  }
  0xbd   :  { %1246 = vmatprep.subr.bf16.mxu1 %v1717_v38  ;;  %v1791_v38 = vld [vmem:[%s2333_s1 + $0x4e8] ss:$20 sps:$4 sm:$0xff]  }
  0xc3   :  { %1124 = vmatpush1.bf16.xpose.msra.mxu0 %v1712_v39  ;;  %v1792_v39 = vld [vmem:[%s2333_s1 + $0x128] ss:$20 sps:$4 sm:$0xff]  }
  0xc4   :  { %1247 = vmatpush1.bf16.xpose.msra.mxu1 %v1715_v40  ;;  %1125 = vmatprep.subr.bf16.mxu0 %v1720_v41  ;;  %v1793_v40 = vld [vmem:[%s2333_s1 + $0x3a8] ss:$20 sps:$4 sm:$0xff]  }
  0xc5   :  { %1248 = vmatprep.subr.bf16.mxu1 %v1723_v42 }
  0xcb   :  { %1126 = vmatpush1.bf16.xpose.msra.mxu0 %v1718_v45 }
  0xcc   :  { %1249 = vmatpush1.bf16.xpose.msra.mxu1 %v1721_v46  ;;  %1127 = vmatprep.subr.bf16.mxu0 %v1726_v47 }
  0xcd   :  { %1250 = vmatprep.subr.bf16.mxu1 %v1729_v48 }
  0xd3   :  { %1128 = vmatpush1.bf16.xpose.msra.mxu0 %v1724_v49 }
  0xd4   :  { %1251 = vmatpush1.bf16.xpose.msra.mxu1 %v1727_v50  ;;  %1129 = vmatprep.subr.bf16.mxu0 %v1732_v51 }
  0xd5   :  { %1252 = vmatprep.subr.bf16.mxu1 %v1735_v52  ;;  %v214_v41 = vpop.permute.xlu0 %213 }
  0xdb   :  { %1130 = vmatpush1.bf16.xpose.msra.mxu0 %v1730_v53 }
  0xdc   :  { %1253 = vmatpush1.bf16.xpose.msra.mxu1 %v1733_v54  ;;  %1131 = vmatprep.subr.bf16.mxu0 %v1738_v55 }
  0xdd   :  { %1254 = vmatprep.subr.bf16.mxu1 %v1741_v56 }
  0xe3   :  { %1132 = vmatpush1.bf16.xpose.msra.mxu0 %v1736_v57 }
  0xe4   :  { %1255 = vmatpush1.bf16.xpose.msra.mxu1 %v1739_v58  ;;  %1133 = vmatprep.subr.bf16.mxu0 %v1744_v59 }
  0xe5   :  { %1256 = vmatprep.subr.bf16.mxu1 %v1747_v60 }
  0xeb   :  { %1134 = vmatpush1.bf16.xpose.msra.mxu0 %v1742_v61 }
  0xec   :  { %1257 = vmatpush1.bf16.xpose.msra.mxu1 %v1745_v62  ;;  %1135 = vmatprep.subr.bf16.mxu0 %v1750_v63 }
  0xed   :  { %1258 = vmatprep.subr.bf16.mxu1 %v1753_v0 }
  0xf3   :  { %1136 = vmatpush1.bf16.xpose.msra.mxu0 %v1748_v1 }
  0xf4   :  { %1259 = vmatpush1.bf16.xpose.msra.mxu1 %v1751_v2  ;;  %1137 = vmatprep.subr.bf16.mxu0 %v1756_v3 }
  0xf5   :  { %1260 = vmatprep.subr.bf16.mxu1 %v1759_v4 }
  0xfb   :  { %1138 = vmatpush1.bf16.xpose.msra.mxu0 %v1754_v6 }
  0xfc   :  { %1261 = vmatpush1.bf16.xpose.msra.mxu1 %v1757_v7  ;;  %1507 = vmatprep.subr.bf16.mxu0 %v1762_v8 }
  0xfd   :  { %1525 = vmatprep.subr.bf16.mxu1 %v1763_v9 }
 0x102   :  { %1140 = vmatmul.mubr.bf16.vlgmr.msra.gmra.mrb[0].mxu0 %v1340_v10 }
 0x103   :  { %1263 = vmatmul.mubr.bf16.vlgmr.msra.gmra.mrb[0].mxu1 %v1340_v10  ;;  %1508 = vmatpush3.bf16.xpose.msra.mxu0 %v1764_v11 }
 0x104   :  { %1526 = vmatpush3.bf16.xpose.msra.mxu1 %v1765_v12  ;;  %1509 = vmatprep.subr.bf16.mxu0 %v1766_v13 }
 0x105   :  { %1527 = vmatprep.subr.bf16.mxu1 %v1767_v14  ;;  %1523 = vmatprep.mubr.bf16.mxu0 %v1663_v5 }
 0x106   :  { %1541 = vmatprep.mubr.bf16.mxu1 %v1663_v5 }
 0x10b   :  { %1510 = vmatpush3.bf16.xpose.msra.mxu0 %v1768_v15 }
 0x10c   :  { %1528 = vmatpush3.bf16.xpose.msra.mxu1 %v1769_v16  ;;  %1511 = vmatprep.subr.bf16.mxu0 %v1770_v17 }
 0x10d   :  { %1529 = vmatprep.subr.bf16.mxu1 %v1771_v18 }
 0x113   :  { %1512 = vmatpush3.bf16.xpose.msra.mxu0 %v1772_v19 }
 0x114   :  { %1530 = vmatpush3.bf16.xpose.msra.mxu1 %v1773_v20  ;;  %1513 = vmatprep.subr.bf16.mxu0 %v1774_v21 }
 0x115   :  { %1531 = vmatprep.subr.bf16.mxu1 %v1775_v22 }
 0x11b   :  { %1514 = vmatpush3.bf16.xpose.msra.mxu0 %v1776_v23 }
 0x11c   :  { %1532 = vmatpush3.bf16.xpose.msra.mxu1 %v1777_v24  ;;  %1515 = vmatprep.subr.bf16.mxu0 %v1778_v25 }
 0x11d   :  { %1533 = vmatprep.subr.bf16.mxu1 %v1779_v26 }
 0x123   :  { %1516 = vmatpush3.bf16.xpose.msra.mxu0 %v1780_v27 }
 0x124   :  { %1534 = vmatpush3.bf16.xpose.msra.mxu1 %v1781_v28  ;;  %1517 = vmatprep.subr.bf16.mxu0 %v1782_v29 }
 0x125   :  { %1535 = vmatprep.subr.bf16.mxu1 %v1783_v30 }
 0x12b   :  { %1518 = vmatpush3.bf16.xpose.msra.mxu0 %v1784_v31 }
 0x12c   :  { %1536 = vmatpush3.bf16.xpose.msra.mxu1 %v1785_v32  ;;  %1519 = vmatprep.subr.bf16.mxu0 %v1786_v33 }
 0x12d   :  { %1537 = vmatprep.subr.bf16.mxu1 %v1787_v34 }
 0x133   :  { %1520 = vmatpush3.bf16.xpose.msra.mxu0 %v1788_v35 }
 0x134   :  { %1538 = vmatpush3.bf16.xpose.msra.mxu1 %v1789_v36  ;;  %1521 = vmatprep.subr.bf16.mxu0 %v1790_v37 }
 0x135   :  { %1539 = vmatprep.subr.bf16.mxu1 %v1791_v38 }
 0x13b   :  { %1522 = vmatpush3.bf16.xpose.msra.mxu0 %v1792_v39 }
 0x13c   :  { %1540 = vmatpush3.bf16.xpose.msra.mxu1 %v1793_v40 }
 0x142   :  { %1524 = vmatmul.mubr.bf16.vlgmr.msra.gmra.mrb[0].mxu0 %v1663_v5 }
 0x143   :  { %1542 = vmatmul.mubr.bf16.vlgmr.msra.gmra.mrb[0].mxu1 %v1663_v5 }
 0x215   :  { %v1182_v42 = vpop.f32.mrb[0].mxu0 }
 0x216   :  { %v1305_v43 = vpop.f32.mrb[0].mxu1  ;;  %v1543_v44 = vadd.f32 %v1182_v42, %v214_v41  ;;  %v1184_v46 = vpop.f32.mrb[1].mxu0 }
 0x217   :  { %v1545_v45 = vadd.f32 %v1305_v43, %v214_v41  ;;  %v1307_v47 = vpop.f32.mrb[1].mxu1  ;;  %v1544_v48 = vadd.f32 %v1184_v46, %v214_v41  ;;  %v1186_v50 = vpop.f32.mrb[2].mxu0 }
 0x218   :  { %v1546_v49 = vadd.f32 %v1307_v47, %v214_v41  ;;  %v1309_v51 = vpop.f32.mrb[2].mxu1  ;;  %1794 = vtanh.f32 %v1543_v44  ;;  %v1187_v52 = vpop.f32.mrb[3].mxu0 }
 0x219   :  { %v1310_v53 = vpop.f32.mrb[3].mxu1  ;;  %1796 = vtanh.f32 %v1545_v45 }
 0x21a   :  { %1798 = vtanh.f32 %v1544_v48 }
 0x21b   :  { %1800 = vtanh.f32 %v1546_v49 }
 0x222   :  { %v1795_v54 = vpop.eup %1794 }
 0x223   :  { %v1797_v55 = vpop.eup %1796 }
 0x224   :  { %v1799_v56 = vpop.eup %1798 }
 0x225   :  { %v1801_v57 = vpop.eup %1800  ;;  %v1505_v58 = vpack.c.bf16 %v1799_v56, %v1795_v54 }
 0x226   :  { %v1506_v59 = vpack.c.bf16 %v1801_v57, %v1797_v55 }
 0x227   :  { %1332 = vst [vmem:[%s2336_s3] sm:$0xff] %v1505_v58 }
 0x228   :  { %1333 = vst [vmem:[%s2336_s3 + $0x8] sm:$0xff] %v1506_v59 }

</bundles_post_ra>
